<compile_context>
chip_gen: v7x
topology: tpu7x:2x2x1
jax: 0.10.0
libtpu: 0.0.40
codegen_flags: <defaults>
</compile_context>

<pallas_src>
import functools

import numpy as np
import jax
import jax.numpy as jnp
from jax import lax
from jax.experimental import pallas as pl
from jax.experimental.pallas import tpu as pltpu


def _layernorm(x, g, b, eps=1e-5):
    m = jnp.mean(x, axis=-1, keepdims=True)
    v = jnp.mean((x - m) ** 2, axis=-1, keepdims=True)
    return (x - m) * lax.rsqrt(v + eps) * g + b


def sentence_encoder_kernel(embs_ref, len_ref,
                            wih_ref, bx_ref, whh_ref, bhh_ref,
                            g1_ref, be1_ref, g2_ref, be2_ref,
                            out_ref, h_ref, hn_ref,
                            gx_ref):
    """Fused bidirectional GRU + LayerNorms.

    embs_ref : (T*B, Dp)  bf16  time-major, flattened (t, b) rows, lane-padded Din
    len_ref  : (B, 1)     int32 clamped lengths (>= 1)
    wih_ref  : (Dp, 6H)   bf16  [W_ih_fwd^T | W_ih_bwd^T]   (zero rows in the pad)
    bx_ref   : (1, 6H)    f32   [b_ih_fwd | b_ih_bwd]
    whh_ref  : (2H, 6H)   bf16  block-diag [[W_hh_fwd^T, 0], [0, W_hh_bwd^T]]
    bhh_ref  : (1, 6H)    f32   [b_hh_fwd | b_hh_bwd]
    out_ref  : (T, B, E)  f32   norm1(padded GRU sequence output)
    h_ref    : (B, E)     f32   concat of norm2'd final fwd/bwd hidden
    hn_ref   : (2, B, H)  f32   norm2'd final hidden per direction
    gx_ref   : (T*B, 6H)  f32   scratch: precomputed input projections
    """
    T, B, E = out_ref.shape
    H = E // 2
    G = 3 * H
    eps = 1e-5

    # ---- Input projection for BOTH directions, hoisted off the recurrence ----
    # One bf16 MXU matmul with f32 accumulation; bias_ih folded in here so the
    # time loop only carries the truly recurrent work.
    gx_ref[...] = jnp.dot(embs_ref[...], wih_ref[...],
                          preferred_element_type=jnp.float32) + bx_ref[...]

    lens = len_ref[...]                                   # (B, 1) int32
    bhh = jnp.broadcast_to(bhh_ref[...], (B, 2 * G))      # hoisted broadcast

    # TODO(synk): h_0 != None is not supported; initial hidden is zeros (h_0=None path).
    h_f = jnp.zeros((B, H), jnp.float32)
    h_b = jnp.zeros((B, H), jnp.float32)

    # Fused fwd/bwd recurrence, statically unrolled (T small & fixed).  Each
    # step: ONE (B, 2H) @ (2H, 6H) recurrent matmul through the block-diagonal
    # whh, then full-vreg gate math for both directions.
    for s in range(T):
        t_f = s
        t_b = T - 1 - s
        gx_f = gx_ref[t_f * B:(t_f + 1) * B, 0:G]          # (B, 3H) fwd @ t_f
        gx_b = gx_ref[t_b * B:(t_b + 1) * B, G:2 * G]      # (B, 3H) bwd @ t_b

        h_cat = jnp.concatenate([h_f, h_b], axis=-1).astype(jnp.bfloat16)
        gh = jnp.dot(h_cat, whh_ref[...],
                     preferred_element_type=jnp.float32) + bhh      # (B, 6H)

        # PyTorch gate order [r, z, n];  n = tanh(gx_n + r * (W_hn h + b_hn)).
        r_f = jax.nn.sigmoid(gx_f[:, 0:H] + gh[:, 0:H])
        z_f = jax.nn.sigmoid(gx_f[:, H:2 * H] + gh[:, H:2 * H])
        n_f = jnp.tanh(gx_f[:, 2 * H:G] + r_f * gh[:, 2 * H:G])
        hf_new = (1.0 - z_f) * n_f + z_f * h_f

        r_b = jax.nn.sigmoid(gx_b[:, 0:H] + gh[:, G:G + H])
        z_b = jax.nn.sigmoid(gx_b[:, H:2 * H] + gh[:, G + H:G + 2 * H])
        n_b = jnp.tanh(gx_b[:, 2 * H:G] + r_b * gh[:, G + 2 * H:2 * G])
        hb_new = (1.0 - z_b) * n_b + z_b * h_b

        valid_f = lens > t_f                               # (B, 1) bool
        valid_b = lens > t_b

        # pad_packed_sequence semantics: positions past a sequence's length are
        # zero in the (pre-norm) GRU output.
        out_ref[t_f, :, 0:H] = jnp.where(valid_f, hf_new, 0.0)
        out_ref[t_b, :, H:E] = jnp.where(valid_b, hb_new, 0.0)

        # Hidden state freezes once t >= length (packed-sequence semantics);
        # for the bwd direction this makes each sequence start at its own last
        # valid token.
        h_f = jnp.where(valid_f, hf_new, h_f)
        h_b = jnp.where(valid_b, hb_new, h_b)

    # ---- norm1: LayerNorm over E on the padded sequence output (in place) ----
    pre = out_ref[...]                                     # (T, B, E)
    m = jnp.mean(pre, axis=-1, keepdims=True)
    v = jnp.mean((pre - m) ** 2, axis=-1, keepdims=True)
    out_ref[...] = (pre - m) * lax.rsqrt(v + eps) * g1_ref[...] + be1_ref[...]

    # ---- norm2: LayerNorm over H on the final hidden of each direction ----
    g2 = g2_ref[...]
    be2 = be2_ref[...]
    hf_n = _layernorm(h_f, g2, be2, eps)
    hb_n = _layernorm(h_b, g2, be2, eps)
    hn_ref[0] = hf_n
    hn_ref[1] = hb_n
    h_ref[:, 0:H] = hf_n
    h_ref[:, H:E] = hb_n


def make_params(key, embedding_dim=256, input_dim=300):
    """PyTorch-equivalent initialization of nn.GRU / nn.LayerNorm parameters."""
    H = embedding_dim // 2
    k = 1.0 / np.sqrt(H)
    ks = jax.random.split(key, 8)

    def u(kk, shape):
        return jax.random.uniform(kk, shape, jnp.float32, minval=-k, maxval=k)

    return {
        # forward direction
        "weight_ih_l0": u(ks[0], (3 * H, input_dim)),
        "weight_hh_l0": u(ks[1], (3 * H, H)),
        "bias_ih_l0": u(ks[2], (3 * H,)),
        "bias_hh_l0": u(ks[3], (3 * H,)),
        # reverse direction
        "weight_ih_l0_reverse": u(ks[4], (3 * H, input_dim)),
        "weight_hh_l0_reverse": u(ks[5], (3 * H, H)),
        "bias_ih_l0_reverse": u(ks[6], (3 * H,)),
        "bias_hh_l0_reverse": u(ks[7], (3 * H,)),
        # LayerNorm defaults: weight=1, bias=0
        "norm1_w": jnp.ones((embedding_dim,), jnp.float32),
        "norm1_b": jnp.zeros((embedding_dim,), jnp.float32),
        "norm2_w": jnp.ones((H,), jnp.float32),
        "norm2_b": jnp.zeros((H,), jnp.float32),
    }


def fuse_params(p, matmul_dtype=jnp.bfloat16):
    """Pack per-direction GRU weights into the fused kernel layout.

    Matmul operands are cast to bf16 (f32 accumulation in-kernel); all biases,
    LayerNorm params and gate math stay f32.  The Din contraction dim of wih is
    zero-padded to a lane multiple so the projection matmul is tile-aligned.
    """
    H = p["weight_hh_l0"].shape[1]
    G = 3 * H
    Din = p["weight_ih_l0"].shape[1]
    Dp = ((Din + 127) // 128) * 128

    wih = jnp.concatenate(
        [p["weight_ih_l0"].T, p["weight_ih_l0_reverse"].T], axis=1)      # (Din, 6H)
    wih = jnp.pad(wih, ((0, Dp - Din), (0, 0)))                          # (Dp, 6H)

    z = jnp.zeros((H, G), jnp.float32)
    whh = jnp.concatenate([
        jnp.concatenate([p["weight_hh_l0"].T, z], axis=1),
        jnp.concatenate([z, p["weight_hh_l0_reverse"].T], axis=1),
    ], axis=0)                                                           # (2H, 6H)

    bx = jnp.concatenate([p["bias_ih_l0"], p["bias_ih_l0_reverse"]])[None, :]
    bhh = jnp.concatenate([p["bias_hh_l0"], p["bias_hh_l0_reverse"]])[None, :]

    return {
        "wih": wih.astype(matmul_dtype),
        "whh": whh.astype(matmul_dtype),
        "bx": bx.astype(jnp.float32),
        "bhh": bhh.astype(jnp.float32),
        "g1": p["norm1_w"][None, :].astype(jnp.float32),
        "be1": p["norm1_b"][None, :].astype(jnp.float32),
        "g2": p["norm2_w"][None, :].astype(jnp.float32),
        "be2": p["norm2_b"][None, :].astype(jnp.float32),
    }


def sentence_encoder_forward(embs, lengths, fused, embedding_dim=256):
    """Jit-compatible forward.  Returns (output (B,T,E), h (B,E), h_n (2,B,H)).

    pad_packed_sequence's truncation of `output` to the max (clamped) length is
    left to the caller (host side) so there is no device->host sync here.
    """
    B, T, Din = embs.shape
    E = embedding_dim
    H = E // 2
    Bp = ((B + 7) // 8) * 8          # pad batch to a full 8-sublane vreg
    Dp = fused["wih"].shape[0]       # lane-padded Din

    # lengths[lengths == 0] = 1 (PyTorch forward does this before packing).
    lens = jnp.maximum(lengths.astype(jnp.int32), 1)
    lens = jnp.pad(lens, (0, Bp - B), constant_values=1).reshape(Bp, 1)

    # Time-major, batch + feature padded, flattened (t, b) rows, bf16 operand.
    x = jnp.transpose(embs, (1, 0, 2))                     # (T, B, Din)
    x = jnp.pad(x, ((0, 0), (0, Bp - B), (0, Dp - Din)))   # (T, Bp, Dp)
    x2d = x.reshape(T * Bp, Dp).astype(jnp.bfloat16)

    vmem = pl.BlockSpec(memory_space=pltpu.MemorySpace.VMEM)
    out_tbe, h, h_n = pl.pallas_call(
        sentence_encoder_kernel,
        out_shape=(
            jax.ShapeDtypeStruct((T, Bp, E), jnp.float32),
            jax.ShapeDtypeStruct((Bp, E), jnp.float32),
            jax.ShapeDtypeStruct((2, Bp, H), jnp.float32),
        ),
        in_specs=[vmem] * 10,
        out_specs=(vmem, vmem, vmem),
        scratch_shapes=[pltpu.VMEM((T * Bp, 6 * H), jnp.float32)],
    )(x2d, lens,
      fused["wih"], fused["bx"], fused["whh"], fused["bhh"],
      fused["g1"], fused["be1"], fused["g2"], fused["be2"])

    output = jnp.transpose(out_tbe[:, :B], (1, 0, 2))      # (B, T, E)
    return output, h[:B], h_n[:, :B]


if __name__ == "__main__":
    key = jax.random.PRNGKey(0)
    k_emb, k_par = jax.random.split(key)

    B, T, Din, E = 4, 8, 300, 256          # embedding_dim=256 -> H=128 per direction
    embs = jax.random.normal(k_emb, (B, T, Din), jnp.float32)
    lengths_np = np.array([8, 5, 0, 3], np.int32)   # includes a 0 to exercise the clamp
    lengths = jnp.asarray(lengths_np)

    params = make_params(k_par, embedding_dim=E, input_dim=Din)
    fused = fuse_params(params)

    fwd = jax.jit(functools.partial(sentence_encoder_forward, embedding_dim=E))
    output, h, h_n = fwd(embs, lengths, fused)
    jax.block_until_ready((output, h, h_n))

    # pad_packed_sequence truncation, computed from host-side lengths (no sync).
    t_out = int(np.maximum(lengths_np, 1).max())
    output = output[:, :t_out]

    assert output.shape == (B, t_out, E)
    assert h.shape == (B, E)
    assert h_n.shape == (2, B, E // 2)
    assert bool(jnp.all(jnp.isfinite(output))) and bool(jnp.all(jnp.isfinite(h)))
    print("KERNEL_OK")
</pallas_src>

<mosaic_0001>
module attributes {stable_mosaic.version = 11 : i64} {
  func.func @sentence_encoder_kernel(%arg0: memref<64x384xbf16, #tpu.memory_space<vmem>>, %arg1: memref<8x1xi32, #tpu.memory_space<vmem>>, %arg2: memref<384x768xbf16, #tpu.memory_space<vmem>>, %arg3: memref<1x768xf32, #tpu.memory_space<vmem>>, %arg4: memref<256x768xbf16, #tpu.memory_space<vmem>>, %arg5: memref<1x768xf32, #tpu.memory_space<vmem>>, %arg6: memref<1x256xf32, #tpu.memory_space<vmem>>, %arg7: memref<1x256xf32, #tpu.memory_space<vmem>>, %arg8: memref<1x128xf32, #tpu.memory_space<vmem>>, %arg9: memref<1x128xf32, #tpu.memory_space<vmem>>, %arg10: memref<8x8x256xf32, #tpu.memory_space<vmem>>, %arg11: memref<8x256xf32, #tpu.memory_space<vmem>>, %arg12: memref<2x8x128xf32, #tpu.memory_space<vmem>>, %arg13: memref<64x768xf32, #tpu.memory_space<vmem>>) attributes {dimension_semantics = [], scalar_prefetch = 0 : i64, scratch_operands = 1 : i64, tpu.core_type = #tpu.core_type<tc>} {
    %c0 = arith.constant 0 : index
    %c0_0 = arith.constant 0 : index
    %0 = vector.load %arg0[%c0, %c0_0] : memref<64x384xbf16, #tpu.memory_space<vmem>>, vector<64x384xbf16>
    %c0_1 = arith.constant 0 : index
    %c0_2 = arith.constant 0 : index
    %1 = vector.load %arg2[%c0_1, %c0_2] : memref<384x768xbf16, #tpu.memory_space<vmem>>, vector<384x768xbf16>
    %cst = arith.constant dense<0.000000e+00> : vector<64x768xf32>
    %2 = tpu.matmul %0, %1, %cst {dimension_numbers = #tpu.dot_dimension_numbers<[1], [0], [0], [1], [0, 0, 1, 1], [], []>} : vector<64x384xbf16>, vector<384x768xbf16>, vector<64x768xf32> -> vector<64x768xf32>
    %c0_3 = arith.constant 0 : index
    %c0_4 = arith.constant 0 : index
    %3 = vector.load %arg3[%c0_3, %c0_4] : memref<1x768xf32, #tpu.memory_space<vmem>>, vector<1x768xf32>
    %4 = vector.broadcast %3 : vector<1x768xf32> to vector<64x768xf32>
    %5 = arith.addf %2, %4 : vector<64x768xf32>
    %c0_5 = arith.constant 0 : index
    %c0_6 = arith.constant 0 : index
    %6 = vector.load %arg13[%c0_5, %c0_6] : memref<64x768xf32, #tpu.memory_space<vmem>>, vector<64x768xf32>
    tpu.vector_store %arg13[%c0_5, %c0_6], %5 {strides = array<i32>} : memref<64x768xf32, #tpu.memory_space<vmem>>, vector<64x768xf32>,
    %c0_7 = arith.constant 0 : index
    %c0_8 = arith.constant 0 : index
    %7 = vector.load %arg1[%c0_7, %c0_8] : memref<8x1xi32, #tpu.memory_space<vmem>>, vector<8x1xi32>
    %c0_9 = arith.constant 0 : index
    %c0_10 = arith.constant 0 : index
    %8 = vector.load %arg5[%c0_9, %c0_10] : memref<1x768xf32, #tpu.memory_space<vmem>>, vector<1x768xf32>
    %9 = vector.shape_cast %8 : vector<1x768xf32> to vector<1x768xf32>
    %10 = vector.broadcast %9 : vector<1x768xf32> to vector<8x768xf32>
    %cst_11 = arith.constant 0.000000e+00 : f32
    %11 = vector.broadcast %cst_11 : f32 to vector<8x128xf32>
    %cst_12 = arith.constant 0.000000e+00 : f32
    %12 = vector.broadcast %cst_12 : f32 to vector<8x128xf32>
    %c0_13 = arith.constant 0 : index
    %c0_14 = arith.constant 0 : index
    %13 = vector.load %arg13[%c0_13, %c0_14] : memref<64x768xf32, #tpu.memory_space<vmem>>, vector<8x384xf32>
    %c56 = arith.constant 56 : index
    %c384 = arith.constant 384 : index
    %14 = vector.load %arg13[%c56, %c384] : memref<64x768xf32, #tpu.memory_space<vmem>>, vector<8x384xf32>
    %15 = tpu.concatenate %11, %12 in 1 : vector<8x128xf32>, vector<8x128xf32> -> vector<8x256xf32>
    %16 = arith.truncf %15 : vector<8x256xf32> to vector<8x256xbf16>
    %c0_15 = arith.constant 0 : index
    %c0_16 = arith.constant 0 : index
    %17 = vector.load %arg4[%c0_15, %c0_16] : memref<256x768xbf16, #tpu.memory_space<vmem>>, vector<256x768xbf16>
    %cst_17 = arith.constant dense<0.000000e+00> : vector<8x768xf32>
    %18 = tpu.matmul %16, %17, %cst_17 {dimension_numbers = #tpu.dot_dimension_numbers<[1], [0], [0], [1], [0, 0, 1, 1], [], []>} : vector<8x256xbf16>, vector<256x768xbf16>, vector<8x768xf32> -> vector<8x768xf32>
    %19 = arith.addf %18, %10 : vector<8x768xf32>
    %20 = vector.extract_strided_slice %13 {offsets = [0, 0], sizes = [8, 128], strides = [1, 1]} : vector<8x384xf32> to vector<8x128xf32>
    %21 = vector.extract_strided_slice %19 {offsets = [0, 0], sizes = [8, 128], strides = [1, 1]} : vector<8x768xf32> to vector<8x128xf32>
    %22 = arith.addf %20, %21 : vector<8x128xf32>
    %23 = arith.negf %22 : vector<8x128xf32>
    %24 = math.exp %23 : vector<8x128xf32>
    %cst_18 = arith.constant 1.000000e+00 : f32
    %25 = vector.broadcast %cst_18 : f32 to vector<8x128xf32>
    %26 = arith.addf %25, %24 : vector<8x128xf32>
    %27 = arith.divf %25, %26 : vector<8x128xf32>
    %28 = vector.extract_strided_slice %13 {offsets = [0, 128], sizes = [8, 128], strides = [1, 1]} : vector<8x384xf32> to vector<8x128xf32>
    %29 = vector.extract_strided_slice %19 {offsets = [0, 128], sizes = [8, 128], strides = [1, 1]} : vector<8x768xf32> to vector<8x128xf32>
    %30 = arith.addf %28, %29 : vector<8x128xf32>
    %31 = arith.negf %30 : vector<8x128xf32>
    %32 = math.exp %31 : vector<8x128xf32>
    %cst_19 = arith.constant 1.000000e+00 : f32
    %33 = vector.broadcast %cst_19 : f32 to vector<8x128xf32>
    %34 = arith.addf %33, %32 : vector<8x128xf32>
    %35 = arith.divf %33, %34 : vector<8x128xf32>
    %36 = vector.extract_strided_slice %13 {offsets = [0, 256], sizes = [8, 128], strides = [1, 1]} : vector<8x384xf32> to vector<8x128xf32>
    %37 = vector.extract_strided_slice %19 {offsets = [0, 256], sizes = [8, 128], strides = [1, 1]} : vector<8x768xf32> to vector<8x128xf32>
    %38 = arith.mulf %27, %37 : vector<8x128xf32>
    %39 = arith.addf %36, %38 : vector<8x128xf32>
    %40 = math.tanh %39 : vector<8x128xf32>
    %cst_20 = arith.constant 1.000000e+00 : f32
    %41 = vector.broadcast %cst_20 : f32 to vector<8x128xf32>
    %42 = arith.subf %41, %35 : vector<8x128xf32>
    %43 = arith.mulf %42, %40 : vector<8x128xf32>
    %44 = arith.mulf %35, %11 : vector<8x128xf32>
    %45 = arith.addf %43, %44 : vector<8x128xf32>
    %46 = vector.extract_strided_slice %14 {offsets = [0, 0], sizes = [8, 128], strides = [1, 1]} : vector<8x384xf32> to vector<8x128xf32>
    %47 = vector.extract_strided_slice %19 {offsets = [0, 384], sizes = [8, 128], strides = [1, 1]} : vector<8x768xf32> to vector<8x128xf32>
    %48 = arith.addf %46, %47 : vector<8x128xf32>
    %49 = arith.negf %48 : vector<8x128xf32>
    %50 = math.exp %49 : vector<8x128xf32>
    %cst_21 = arith.constant 1.000000e+00 : f32
    %51 = vector.broadcast %cst_21 : f32 to vector<8x128xf32>
    %52 = arith.addf %51, %50 : vector<8x128xf32>
    %53 = arith.divf %51, %52 : vector<8x128xf32>
    %54 = vector.extract_strided_slice %14 {offsets = [0, 128], sizes = [8, 128], strides = [1, 1]} : vector<8x384xf32> to vector<8x128xf32>
    %55 = vector.extract_strided_slice %19 {offsets = [0, 512], sizes = [8, 128], strides = [1, 1]} : vector<8x768xf32> to vector<8x128xf32>
    %56 = arith.addf %54, %55 : vector<8x128xf32>
    %57 = arith.negf %56 : vector<8x128xf32>
    %58 = math.exp %57 : vector<8x128xf32>
    %cst_22 = arith.constant 1.000000e+00 : f32
    %59 = vector.broadcast %cst_22 : f32 to vector<8x128xf32>
    %60 = arith.addf %59, %58 : vector<8x128xf32>
    %61 = arith.divf %59, %60 : vector<8x128xf32>
    %62 = vector.extract_strided_slice %14 {offsets = [0, 256], sizes = [8, 128], strides = [1, 1]} : vector<8x384xf32> to vector<8x128xf32>
    %63 = vector.extract_strided_slice %19 {offsets = [0, 640], sizes = [8, 128], strides = [1, 1]} : vector<8x768xf32> to vector<8x128xf32>
    %64 = arith.mulf %53, %63 : vector<8x128xf32>
    %65 = arith.addf %62, %64 : vector<8x128xf32>
    %66 = math.tanh %65 : vector<8x128xf32>
    %cst_23 = arith.constant 1.000000e+00 : f32
    %67 = vector.broadcast %cst_23 : f32 to vector<8x128xf32>
    %68 = arith.subf %67, %61 : vector<8x128xf32>
    %69 = arith.mulf %68, %66 : vector<8x128xf32>
    %70 = arith.mulf %61, %12 : vector<8x128xf32>
    %71 = arith.addf %69, %70 : vector<8x128xf32>
    %c0_i32 = arith.constant 0 : i32
    %72 = vector.broadcast %c0_i32 : i32 to vector<8x1xi32>
    %73 = arith.cmpi sgt, %7, %72 : vector<8x1xi32>
    %c7_i32 = arith.constant 7 : i32
    %74 = vector.broadcast %c7_i32 : i32 to vector<8x1xi32>
    %75 = arith.cmpi sgt, %7, %74 : vector<8x1xi32>
    %cst_24 = arith.constant 0.000000e+00 : f32
    %76 = vector.shape_cast %73 : vector<8x1xi1> to vector<8x1xi1>
    %77 = vector.broadcast %76 : vector<8x1xi1> to vector<8x128xi1>
    %78 = vector.broadcast %cst_24 : f32 to vector<8x128xf32>
    %79 = arith.select %77, %45, %78 : vector<8x128xi1>, vector<8x128xf32>
    %c0_25 = arith.constant 0 : index
    %c0_26 = arith.constant 0 : index
    %c0_27 = arith.constant 0 : index
    %80 = vector.load %arg10[%c0_25, %c0_26, %c0_27] : memref<8x8x256xf32, #tpu.memory_space<vmem>>, vector<1x8x128xf32>
    %81 = vector.shape_cast %80 : vector<1x8x128xf32> to vector<8x128xf32>
    %82 = vector.shape_cast %79 : vector<8x128xf32> to vector<1x8x128xf32>
    tpu.vector_store %arg10[%c0_25, %c0_26, %c0_27], %82 {strides = array<i32>} : memref<8x8x256xf32, #tpu.memory_space<vmem>>, vector<1x8x128xf32>,
    %cst_28 = arith.constant 0.000000e+00 : f32
    %83 = vector.shape_cast %75 : vector<8x1xi1> to vector<8x1xi1>
    %84 = vector.broadcast %83 : vector<8x1xi1> to vector<8x128xi1>
    %85 = vector.broadcast %cst_28 : f32 to vector<8x128xf32>
    %86 = arith.select %84, %71, %85 : vector<8x128xi1>, vector<8x128xf32>
    %c7 = arith.constant 7 : index
    %c0_29 = arith.constant 0 : index
    %c128 = arith.constant 128 : index
    %87 = vector.load %arg10[%c7, %c0_29, %c128] : memref<8x8x256xf32, #tpu.memory_space<vmem>>, vector<1x8x128xf32>
    %88 = vector.shape_cast %87 : vector<1x8x128xf32> to vector<8x128xf32>
    %89 = vector.shape_cast %86 : vector<8x128xf32> to vector<1x8x128xf32>
    tpu.vector_store %arg10[%c7, %c0_29, %c128], %89 {strides = array<i32>} : memref<8x8x256xf32, #tpu.memory_space<vmem>>, vector<1x8x128xf32>,
    %90 = vector.shape_cast %73 : vector<8x1xi1> to vector<8x1xi1>
    %91 = vector.broadcast %90 : vector<8x1xi1> to vector<8x128xi1>
    %92 = arith.select %91, %45, %11 : vector<8x128xi1>, vector<8x128xf32>
    %93 = vector.shape_cast %75 : vector<8x1xi1> to vector<8x1xi1>
    %94 = vector.broadcast %93 : vector<8x1xi1> to vector<8x128xi1>
    %95 = arith.select %94, %71, %12 : vector<8x128xi1>, vector<8x128xf32>
    %c8 = arith.constant 8 : index
    %c0_30 = arith.constant 0 : index
    %96 = vector.load %arg13[%c8, %c0_30] : memref<64x768xf32, #tpu.memory_space<vmem>>, vector<8x384xf32>
    %c48 = arith.constant 48 : index
    %c384_31 = arith.constant 384 : index
    %97 = vector.load %arg13[%c48, %c384_31] : memref<64x768xf32, #tpu.memory_space<vmem>>, vector<8x384xf32>
    %98 = tpu.concatenate %92, %95 in 1 : vector<8x128xf32>, vector<8x128xf32> -> vector<8x256xf32>
    %99 = arith.truncf %98 : vector<8x256xf32> to vector<8x256xbf16>
    %c0_32 = arith.constant 0 : index
    %c0_33 = arith.constant 0 : index
    %100 = vector.load %arg4[%c0_32, %c0_33] : memref<256x768xbf16, #tpu.memory_space<vmem>>, vector<256x768xbf16>
    %cst_34 = arith.constant dense<0.000000e+00> : vector<8x768xf32>
    %101 = tpu.matmul %99, %100, %cst_34 {dimension_numbers = #tpu.dot_dimension_numbers<[1], [0], [0], [1], [0, 0, 1, 1], [], []>} : vector<8x256xbf16>, vector<256x768xbf16>, vector<8x768xf32> -> vector<8x768xf32>
    %102 = arith.addf %101, %10 : vector<8x768xf32>
    %103 = vector.extract_strided_slice %96 {offsets = [0, 0], sizes = [8, 128], strides = [1, 1]} : vector<8x384xf32> to vector<8x128xf32>
    %104 = vector.extract_strided_slice %102 {offsets = [0, 0], sizes = [8, 128], strides = [1, 1]} : vector<8x768xf32> to vector<8x128xf32>
    %105 = arith.addf %103, %104 : vector<8x128xf32>
    %106 = arith.negf %105 : vector<8x128xf32>
    %107 = math.exp %106 : vector<8x128xf32>
    %cst_35 = arith.constant 1.000000e+00 : f32
    %108 = vector.broadcast %cst_35 : f32 to vector<8x128xf32>
    %109 = arith.addf %108, %107 : vector<8x128xf32>
    %110 = arith.divf %108, %109 : vector<8x128xf32>
    %111 = vector.extract_strided_slice %96 {offsets = [0, 128], sizes = [8, 128], strides = [1, 1]} : vector<8x384xf32> to vector<8x128xf32>
    %112 = vector.extract_strided_slice %102 {offsets = [0, 128], sizes = [8, 128], strides = [1, 1]} : vector<8x768xf32> to vector<8x128xf32>
    %113 = arith.addf %111, %112 : vector<8x128xf32>
    %114 = arith.negf %113 : vector<8x128xf32>
    %115 = math.exp %114 : vector<8x128xf32>
    %cst_36 = arith.constant 1.000000e+00 : f32
    %116 = vector.broadcast %cst_36 : f32 to vector<8x128xf32>
    %117 = arith.addf %116, %115 : vector<8x128xf32>
    %118 = arith.divf %116, %117 : vector<8x128xf32>
    %119 = vector.extract_strided_slice %96 {offsets = [0, 256], sizes = [8, 128], strides = [1, 1]} : vector<8x384xf32> to vector<8x128xf32>
    %120 = vector.extract_strided_slice %102 {offsets = [0, 256], sizes = [8, 128], strides = [1, 1]} : vector<8x768xf32> to vector<8x128xf32>
    %121 = arith.mulf %110, %120 : vector<8x128xf32>
    %122 = arith.addf %119, %121 : vector<8x128xf32>
    %123 = math.tanh %122 : vector<8x128xf32>
    %cst_37 = arith.constant 1.000000e+00 : f32
    %124 = vector.broadcast %cst_37 : f32 to vector<8x128xf32>
    %125 = arith.subf %124, %118 : vector<8x128xf32>
    %126 = arith.mulf %125, %123 : vector<8x128xf32>
    %127 = arith.mulf %118, %92 : vector<8x128xf32>
    %128 = arith.addf %126, %127 : vector<8x128xf32>
    %129 = vector.extract_strided_slice %97 {offsets = [0, 0], sizes = [8, 128], strides = [1, 1]} : vector<8x384xf32> to vector<8x128xf32>
    %130 = vector.extract_strided_slice %102 {offsets = [0, 384], sizes = [8, 128], strides = [1, 1]} : vector<8x768xf32> to vector<8x128xf32>
    %131 = arith.addf %129, %130 : vector<8x128xf32>
    %132 = arith.negf %131 : vector<8x128xf32>
    %133 = math.exp %132 : vector<8x128xf32>
    %cst_38 = arith.constant 1.000000e+00 : f32
    %134 = vector.broadcast %cst_38 : f32 to vector<8x128xf32>
    %135 = arith.addf %134, %133 : vector<8x128xf32>
    %136 = arith.divf %134, %135 : vector<8x128xf32>
    %137 = vector.extract_strided_slice %97 {offsets = [0, 128], sizes = [8, 128], strides = [1, 1]} : vector<8x384xf32> to vector<8x128xf32>
    %138 = vector.extract_strided_slice %102 {offsets = [0, 512], sizes = [8, 128], strides = [1, 1]} : vector<8x768xf32> to vector<8x128xf32>
    %139 = arith.addf %137, %138 : vector<8x128xf32>
    %140 = arith.negf %139 : vector<8x128xf32>
    %141 = math.exp %140 : vector<8x128xf32>
    %cst_39 = arith.constant 1.000000e+00 : f32
    %142 = vector.broadcast %cst_39 : f32 to vector<8x128xf32>
    %143 = arith.addf %142, %141 : vector<8x128xf32>
    %144 = arith.divf %142, %143 : vector<8x128xf32>
    %145 = vector.extract_strided_slice %97 {offsets = [0, 256], sizes = [8, 128], strides = [1, 1]} : vector<8x384xf32> to vector<8x128xf32>
    %146 = vector.extract_strided_slice %102 {offsets = [0, 640], sizes = [8, 128], strides = [1, 1]} : vector<8x768xf32> to vector<8x128xf32>
    %147 = arith.mulf %136, %146 : vector<8x128xf32>
    %148 = arith.addf %145, %147 : vector<8x128xf32>
    %149 = math.tanh %148 : vector<8x128xf32>
    %cst_40 = arith.constant 1.000000e+00 : f32
    %150 = vector.broadcast %cst_40 : f32 to vector<8x128xf32>
    %151 = arith.subf %150, %144 : vector<8x128xf32>
    %152 = arith.mulf %151, %149 : vector<8x128xf32>
    %153 = arith.mulf %144, %95 : vector<8x128xf32>
    %154 = arith.addf %152, %153 : vector<8x128xf32>
    %c1_i32 = arith.constant 1 : i32
    %155 = vector.broadcast %c1_i32 : i32 to vector<8x1xi32>
    %156 = arith.cmpi sgt, %7, %155 : vector<8x1xi32>
    %c6_i32 = arith.constant 6 : i32
    %157 = vector.broadcast %c6_i32 : i32 to vector<8x1xi32>
    %158 = arith.cmpi sgt, %7, %157 : vector<8x1xi32>
    %cst_41 = arith.constant 0.000000e+00 : f32
    %159 = vector.shape_cast %156 : vector<8x1xi1> to vector<8x1xi1>
    %160 = vector.broadcast %159 : vector<8x1xi1> to vector<8x128xi1>
    %161 = vector.broadcast %cst_41 : f32 to vector<8x128xf32>
    %162 = arith.select %160, %128, %161 : vector<8x128xi1>, vector<8x128xf32>
    %c1 = arith.constant 1 : index
    %c0_42 = arith.constant 0 : index
    %c0_43 = arith.constant 0 : index
    %163 = vector.load %arg10[%c1, %c0_42, %c0_43] : memref<8x8x256xf32, #tpu.memory_space<vmem>>, vector<1x8x128xf32>
    %164 = vector.shape_cast %163 : vector<1x8x128xf32> to vector<8x128xf32>
    %165 = vector.shape_cast %162 : vector<8x128xf32> to vector<1x8x128xf32>
    tpu.vector_store %arg10[%c1, %c0_42, %c0_43], %165 {strides = array<i32>} : memref<8x8x256xf32, #tpu.memory_space<vmem>>, vector<1x8x128xf32>,
    %cst_44 = arith.constant 0.000000e+00 : f32
    %166 = vector.shape_cast %158 : vector<8x1xi1> to vector<8x1xi1>
    %167 = vector.broadcast %166 : vector<8x1xi1> to vector<8x128xi1>
    %168 = vector.broadcast %cst_44 : f32 to vector<8x128xf32>
    %169 = arith.select %167, %154, %168 : vector<8x128xi1>, vector<8x128xf32>
    %c6 = arith.constant 6 : index
    %c0_45 = arith.constant 0 : index
    %c128_46 = arith.constant 128 : index
    %170 = vector.load %arg10[%c6, %c0_45, %c128_46] : memref<8x8x256xf32, #tpu.memory_space<vmem>>, vector<1x8x128xf32>
    %171 = vector.shape_cast %170 : vector<1x8x128xf32> to vector<8x128xf32>
    %172 = vector.shape_cast %169 : vector<8x128xf32> to vector<1x8x128xf32>
    tpu.vector_store %arg10[%c6, %c0_45, %c128_46], %172 {strides = array<i32>} : memref<8x8x256xf32, #tpu.memory_space<vmem>>, vector<1x8x128xf32>,
    %173 = vector.shape_cast %156 : vector<8x1xi1> to vector<8x1xi1>
    %174 = vector.broadcast %173 : vector<8x1xi1> to vector<8x128xi1>
    %175 = arith.select %174, %128, %92 : vector<8x128xi1>, vector<8x128xf32>
    %176 = vector.shape_cast %158 : vector<8x1xi1> to vector<8x1xi1>
    %177 = vector.broadcast %176 : vector<8x1xi1> to vector<8x128xi1>
    %178 = arith.select %177, %154, %95 : vector<8x128xi1>, vector<8x128xf32>
    %c16 = arith.constant 16 : index
    %c0_47 = arith.constant 0 : index
    %179 = vector.load %arg13[%c16, %c0_47] : memref<64x768xf32, #tpu.memory_space<vmem>>, vector<8x384xf32>
    %c40 = arith.constant 40 : index
    %c384_48 = arith.constant 384 : index
    %180 = vector.load %arg13[%c40, %c384_48] : memref<64x768xf32, #tpu.memory_space<vmem>>, vector<8x384xf32>
    %181 = tpu.concatenate %175, %178 in 1 : vector<8x128xf32>, vector<8x128xf32> -> vector<8x256xf32>
    %182 = arith.truncf %181 : vector<8x256xf32> to vector<8x256xbf16>
    %c0_49 = arith.constant 0 : index
    %c0_50 = arith.constant 0 : index
    %183 = vector.load %arg4[%c0_49, %c0_50] : memref<256x768xbf16, #tpu.memory_space<vmem>>, vector<256x768xbf16>
    %cst_51 = arith.constant dense<0.000000e+00> : vector<8x768xf32>
    %184 = tpu.matmul %182, %183, %cst_51 {dimension_numbers = #tpu.dot_dimension_numbers<[1], [0], [0], [1], [0, 0, 1, 1], [], []>} : vector<8x256xbf16>, vector<256x768xbf16>, vector<8x768xf32> -> vector<8x768xf32>
    %185 = arith.addf %184, %10 : vector<8x768xf32>
    %186 = vector.extract_strided_slice %179 {offsets = [0, 0], sizes = [8, 128], strides = [1, 1]} : vector<8x384xf32> to vector<8x128xf32>
    %187 = vector.extract_strided_slice %185 {offsets = [0, 0], sizes = [8, 128], strides = [1, 1]} : vector<8x768xf32> to vector<8x128xf32>
    %188 = arith.addf %186, %187 : vector<8x128xf32>
    %189 = arith.negf %188 : vector<8x128xf32>
    %190 = math.exp %189 : vector<8x128xf32>
    %cst_52 = arith.constant 1.000000e+00 : f32
    %191 = vector.broadcast %cst_52 : f32 to vector<8x128xf32>
    %192 = arith.addf %191, %190 : vector<8x128xf32>
    %193 = arith.divf %191, %192 : vector<8x128xf32>
    %194 = vector.extract_strided_slice %179 {offsets = [0, 128], sizes = [8, 128], strides = [1, 1]} : vector<8x384xf32> to vector<8x128xf32>
    %195 = vector.extract_strided_slice %185 {offsets = [0, 128], sizes = [8, 128], strides = [1, 1]} : vector<8x768xf32> to vector<8x128xf32>
    %196 = arith.addf %194, %195 : vector<8x128xf32>
    %197 = arith.negf %196 : vector<8x128xf32>
    %198 = math.exp %197 : vector<8x128xf32>
    %cst_53 = arith.constant 1.000000e+00 : f32
    %199 = vector.broadcast %cst_53 : f32 to vector<8x128xf32>
    %200 = arith.addf %199, %198 : vector<8x128xf32>
    %201 = arith.divf %199, %200 : vector<8x128xf32>
    %202 = vector.extract_strided_slice %179 {offsets = [0, 256], sizes = [8, 128], strides = [1, 1]} : vector<8x384xf32> to vector<8x128xf32>
    %203 = vector.extract_strided_slice %185 {offsets = [0, 256], sizes = [8, 128], strides = [1, 1]} : vector<8x768xf32> to vector<8x128xf32>
    %204 = arith.mulf %193, %203 : vector<8x128xf32>
    %205 = arith.addf %202, %204 : vector<8x128xf32>
    %206 = math.tanh %205 : vector<8x128xf32>
    %cst_54 = arith.constant 1.000000e+00 : f32
    %207 = vector.broadcast %cst_54 : f32 to vector<8x128xf32>
    %208 = arith.subf %207, %201 : vector<8x128xf32>
    %209 = arith.mulf %208, %206 : vector<8x128xf32>
    %210 = arith.mulf %201, %175 : vector<8x128xf32>
    %211 = arith.addf %209, %210 : vector<8x128xf32>
    %212 = vector.extract_strided_slice %180 {offsets = [0, 0], sizes = [8, 128], strides = [1, 1]} : vector<8x384xf32> to vector<8x128xf32>
    %213 = vector.extract_strided_slice %185 {offsets = [0, 384], sizes = [8, 128], strides = [1, 1]} : vector<8x768xf32> to vector<8x128xf32>
    %214 = arith.addf %212, %213 : vector<8x128xf32>
    %215 = arith.negf %214 : vector<8x128xf32>
    %216 = math.exp %215 : vector<8x128xf32>
    %cst_55 = arith.constant 1.000000e+00 : f32
    %217 = vector.broadcast %cst_55 : f32 to vector<8x128xf32>
    %218 = arith.addf %217, %216 : vector<8x128xf32>
    %219 = arith.divf %217, %218 : vector<8x128xf32>
    %220 = vector.extract_strided_slice %180 {offsets = [0, 128], sizes = [8, 128], strides = [1, 1]} : vector<8x384xf32> to vector<8x128xf32>
    %221 = vector.extract_strided_slice %185 {offsets = [0, 512], sizes = [8, 128], strides = [1, 1]} : vector<8x768xf32> to vector<8x128xf32>
    %222 = arith.addf %220, %221 : vector<8x128xf32>
    %223 = arith.negf %222 : vector<8x128xf32>
    %224 = math.exp %223 : vector<8x128xf32>
    %cst_56 = arith.constant 1.000000e+00 : f32
    %225 = vector.broadcast %cst_56 : f32 to vector<8x128xf32>
    %226 = arith.addf %225, %224 : vector<8x128xf32>
    %227 = arith.divf %225, %226 : vector<8x128xf32>
    %228 = vector.extract_strided_slice %180 {offsets = [0, 256], sizes = [8, 128], strides = [1, 1]} : vector<8x384xf32> to vector<8x128xf32>
    %229 = vector.extract_strided_slice %185 {offsets = [0, 640], sizes = [8, 128], strides = [1, 1]} : vector<8x768xf32> to vector<8x128xf32>
    %230 = arith.mulf %219, %229 : vector<8x128xf32>
    %231 = arith.addf %228, %230 : vector<8x128xf32>
    %232 = math.tanh %231 : vector<8x128xf32>
    %cst_57 = arith.constant 1.000000e+00 : f32
    %233 = vector.broadcast %cst_57 : f32 to vector<8x128xf32>
    %234 = arith.subf %233, %227 : vector<8x128xf32>
    %235 = arith.mulf %234, %232 : vector<8x128xf32>
    %236 = arith.mulf %227, %178 : vector<8x128xf32>
    %237 = arith.addf %235, %236 : vector<8x128xf32>
    %c2_i32 = arith.constant 2 : i32
    %238 = vector.broadcast %c2_i32 : i32 to vector<8x1xi32>
    %239 = arith.cmpi sgt, %7, %238 : vector<8x1xi32>
    %c5_i32 = arith.constant 5 : i32
    %240 = vector.broadcast %c5_i32 : i32 to vector<8x1xi32>
    %241 = arith.cmpi sgt, %7, %240 : vector<8x1xi32>
    %cst_58 = arith.constant 0.000000e+00 : f32
    %242 = vector.shape_cast %239 : vector<8x1xi1> to vector<8x1xi1>
    %243 = vector.broadcast %242 : vector<8x1xi1> to vector<8x128xi1>
    %244 = vector.broadcast %cst_58 : f32 to vector<8x128xf32>
    %245 = arith.select %243, %211, %244 : vector<8x128xi1>, vector<8x128xf32>
    %c2 = arith.constant 2 : index
    %c0_59 = arith.constant 0 : index
    %c0_60 = arith.constant 0 : index
    %246 = vector.load %arg10[%c2, %c0_59, %c0_60] : memref<8x8x256xf32, #tpu.memory_space<vmem>>, vector<1x8x128xf32>
    %247 = vector.shape_cast %246 : vector<1x8x128xf32> to vector<8x128xf32>
    %248 = vector.shape_cast %245 : vector<8x128xf32> to vector<1x8x128xf32>
    tpu.vector_store %arg10[%c2, %c0_59, %c0_60], %248 {strides = array<i32>} : memref<8x8x256xf32, #tpu.memory_space<vmem>>, vector<1x8x128xf32>,
    %cst_61 = arith.constant 0.000000e+00 : f32
    %249 = vector.shape_cast %241 : vector<8x1xi1> to vector<8x1xi1>
    %250 = vector.broadcast %249 : vector<8x1xi1> to vector<8x128xi1>
    %251 = vector.broadcast %cst_61 : f32 to vector<8x128xf32>
    %252 = arith.select %250, %237, %251 : vector<8x128xi1>, vector<8x128xf32>
    %c5 = arith.constant 5 : index
    %c0_62 = arith.constant 0 : index
    %c128_63 = arith.constant 128 : index
    %253 = vector.load %arg10[%c5, %c0_62, %c128_63] : memref<8x8x256xf32, #tpu.memory_space<vmem>>, vector<1x8x128xf32>
    %254 = vector.shape_cast %253 : vector<1x8x128xf32> to vector<8x128xf32>
    %255 = vector.shape_cast %252 : vector<8x128xf32> to vector<1x8x128xf32>
    tpu.vector_store %arg10[%c5, %c0_62, %c128_63], %255 {strides = array<i32>} : memref<8x8x256xf32, #tpu.memory_space<vmem>>, vector<1x8x128xf32>,
    %256 = vector.shape_cast %239 : vector<8x1xi1> to vector<8x1xi1>
    %257 = vector.broadcast %256 : vector<8x1xi1> to vector<8x128xi1>
    %258 = arith.select %257, %211, %175 : vector<8x128xi1>, vector<8x128xf32>
    %259 = vector.shape_cast %241 : vector<8x1xi1> to vector<8x1xi1>
    %260 = vector.broadcast %259 : vector<8x1xi1> to vector<8x128xi1>
    %261 = arith.select %260, %237, %178 : vector<8x128xi1>, vector<8x128xf32>
    %c24 = arith.constant 24 : index
    %c0_64 = arith.constant 0 : index
    %262 = vector.load %arg13[%c24, %c0_64] : memref<64x768xf32, #tpu.memory_space<vmem>>, vector<8x384xf32>
    %c32 = arith.constant 32 : index
    %c384_65 = arith.constant 384 : index
    %263 = vector.load %arg13[%c32, %c384_65] : memref<64x768xf32, #tpu.memory_space<vmem>>, vector<8x384xf32>
    %264 = tpu.concatenate %258, %261 in 1 : vector<8x128xf32>, vector<8x128xf32> -> vector<8x256xf32>
    %265 = arith.truncf %264 : vector<8x256xf32> to vector<8x256xbf16>
    %c0_66 = arith.constant 0 : index
    %c0_67 = arith.constant 0 : index
    %266 = vector.load %arg4[%c0_66, %c0_67] : memref<256x768xbf16, #tpu.memory_space<vmem>>, vector<256x768xbf16>
    %cst_68 = arith.constant dense<0.000000e+00> : vector<8x768xf32>
    %267 = tpu.matmul %265, %266, %cst_68 {dimension_numbers = #tpu.dot_dimension_numbers<[1], [0], [0], [1], [0, 0, 1, 1], [], []>} : vector<8x256xbf16>, vector<256x768xbf16>, vector<8x768xf32> -> vector<8x768xf32>
    %268 = arith.addf %267, %10 : vector<8x768xf32>
    %269 = vector.extract_strided_slice %262 {offsets = [0, 0], sizes = [8, 128], strides = [1, 1]} : vector<8x384xf32> to vector<8x128xf32>
    %270 = vector.extract_strided_slice %268 {offsets = [0, 0], sizes = [8, 128], strides = [1, 1]} : vector<8x768xf32> to vector<8x128xf32>
    %271 = arith.addf %269, %270 : vector<8x128xf32>
    %272 = arith.negf %271 : vector<8x128xf32>
    %273 = math.exp %272 : vector<8x128xf32>
    %cst_69 = arith.constant 1.000000e+00 : f32
    %274 = vector.broadcast %cst_69 : f32 to vector<8x128xf32>
    %275 = arith.addf %274, %273 : vector<8x128xf32>
    %276 = arith.divf %274, %275 : vector<8x128xf32>
    %277 = vector.extract_strided_slice %262 {offsets = [0, 128], sizes = [8, 128], strides = [1, 1]} : vector<8x384xf32> to vector<8x128xf32>
    %278 = vector.extract_strided_slice %268 {offsets = [0, 128], sizes = [8, 128], strides = [1, 1]} : vector<8x768xf32> to vector<8x128xf32>
    %279 = arith.addf %277, %278 : vector<8x128xf32>
    %280 = arith.negf %279 : vector<8x128xf32>
    %281 = math.exp %280 : vector<8x128xf32>
    %cst_70 = arith.constant 1.000000e+00 : f32
    %282 = vector.broadcast %cst_70 : f32 to vector<8x128xf32>
    %283 = arith.addf %282, %281 : vector<8x128xf32>
    %284 = arith.divf %282, %283 : vector<8x128xf32>
    %285 = vector.extract_strided_slice %262 {offsets = [0, 256], sizes = [8, 128], strides = [1, 1]} : vector<8x384xf32> to vector<8x128xf32>
    %286 = vector.extract_strided_slice %268 {offsets = [0, 256], sizes = [8, 128], strides = [1, 1]} : vector<8x768xf32> to vector<8x128xf32>
    %287 = arith.mulf %276, %286 : vector<8x128xf32>
    %288 = arith.addf %285, %287 : vector<8x128xf32>
    %289 = math.tanh %288 : vector<8x128xf32>
    %cst_71 = arith.constant 1.000000e+00 : f32
    %290 = vector.broadcast %cst_71 : f32 to vector<8x128xf32>
    %291 = arith.subf %290, %284 : vector<8x128xf32>
    %292 = arith.mulf %291, %289 : vector<8x128xf32>
    %293 = arith.mulf %284, %258 : vector<8x128xf32>
    %294 = arith.addf %292, %293 : vector<8x128xf32>
    %295 = vector.extract_strided_slice %263 {offsets = [0, 0], sizes = [8, 128], strides = [1, 1]} : vector<8x384xf32> to vector<8x128xf32>
    %296 = vector.extract_strided_slice %268 {offsets = [0, 384], sizes = [8, 128], strides = [1, 1]} : vector<8x768xf32> to vector<8x128xf32>
    %297 = arith.addf %295, %296 : vector<8x128xf32>
    %298 = arith.negf %297 : vector<8x128xf32>
    %299 = math.exp %298 : vector<8x128xf32>
    %cst_72 = arith.constant 1.000000e+00 : f32
    %300 = vector.broadcast %cst_72 : f32 to vector<8x128xf32>
    %301 = arith.addf %300, %299 : vector<8x128xf32>
    %302 = arith.divf %300, %301 : vector<8x128xf32>
    %303 = vector.extract_strided_slice %263 {offsets = [0, 128], sizes = [8, 128], strides = [1, 1]} : vector<8x384xf32> to vector<8x128xf32>
    %304 = vector.extract_strided_slice %268 {offsets = [0, 512], sizes = [8, 128], strides = [1, 1]} : vector<8x768xf32> to vector<8x128xf32>
    %305 = arith.addf %303, %304 : vector<8x128xf32>
    %306 = arith.negf %305 : vector<8x128xf32>
    %307 = math.exp %306 : vector<8x128xf32>
    %cst_73 = arith.constant 1.000000e+00 : f32
    %308 = vector.broadcast %cst_73 : f32 to vector<8x128xf32>
    %309 = arith.addf %308, %307 : vector<8x128xf32>
    %310 = arith.divf %308, %309 : vector<8x128xf32>
    %311 = vector.extract_strided_slice %263 {offsets = [0, 256], sizes = [8, 128], strides = [1, 1]} : vector<8x384xf32> to vector<8x128xf32>
    %312 = vector.extract_strided_slice %268 {offsets = [0, 640], sizes = [8, 128], strides = [1, 1]} : vector<8x768xf32> to vector<8x128xf32>
    %313 = arith.mulf %302, %312 : vector<8x128xf32>
    %314 = arith.addf %311, %313 : vector<8x128xf32>
    %315 = math.tanh %314 : vector<8x128xf32>
    %cst_74 = arith.constant 1.000000e+00 : f32
    %316 = vector.broadcast %cst_74 : f32 to vector<8x128xf32>
    %317 = arith.subf %316, %310 : vector<8x128xf32>
    %318 = arith.mulf %317, %315 : vector<8x128xf32>
    %319 = arith.mulf %310, %261 : vector<8x128xf32>
    %320 = arith.addf %318, %319 : vector<8x128xf32>
    %c3_i32 = arith.constant 3 : i32
    %321 = vector.broadcast %c3_i32 : i32 to vector<8x1xi32>
    %322 = arith.cmpi sgt, %7, %321 : vector<8x1xi32>
    %c4_i32 = arith.constant 4 : i32
    %323 = vector.broadcast %c4_i32 : i32 to vector<8x1xi32>
    %324 = arith.cmpi sgt, %7, %323 : vector<8x1xi32>
    %cst_75 = arith.constant 0.000000e+00 : f32
    %325 = vector.shape_cast %322 : vector<8x1xi1> to vector<8x1xi1>
    %326 = vector.broadcast %325 : vector<8x1xi1> to vector<8x128xi1>
    %327 = vector.broadcast %cst_75 : f32 to vector<8x128xf32>
    %328 = arith.select %326, %294, %327 : vector<8x128xi1>, vector<8x128xf32>
    %c3 = arith.constant 3 : index
    %c0_76 = arith.constant 0 : index
    %c0_77 = arith.constant 0 : index
    %329 = vector.load %arg10[%c3, %c0_76, %c0_77] : memref<8x8x256xf32, #tpu.memory_space<vmem>>, vector<1x8x128xf32>
    %330 = vector.shape_cast %329 : vector<1x8x128xf32> to vector<8x128xf32>
    %331 = vector.shape_cast %328 : vector<8x128xf32> to vector<1x8x128xf32>
    tpu.vector_store %arg10[%c3, %c0_76, %c0_77], %331 {strides = array<i32>} : memref<8x8x256xf32, #tpu.memory_space<vmem>>, vector<1x8x128xf32>,
    %cst_78 = arith.constant 0.000000e+00 : f32
    %332 = vector.shape_cast %324 : vector<8x1xi1> to vector<8x1xi1>
    %333 = vector.broadcast %332 : vector<8x1xi1> to vector<8x128xi1>
    %334 = vector.broadcast %cst_78 : f32 to vector<8x128xf32>
    %335 = arith.select %333, %320, %334 : vector<8x128xi1>, vector<8x128xf32>
    %c4 = arith.constant 4 : index
    %c0_79 = arith.constant 0 : index
    %c128_80 = arith.constant 128 : index
    %336 = vector.load %arg10[%c4, %c0_79, %c128_80] : memref<8x8x256xf32, #tpu.memory_space<vmem>>, vector<1x8x128xf32>
    %337 = vector.shape_cast %336 : vector<1x8x128xf32> to vector<8x128xf32>
    %338 = vector.shape_cast %335 : vector<8x128xf32> to vector<1x8x128xf32>
    tpu.vector_store %arg10[%c4, %c0_79, %c128_80], %338 {strides = array<i32>} : memref<8x8x256xf32, #tpu.memory_space<vmem>>, vector<1x8x128xf32>,
    %339 = vector.shape_cast %322 : vector<8x1xi1> to vector<8x1xi1>
    %340 = vector.broadcast %339 : vector<8x1xi1> to vector<8x128xi1>
    %341 = arith.select %340, %294, %258 : vector<8x128xi1>, vector<8x128xf32>
    %342 = vector.shape_cast %324 : vector<8x1xi1> to vector<8x1xi1>
    %343 = vector.broadcast %342 : vector<8x1xi1> to vector<8x128xi1>
    %344 = arith.select %343, %320, %261 : vector<8x128xi1>, vector<8x128xf32>
    %c32_81 = arith.constant 32 : index
    %c0_82 = arith.constant 0 : index
    %345 = vector.load %arg13[%c32_81, %c0_82] : memref<64x768xf32, #tpu.memory_space<vmem>>, vector<8x384xf32>
    %c24_83 = arith.constant 24 : index
    %c384_84 = arith.constant 384 : index
    %346 = vector.load %arg13[%c24_83, %c384_84] : memref<64x768xf32, #tpu.memory_space<vmem>>, vector<8x384xf32>
    %347 = tpu.concatenate %341, %344 in 1 : vector<8x128xf32>, vector<8x128xf32> -> vector<8x256xf32>
    %348 = arith.truncf %347 : vector<8x256xf32> to vector<8x256xbf16>
    %c0_85 = arith.constant 0 : index
    %c0_86 = arith.constant 0 : index
    %349 = vector.load %arg4[%c0_85, %c0_86] : memref<256x768xbf16, #tpu.memory_space<vmem>>, vector<256x768xbf16>
    %cst_87 = arith.constant dense<0.000000e+00> : vector<8x768xf32>
    %350 = tpu.matmul %348, %349, %cst_87 {dimension_numbers = #tpu.dot_dimension_numbers<[1], [0], [0], [1], [0, 0, 1, 1], [], []>} : vector<8x256xbf16>, vector<256x768xbf16>, vector<8x768xf32> -> vector<8x768xf32>
    %351 = arith.addf %350, %10 : vector<8x768xf32>
    %352 = vector.extract_strided_slice %345 {offsets = [0, 0], sizes = [8, 128], strides = [1, 1]} : vector<8x384xf32> to vector<8x128xf32>
    %353 = vector.extract_strided_slice %351 {offsets = [0, 0], sizes = [8, 128], strides = [1, 1]} : vector<8x768xf32> to vector<8x128xf32>
    %354 = arith.addf %352, %353 : vector<8x128xf32>
    %355 = arith.negf %354 : vector<8x128xf32>
    %356 = math.exp %355 : vector<8x128xf32>
    %cst_88 = arith.constant 1.000000e+00 : f32
    %357 = vector.broadcast %cst_88 : f32 to vector<8x128xf32>
    %358 = arith.addf %357, %356 : vector<8x128xf32>
    %359 = arith.divf %357, %358 : vector<8x128xf32>
    %360 = vector.extract_strided_slice %345 {offsets = [0, 128], sizes = [8, 128], strides = [1, 1]} : vector<8x384xf32> to vector<8x128xf32>
    %361 = vector.extract_strided_slice %351 {offsets = [0, 128], sizes = [8, 128], strides = [1, 1]} : vector<8x768xf32> to vector<8x128xf32>
    %362 = arith.addf %360, %361 : vector<8x128xf32>
    %363 = arith.negf %362 : vector<8x128xf32>
    %364 = math.exp %363 : vector<8x128xf32>
    %cst_89 = arith.constant 1.000000e+00 : f32
    %365 = vector.broadcast %cst_89 : f32 to vector<8x128xf32>
    %366 = arith.addf %365, %364 : vector<8x128xf32>
    %367 = arith.divf %365, %366 : vector<8x128xf32>
    %368 = vector.extract_strided_slice %345 {offsets = [0, 256], sizes = [8, 128], strides = [1, 1]} : vector<8x384xf32> to vector<8x128xf32>
    %369 = vector.extract_strided_slice %351 {offsets = [0, 256], sizes = [8, 128], strides = [1, 1]} : vector<8x768xf32> to vector<8x128xf32>
    %370 = arith.mulf %359, %369 : vector<8x128xf32>
    %371 = arith.addf %368, %370 : vector<8x128xf32>
    %372 = math.tanh %371 : vector<8x128xf32>
    %cst_90 = arith.constant 1.000000e+00 : f32
    %373 = vector.broadcast %cst_90 : f32 to vector<8x128xf32>
    %374 = arith.subf %373, %367 : vector<8x128xf32>
    %375 = arith.mulf %374, %372 : vector<8x128xf32>
    %376 = arith.mulf %367, %341 : vector<8x128xf32>
    %377 = arith.addf %375, %376 : vector<8x128xf32>
    %378 = vector.extract_strided_slice %346 {offsets = [0, 0], sizes = [8, 128], strides = [1, 1]} : vector<8x384xf32> to vector<8x128xf32>
    %379 = vector.extract_strided_slice %351 {offsets = [0, 384], sizes = [8, 128], strides = [1, 1]} : vector<8x768xf32> to vector<8x128xf32>
    %380 = arith.addf %378, %379 : vector<8x128xf32>
    %381 = arith.negf %380 : vector<8x128xf32>
    %382 = math.exp %381 : vector<8x128xf32>
    %cst_91 = arith.constant 1.000000e+00 : f32
    %383 = vector.broadcast %cst_91 : f32 to vector<8x128xf32>
    %384 = arith.addf %383, %382 : vector<8x128xf32>
    %385 = arith.divf %383, %384 : vector<8x128xf32>
    %386 = vector.extract_strided_slice %346 {offsets = [0, 128], sizes = [8, 128], strides = [1, 1]} : vector<8x384xf32> to vector<8x128xf32>
    %387 = vector.extract_strided_slice %351 {offsets = [0, 512], sizes = [8, 128], strides = [1, 1]} : vector<8x768xf32> to vector<8x128xf32>
    %388 = arith.addf %386, %387 : vector<8x128xf32>
    %389 = arith.negf %388 : vector<8x128xf32>
    %390 = math.exp %389 : vector<8x128xf32>
    %cst_92 = arith.constant 1.000000e+00 : f32
    %391 = vector.broadcast %cst_92 : f32 to vector<8x128xf32>
    %392 = arith.addf %391, %390 : vector<8x128xf32>
    %393 = arith.divf %391, %392 : vector<8x128xf32>
    %394 = vector.extract_strided_slice %346 {offsets = [0, 256], sizes = [8, 128], strides = [1, 1]} : vector<8x384xf32> to vector<8x128xf32>
    %395 = vector.extract_strided_slice %351 {offsets = [0, 640], sizes = [8, 128], strides = [1, 1]} : vector<8x768xf32> to vector<8x128xf32>
    %396 = arith.mulf %385, %395 : vector<8x128xf32>
    %397 = arith.addf %394, %396 : vector<8x128xf32>
    %398 = math.tanh %397 : vector<8x128xf32>
    %cst_93 = arith.constant 1.000000e+00 : f32
    %399 = vector.broadcast %cst_93 : f32 to vector<8x128xf32>
    %400 = arith.subf %399, %393 : vector<8x128xf32>
    %401 = arith.mulf %400, %398 : vector<8x128xf32>
    %402 = arith.mulf %393, %344 : vector<8x128xf32>
    %403 = arith.addf %401, %402 : vector<8x128xf32>
    %c4_i32_94 = arith.constant 4 : i32
    %404 = vector.broadcast %c4_i32_94 : i32 to vector<8x1xi32>
    %405 = arith.cmpi sgt, %7, %404 : vector<8x1xi32>
    %c3_i32_95 = arith.constant 3 : i32
    %406 = vector.broadcast %c3_i32_95 : i32 to vector<8x1xi32>
    %407 = arith.cmpi sgt, %7, %406 : vector<8x1xi32>
    %cst_96 = arith.constant 0.000000e+00 : f32
    %408 = vector.shape_cast %405 : vector<8x1xi1> to vector<8x1xi1>
    %409 = vector.broadcast %408 : vector<8x1xi1> to vector<8x128xi1>
    %410 = vector.broadcast %cst_96 : f32 to vector<8x128xf32>
    %411 = arith.select %409, %377, %410 : vector<8x128xi1>, vector<8x128xf32>
    %c4_97 = arith.constant 4 : index
    %c0_98 = arith.constant 0 : index
    %c0_99 = arith.constant 0 : index
    %412 = vector.load %arg10[%c4_97, %c0_98, %c0_99] : memref<8x8x256xf32, #tpu.memory_space<vmem>>, vector<1x8x128xf32>
    %413 = vector.shape_cast %412 : vector<1x8x128xf32> to vector<8x128xf32>
    %414 = vector.shape_cast %411 : vector<8x128xf32> to vector<1x8x128xf32>
    tpu.vector_store %arg10[%c4_97, %c0_98, %c0_99], %414 {strides = array<i32>} : memref<8x8x256xf32, #tpu.memory_space<vmem>>, vector<1x8x128xf32>,
    %cst_100 = arith.constant 0.000000e+00 : f32
    %415 = vector.shape_cast %407 : vector<8x1xi1> to vector<8x1xi1>
    %416 = vector.broadcast %415 : vector<8x1xi1> to vector<8x128xi1>
    %417 = vector.broadcast %cst_100 : f32 to vector<8x128xf32>
    %418 = arith.select %416, %403, %417 : vector<8x128xi1>, vector<8x128xf32>
    %c3_101 = arith.constant 3 : index
    %c0_102 = arith.constant 0 : index
    %c128_103 = arith.constant 128 : index
    %419 = vector.load %arg10[%c3_101, %c0_102, %c128_103] : memref<8x8x256xf32, #tpu.memory_space<vmem>>, vector<1x8x128xf32>
    %420 = vector.shape_cast %419 : vector<1x8x128xf32> to vector<8x128xf32>
    %421 = vector.shape_cast %418 : vector<8x128xf32> to vector<1x8x128xf32>
    tpu.vector_store %arg10[%c3_101, %c0_102, %c128_103], %421 {strides = array<i32>} : memref<8x8x256xf32, #tpu.memory_space<vmem>>, vector<1x8x128xf32>,
    %422 = vector.shape_cast %405 : vector<8x1xi1> to vector<8x1xi1>
    %423 = vector.broadcast %422 : vector<8x1xi1> to vector<8x128xi1>
    %424 = arith.select %423, %377, %341 : vector<8x128xi1>, vector<8x128xf32>
    %425 = vector.shape_cast %407 : vector<8x1xi1> to vector<8x1xi1>
    %426 = vector.broadcast %425 : vector<8x1xi1> to vector<8x128xi1>
    %427 = arith.select %426, %403, %344 : vector<8x128xi1>, vector<8x128xf32>
    %c40_104 = arith.constant 40 : index
    %c0_105 = arith.constant 0 : index
    %428 = vector.load %arg13[%c40_104, %c0_105] : memref<64x768xf32, #tpu.memory_space<vmem>>, vector<8x384xf32>
    %c16_106 = arith.constant 16 : index
    %c384_107 = arith.constant 384 : index
    %429 = vector.load %arg13[%c16_106, %c384_107] : memref<64x768xf32, #tpu.memory_space<vmem>>, vector<8x384xf32>
    %430 = tpu.concatenate %424, %427 in 1 : vector<8x128xf32>, vector<8x128xf32> -> vector<8x256xf32>
    %431 = arith.truncf %430 : vector<8x256xf32> to vector<8x256xbf16>
    %c0_108 = arith.constant 0 : index
    %c0_109 = arith.constant 0 : index
    %432 = vector.load %arg4[%c0_108, %c0_109] : memref<256x768xbf16, #tpu.memory_space<vmem>>, vector<256x768xbf16>
    %cst_110 = arith.constant dense<0.000000e+00> : vector<8x768xf32>
    %433 = tpu.matmul %431, %432, %cst_110 {dimension_numbers = #tpu.dot_dimension_numbers<[1], [0], [0], [1], [0, 0, 1, 1], [], []>} : vector<8x256xbf16>, vector<256x768xbf16>, vector<8x768xf32> -> vector<8x768xf32>
    %434 = arith.addf %433, %10 : vector<8x768xf32>
    %435 = vector.extract_strided_slice %428 {offsets = [0, 0], sizes = [8, 128], strides = [1, 1]} : vector<8x384xf32> to vector<8x128xf32>
    %436 = vector.extract_strided_slice %434 {offsets = [0, 0], sizes = [8, 128], strides = [1, 1]} : vector<8x768xf32> to vector<8x128xf32>
    %437 = arith.addf %435, %436 : vector<8x128xf32>
    %438 = arith.negf %437 : vector<8x128xf32>
    %439 = math.exp %438 : vector<8x128xf32>
    %cst_111 = arith.constant 1.000000e+00 : f32
    %440 = vector.broadcast %cst_111 : f32 to vector<8x128xf32>
    %441 = arith.addf %440, %439 : vector<8x128xf32>
    %442 = arith.divf %440, %441 : vector<8x128xf32>
    %443 = vector.extract_strided_slice %428 {offsets = [0, 128], sizes = [8, 128], strides = [1, 1]} : vector<8x384xf32> to vector<8x128xf32>
    %444 = vector.extract_strided_slice %434 {offsets = [0, 128], sizes = [8, 128], strides = [1, 1]} : vector<8x768xf32> to vector<8x128xf32>
    %445 = arith.addf %443, %444 : vector<8x128xf32>
    %446 = arith.negf %445 : vector<8x128xf32>
    %447 = math.exp %446 : vector<8x128xf32>
    %cst_112 = arith.constant 1.000000e+00 : f32
    %448 = vector.broadcast %cst_112 : f32 to vector<8x128xf32>
    %449 = arith.addf %448, %447 : vector<8x128xf32>
    %450 = arith.divf %448, %449 : vector<8x128xf32>
    %451 = vector.extract_strided_slice %428 {offsets = [0, 256], sizes = [8, 128], strides = [1, 1]} : vector<8x384xf32> to vector<8x128xf32>
    %452 = vector.extract_strided_slice %434 {offsets = [0, 256], sizes = [8, 128], strides = [1, 1]} : vector<8x768xf32> to vector<8x128xf32>
    %453 = arith.mulf %442, %452 : vector<8x128xf32>
    %454 = arith.addf %451, %453 : vector<8x128xf32>
    %455 = math.tanh %454 : vector<8x128xf32>
    %cst_113 = arith.constant 1.000000e+00 : f32
    %456 = vector.broadcast %cst_113 : f32 to vector<8x128xf32>
    %457 = arith.subf %456, %450 : vector<8x128xf32>
    %458 = arith.mulf %457, %455 : vector<8x128xf32>
    %459 = arith.mulf %450, %424 : vector<8x128xf32>
    %460 = arith.addf %458, %459 : vector<8x128xf32>
    %461 = vector.extract_strided_slice %429 {offsets = [0, 0], sizes = [8, 128], strides = [1, 1]} : vector<8x384xf32> to vector<8x128xf32>
    %462 = vector.extract_strided_slice %434 {offsets = [0, 384], sizes = [8, 128], strides = [1, 1]} : vector<8x768xf32> to vector<8x128xf32>
    %463 = arith.addf %461, %462 : vector<8x128xf32>
    %464 = arith.negf %463 : vector<8x128xf32>
    %465 = math.exp %464 : vector<8x128xf32>
    %cst_114 = arith.constant 1.000000e+00 : f32
    %466 = vector.broadcast %cst_114 : f32 to vector<8x128xf32>
    %467 = arith.addf %466, %465 : vector<8x128xf32>
    %468 = arith.divf %466, %467 : vector<8x128xf32>
    %469 = vector.extract_strided_slice %429 {offsets = [0, 128], sizes = [8, 128], strides = [1, 1]} : vector<8x384xf32> to vector<8x128xf32>
    %470 = vector.extract_strided_slice %434 {offsets = [0, 512], sizes = [8, 128], strides = [1, 1]} : vector<8x768xf32> to vector<8x128xf32>
    %471 = arith.addf %469, %470 : vector<8x128xf32>
    %472 = arith.negf %471 : vector<8x128xf32>
    %473 = math.exp %472 : vector<8x128xf32>
    %cst_115 = arith.constant 1.000000e+00 : f32
    %474 = vector.broadcast %cst_115 : f32 to vector<8x128xf32>
    %475 = arith.addf %474, %473 : vector<8x128xf32>
    %476 = arith.divf %474, %475 : vector<8x128xf32>
    %477 = vector.extract_strided_slice %429 {offsets = [0, 256], sizes = [8, 128], strides = [1, 1]} : vector<8x384xf32> to vector<8x128xf32>
    %478 = vector.extract_strided_slice %434 {offsets = [0, 640], sizes = [8, 128], strides = [1, 1]} : vector<8x768xf32> to vector<8x128xf32>
    %479 = arith.mulf %468, %478 : vector<8x128xf32>
    %480 = arith.addf %477, %479 : vector<8x128xf32>
    %481 = math.tanh %480 : vector<8x128xf32>
    %cst_116 = arith.constant 1.000000e+00 : f32
    %482 = vector.broadcast %cst_116 : f32 to vector<8x128xf32>
    %483 = arith.subf %482, %476 : vector<8x128xf32>
    %484 = arith.mulf %483, %481 : vector<8x128xf32>
    %485 = arith.mulf %476, %427 : vector<8x128xf32>
    %486 = arith.addf %484, %485 : vector<8x128xf32>
    %c5_i32_117 = arith.constant 5 : i32
    %487 = vector.broadcast %c5_i32_117 : i32 to vector<8x1xi32>
    %488 = arith.cmpi sgt, %7, %487 : vector<8x1xi32>
    %c2_i32_118 = arith.constant 2 : i32
    %489 = vector.broadcast %c2_i32_118 : i32 to vector<8x1xi32>
    %490 = arith.cmpi sgt, %7, %489 : vector<8x1xi32>
    %cst_119 = arith.constant 0.000000e+00 : f32
    %491 = vector.shape_cast %488 : vector<8x1xi1> to vector<8x1xi1>
    %492 = vector.broadcast %491 : vector<8x1xi1> to vector<8x128xi1>
    %493 = vector.broadcast %cst_119 : f32 to vector<8x128xf32>
    %494 = arith.select %492, %460, %493 : vector<8x128xi1>, vector<8x128xf32>
    %c5_120 = arith.constant 5 : index
    %c0_121 = arith.constant 0 : index
    %c0_122 = arith.constant 0 : index
    %495 = vector.load %arg10[%c5_120, %c0_121, %c0_122] : memref<8x8x256xf32, #tpu.memory_space<vmem>>, vector<1x8x128xf32>
    %496 = vector.shape_cast %495 : vector<1x8x128xf32> to vector<8x128xf32>
    %497 = vector.shape_cast %494 : vector<8x128xf32> to vector<1x8x128xf32>
    tpu.vector_store %arg10[%c5_120, %c0_121, %c0_122], %497 {strides = array<i32>} : memref<8x8x256xf32, #tpu.memory_space<vmem>>, vector<1x8x128xf32>,
    %cst_123 = arith.constant 0.000000e+00 : f32
    %498 = vector.shape_cast %490 : vector<8x1xi1> to vector<8x1xi1>
    %499 = vector.broadcast %498 : vector<8x1xi1> to vector<8x128xi1>
    %500 = vector.broadcast %cst_123 : f32 to vector<8x128xf32>
    %501 = arith.select %499, %486, %500 : vector<8x128xi1>, vector<8x128xf32>
    %c2_124 = arith.constant 2 : index
    %c0_125 = arith.constant 0 : index
    %c128_126 = arith.constant 128 : index
    %502 = vector.load %arg10[%c2_124, %c0_125, %c128_126] : memref<8x8x256xf32, #tpu.memory_space<vmem>>, vector<1x8x128xf32>
    %503 = vector.shape_cast %502 : vector<1x8x128xf32> to vector<8x128xf32>
    %504 = vector.shape_cast %501 : vector<8x128xf32> to vector<1x8x128xf32>
    tpu.vector_store %arg10[%c2_124, %c0_125, %c128_126], %504 {strides = array<i32>} : memref<8x8x256xf32, #tpu.memory_space<vmem>>, vector<1x8x128xf32>,
    %505 = vector.shape_cast %488 : vector<8x1xi1> to vector<8x1xi1>
    %506 = vector.broadcast %505 : vector<8x1xi1> to vector<8x128xi1>
    %507 = arith.select %506, %460, %424 : vector<8x128xi1>, vector<8x128xf32>
    %508 = vector.shape_cast %490 : vector<8x1xi1> to vector<8x1xi1>
    %509 = vector.broadcast %508 : vector<8x1xi1> to vector<8x128xi1>
    %510 = arith.select %509, %486, %427 : vector<8x128xi1>, vector<8x128xf32>
    %c48_127 = arith.constant 48 : index
    %c0_128 = arith.constant 0 : index
    %511 = vector.load %arg13[%c48_127, %c0_128] : memref<64x768xf32, #tpu.memory_space<vmem>>, vector<8x384xf32>
    %c8_129 = arith.constant 8 : index
    %c384_130 = arith.constant 384 : index
    %512 = vector.load %arg13[%c8_129, %c384_130] : memref<64x768xf32, #tpu.memory_space<vmem>>, vector<8x384xf32>
    %513 = tpu.concatenate %507, %510 in 1 : vector<8x128xf32>, vector<8x128xf32> -> vector<8x256xf32>
    %514 = arith.truncf %513 : vector<8x256xf32> to vector<8x256xbf16>
    %c0_131 = arith.constant 0 : index
    %c0_132 = arith.constant 0 : index
    %515 = vector.load %arg4[%c0_131, %c0_132] : memref<256x768xbf16, #tpu.memory_space<vmem>>, vector<256x768xbf16>
    %cst_133 = arith.constant dense<0.000000e+00> : vector<8x768xf32>
    %516 = tpu.matmul %514, %515, %cst_133 {dimension_numbers = #tpu.dot_dimension_numbers<[1], [0], [0], [1], [0, 0, 1, 1], [], []>} : vector<8x256xbf16>, vector<256x768xbf16>, vector<8x768xf32> -> vector<8x768xf32>
    %517 = arith.addf %516, %10 : vector<8x768xf32>
    %518 = vector.extract_strided_slice %511 {offsets = [0, 0], sizes = [8, 128], strides = [1, 1]} : vector<8x384xf32> to vector<8x128xf32>
    %519 = vector.extract_strided_slice %517 {offsets = [0, 0], sizes = [8, 128], strides = [1, 1]} : vector<8x768xf32> to vector<8x128xf32>
    %520 = arith.addf %518, %519 : vector<8x128xf32>
    %521 = arith.negf %520 : vector<8x128xf32>
    %522 = math.exp %521 : vector<8x128xf32>
    %cst_134 = arith.constant 1.000000e+00 : f32
    %523 = vector.broadcast %cst_134 : f32 to vector<8x128xf32>
    %524 = arith.addf %523, %522 : vector<8x128xf32>
    %525 = arith.divf %523, %524 : vector<8x128xf32>
    %526 = vector.extract_strided_slice %511 {offsets = [0, 128], sizes = [8, 128], strides = [1, 1]} : vector<8x384xf32> to vector<8x128xf32>
    %527 = vector.extract_strided_slice %517 {offsets = [0, 128], sizes = [8, 128], strides = [1, 1]} : vector<8x768xf32> to vector<8x128xf32>
    %528 = arith.addf %526, %527 : vector<8x128xf32>
    %529 = arith.negf %528 : vector<8x128xf32>
    %530 = math.exp %529 : vector<8x128xf32>
    %cst_135 = arith.constant 1.000000e+00 : f32
    %531 = vector.broadcast %cst_135 : f32 to vector<8x128xf32>
    %532 = arith.addf %531, %530 : vector<8x128xf32>
    %533 = arith.divf %531, %532 : vector<8x128xf32>
    %534 = vector.extract_strided_slice %511 {offsets = [0, 256], sizes = [8, 128], strides = [1, 1]} : vector<8x384xf32> to vector<8x128xf32>
    %535 = vector.extract_strided_slice %517 {offsets = [0, 256], sizes = [8, 128], strides = [1, 1]} : vector<8x768xf32> to vector<8x128xf32>
    %536 = arith.mulf %525, %535 : vector<8x128xf32>
    %537 = arith.addf %534, %536 : vector<8x128xf32>
    %538 = math.tanh %537 : vector<8x128xf32>
    %cst_136 = arith.constant 1.000000e+00 : f32
    %539 = vector.broadcast %cst_136 : f32 to vector<8x128xf32>
    %540 = arith.subf %539, %533 : vector<8x128xf32>
    %541 = arith.mulf %540, %538 : vector<8x128xf32>
    %542 = arith.mulf %533, %507 : vector<8x128xf32>
    %543 = arith.addf %541, %542 : vector<8x128xf32>
    %544 = vector.extract_strided_slice %512 {offsets = [0, 0], sizes = [8, 128], strides = [1, 1]} : vector<8x384xf32> to vector<8x128xf32>
    %545 = vector.extract_strided_slice %517 {offsets = [0, 384], sizes = [8, 128], strides = [1, 1]} : vector<8x768xf32> to vector<8x128xf32>
    %546 = arith.addf %544, %545 : vector<8x128xf32>
    %547 = arith.negf %546 : vector<8x128xf32>
    %548 = math.exp %547 : vector<8x128xf32>
    %cst_137 = arith.constant 1.000000e+00 : f32
    %549 = vector.broadcast %cst_137 : f32 to vector<8x128xf32>
    %550 = arith.addf %549, %548 : vector<8x128xf32>
    %551 = arith.divf %549, %550 : vector<8x128xf32>
    %552 = vector.extract_strided_slice %512 {offsets = [0, 128], sizes = [8, 128], strides = [1, 1]} : vector<8x384xf32> to vector<8x128xf32>
    %553 = vector.extract_strided_slice %517 {offsets = [0, 512], sizes = [8, 128], strides = [1, 1]} : vector<8x768xf32> to vector<8x128xf32>
    %554 = arith.addf %552, %553 : vector<8x128xf32>
    %555 = arith.negf %554 : vector<8x128xf32>
    %556 = math.exp %555 : vector<8x128xf32>
    %cst_138 = arith.constant 1.000000e+00 : f32
    %557 = vector.broadcast %cst_138 : f32 to vector<8x128xf32>
    %558 = arith.addf %557, %556 : vector<8x128xf32>
    %559 = arith.divf %557, %558 : vector<8x128xf32>
    %560 = vector.extract_strided_slice %512 {offsets = [0, 256], sizes = [8, 128], strides = [1, 1]} : vector<8x384xf32> to vector<8x128xf32>
    %561 = vector.extract_strided_slice %517 {offsets = [0, 640], sizes = [8, 128], strides = [1, 1]} : vector<8x768xf32> to vector<8x128xf32>
    %562 = arith.mulf %551, %561 : vector<8x128xf32>
    %563 = arith.addf %560, %562 : vector<8x128xf32>
    %564 = math.tanh %563 : vector<8x128xf32>
    %cst_139 = arith.constant 1.000000e+00 : f32
    %565 = vector.broadcast %cst_139 : f32 to vector<8x128xf32>
    %566 = arith.subf %565, %559 : vector<8x128xf32>
    %567 = arith.mulf %566, %564 : vector<8x128xf32>
    %568 = arith.mulf %559, %510 : vector<8x128xf32>
    %569 = arith.addf %567, %568 : vector<8x128xf32>
    %c6_i32_140 = arith.constant 6 : i32
    %570 = vector.broadcast %c6_i32_140 : i32 to vector<8x1xi32>
    %571 = arith.cmpi sgt, %7, %570 : vector<8x1xi32>
    %c1_i32_141 = arith.constant 1 : i32
    %572 = vector.broadcast %c1_i32_141 : i32 to vector<8x1xi32>
    %573 = arith.cmpi sgt, %7, %572 : vector<8x1xi32>
    %cst_142 = arith.constant 0.000000e+00 : f32
    %574 = vector.shape_cast %571 : vector<8x1xi1> to vector<8x1xi1>
    %575 = vector.broadcast %574 : vector<8x1xi1> to vector<8x128xi1>
    %576 = vector.broadcast %cst_142 : f32 to vector<8x128xf32>
    %577 = arith.select %575, %543, %576 : vector<8x128xi1>, vector<8x128xf32>
    %c6_143 = arith.constant 6 : index
    %c0_144 = arith.constant 0 : index
    %c0_145 = arith.constant 0 : index
    %578 = vector.load %arg10[%c6_143, %c0_144, %c0_145] : memref<8x8x256xf32, #tpu.memory_space<vmem>>, vector<1x8x128xf32>
    %579 = vector.shape_cast %578 : vector<1x8x128xf32> to vector<8x128xf32>
    %580 = vector.shape_cast %577 : vector<8x128xf32> to vector<1x8x128xf32>
    tpu.vector_store %arg10[%c6_143, %c0_144, %c0_145], %580 {strides = array<i32>} : memref<8x8x256xf32, #tpu.memory_space<vmem>>, vector<1x8x128xf32>,
    %cst_146 = arith.constant 0.000000e+00 : f32
    %581 = vector.shape_cast %573 : vector<8x1xi1> to vector<8x1xi1>
    %582 = vector.broadcast %581 : vector<8x1xi1> to vector<8x128xi1>
    %583 = vector.broadcast %cst_146 : f32 to vector<8x128xf32>
    %584 = arith.select %582, %569, %583 : vector<8x128xi1>, vector<8x128xf32>
    %c1_147 = arith.constant 1 : index
    %c0_148 = arith.constant 0 : index
    %c128_149 = arith.constant 128 : index
    %585 = vector.load %arg10[%c1_147, %c0_148, %c128_149] : memref<8x8x256xf32, #tpu.memory_space<vmem>>, vector<1x8x128xf32>
    %586 = vector.shape_cast %585 : vector<1x8x128xf32> to vector<8x128xf32>
    %587 = vector.shape_cast %584 : vector<8x128xf32> to vector<1x8x128xf32>
    tpu.vector_store %arg10[%c1_147, %c0_148, %c128_149], %587 {strides = array<i32>} : memref<8x8x256xf32, #tpu.memory_space<vmem>>, vector<1x8x128xf32>,
    %588 = vector.shape_cast %571 : vector<8x1xi1> to vector<8x1xi1>
    %589 = vector.broadcast %588 : vector<8x1xi1> to vector<8x128xi1>
    %590 = arith.select %589, %543, %507 : vector<8x128xi1>, vector<8x128xf32>
    %591 = vector.shape_cast %573 : vector<8x1xi1> to vector<8x1xi1>
    %592 = vector.broadcast %591 : vector<8x1xi1> to vector<8x128xi1>
    %593 = arith.select %592, %569, %510 : vector<8x128xi1>, vector<8x128xf32>
    %c56_150 = arith.constant 56 : index
    %c0_151 = arith.constant 0 : index
    %594 = vector.load %arg13[%c56_150, %c0_151] : memref<64x768xf32, #tpu.memory_space<vmem>>, vector<8x384xf32>
    %c0_152 = arith.constant 0 : index
    %c384_153 = arith.constant 384 : index
    %595 = vector.load %arg13[%c0_152, %c384_153] : memref<64x768xf32, #tpu.memory_space<vmem>>, vector<8x384xf32>
    %596 = tpu.concatenate %590, %593 in 1 : vector<8x128xf32>, vector<8x128xf32> -> vector<8x256xf32>
    %597 = arith.truncf %596 : vector<8x256xf32> to vector<8x256xbf16>
    %c0_154 = arith.constant 0 : index
    %c0_155 = arith.constant 0 : index
    %598 = vector.load %arg4[%c0_154, %c0_155] : memref<256x768xbf16, #tpu.memory_space<vmem>>, vector<256x768xbf16>
    %cst_156 = arith.constant dense<0.000000e+00> : vector<8x768xf32>
    %599 = tpu.matmul %597, %598, %cst_156 {dimension_numbers = #tpu.dot_dimension_numbers<[1], [0], [0], [1], [0, 0, 1, 1], [], []>} : vector<8x256xbf16>, vector<256x768xbf16>, vector<8x768xf32> -> vector<8x768xf32>
    %600 = arith.addf %599, %10 : vector<8x768xf32>
    %601 = vector.extract_strided_slice %594 {offsets = [0, 0], sizes = [8, 128], strides = [1, 1]} : vector<8x384xf32> to vector<8x128xf32>
    %602 = vector.extract_strided_slice %600 {offsets = [0, 0], sizes = [8, 128], strides = [1, 1]} : vector<8x768xf32> to vector<8x128xf32>
    %603 = arith.addf %601, %602 : vector<8x128xf32>
    %604 = arith.negf %603 : vector<8x128xf32>
    %605 = math.exp %604 : vector<8x128xf32>
    %cst_157 = arith.constant 1.000000e+00 : f32
    %606 = vector.broadcast %cst_157 : f32 to vector<8x128xf32>
    %607 = arith.addf %606, %605 : vector<8x128xf32>
    %608 = arith.divf %606, %607 : vector<8x128xf32>
    %609 = vector.extract_strided_slice %594 {offsets = [0, 128], sizes = [8, 128], strides = [1, 1]} : vector<8x384xf32> to vector<8x128xf32>
    %610 = vector.extract_strided_slice %600 {offsets = [0, 128], sizes = [8, 128], strides = [1, 1]} : vector<8x768xf32> to vector<8x128xf32>
    %611 = arith.addf %609, %610 : vector<8x128xf32>
    %612 = arith.negf %611 : vector<8x128xf32>
    %613 = math.exp %612 : vector<8x128xf32>
    %cst_158 = arith.constant 1.000000e+00 : f32
    %614 = vector.broadcast %cst_158 : f32 to vector<8x128xf32>
    %615 = arith.addf %614, %613 : vector<8x128xf32>
    %616 = arith.divf %614, %615 : vector<8x128xf32>
    %617 = vector.extract_strided_slice %594 {offsets = [0, 256], sizes = [8, 128], strides = [1, 1]} : vector<8x384xf32> to vector<8x128xf32>
    %618 = vector.extract_strided_slice %600 {offsets = [0, 256], sizes = [8, 128], strides = [1, 1]} : vector<8x768xf32> to vector<8x128xf32>
    %619 = arith.mulf %608, %618 : vector<8x128xf32>
    %620 = arith.addf %617, %619 : vector<8x128xf32>
    %621 = math.tanh %620 : vector<8x128xf32>
    %cst_159 = arith.constant 1.000000e+00 : f32
    %622 = vector.broadcast %cst_159 : f32 to vector<8x128xf32>
    %623 = arith.subf %622, %616 : vector<8x128xf32>
    %624 = arith.mulf %623, %621 : vector<8x128xf32>
    %625 = arith.mulf %616, %590 : vector<8x128xf32>
    %626 = arith.addf %624, %625 : vector<8x128xf32>
    %627 = vector.extract_strided_slice %595 {offsets = [0, 0], sizes = [8, 128], strides = [1, 1]} : vector<8x384xf32> to vector<8x128xf32>
    %628 = vector.extract_strided_slice %600 {offsets = [0, 384], sizes = [8, 128], strides = [1, 1]} : vector<8x768xf32> to vector<8x128xf32>
    %629 = arith.addf %627, %628 : vector<8x128xf32>
    %630 = arith.negf %629 : vector<8x128xf32>
    %631 = math.exp %630 : vector<8x128xf32>
    %cst_160 = arith.constant 1.000000e+00 : f32
    %632 = vector.broadcast %cst_160 : f32 to vector<8x128xf32>
    %633 = arith.addf %632, %631 : vector<8x128xf32>
    %634 = arith.divf %632, %633 : vector<8x128xf32>
    %635 = vector.extract_strided_slice %595 {offsets = [0, 128], sizes = [8, 128], strides = [1, 1]} : vector<8x384xf32> to vector<8x128xf32>
    %636 = vector.extract_strided_slice %600 {offsets = [0, 512], sizes = [8, 128], strides = [1, 1]} : vector<8x768xf32> to vector<8x128xf32>
    %637 = arith.addf %635, %636 : vector<8x128xf32>
    %638 = arith.negf %637 : vector<8x128xf32>
    %639 = math.exp %638 : vector<8x128xf32>
    %cst_161 = arith.constant 1.000000e+00 : f32
    %640 = vector.broadcast %cst_161 : f32 to vector<8x128xf32>
    %641 = arith.addf %640, %639 : vector<8x128xf32>
    %642 = arith.divf %640, %641 : vector<8x128xf32>
    %643 = vector.extract_strided_slice %595 {offsets = [0, 256], sizes = [8, 128], strides = [1, 1]} : vector<8x384xf32> to vector<8x128xf32>
    %644 = vector.extract_strided_slice %600 {offsets = [0, 640], sizes = [8, 128], strides = [1, 1]} : vector<8x768xf32> to vector<8x128xf32>
    %645 = arith.mulf %634, %644 : vector<8x128xf32>
    %646 = arith.addf %643, %645 : vector<8x128xf32>
    %647 = math.tanh %646 : vector<8x128xf32>
    %cst_162 = arith.constant 1.000000e+00 : f32
    %648 = vector.broadcast %cst_162 : f32 to vector<8x128xf32>
    %649 = arith.subf %648, %642 : vector<8x128xf32>
    %650 = arith.mulf %649, %647 : vector<8x128xf32>
    %651 = arith.mulf %642, %593 : vector<8x128xf32>
    %652 = arith.addf %650, %651 : vector<8x128xf32>
    %c7_i32_163 = arith.constant 7 : i32
    %653 = vector.broadcast %c7_i32_163 : i32 to vector<8x1xi32>
    %654 = arith.cmpi sgt, %7, %653 : vector<8x1xi32>
    %c0_i32_164 = arith.constant 0 : i32
    %655 = vector.broadcast %c0_i32_164 : i32 to vector<8x1xi32>
    %656 = arith.cmpi sgt, %7, %655 : vector<8x1xi32>
    %cst_165 = arith.constant 0.000000e+00 : f32
    %657 = vector.shape_cast %654 : vector<8x1xi1> to vector<8x1xi1>
    %658 = vector.broadcast %657 : vector<8x1xi1> to vector<8x128xi1>
    %659 = vector.broadcast %cst_165 : f32 to vector<8x128xf32>
    %660 = arith.select %658, %626, %659 : vector<8x128xi1>, vector<8x128xf32>
    %c7_166 = arith.constant 7 : index
    %c0_167 = arith.constant 0 : index
    %c0_168 = arith.constant 0 : index
    %661 = vector.load %arg10[%c7_166, %c0_167, %c0_168] : memref<8x8x256xf32, #tpu.memory_space<vmem>>, vector<1x8x128xf32>
    %662 = vector.shape_cast %661 : vector<1x8x128xf32> to vector<8x128xf32>
    %663 = vector.shape_cast %660 : vector<8x128xf32> to vector<1x8x128xf32>
    tpu.vector_store %arg10[%c7_166, %c0_167, %c0_168], %663 {strides = array<i32>} : memref<8x8x256xf32, #tpu.memory_space<vmem>>, vector<1x8x128xf32>,
    %cst_169 = arith.constant 0.000000e+00 : f32
    %664 = vector.shape_cast %656 : vector<8x1xi1> to vector<8x1xi1>
    %665 = vector.broadcast %664 : vector<8x1xi1> to vector<8x128xi1>
    %666 = vector.broadcast %cst_169 : f32 to vector<8x128xf32>
    %667 = arith.select %665, %652, %666 : vector<8x128xi1>, vector<8x128xf32>
    %c0_170 = arith.constant 0 : index
    %c0_171 = arith.constant 0 : index
    %c128_172 = arith.constant 128 : index
    %668 = vector.load %arg10[%c0_170, %c0_171, %c128_172] : memref<8x8x256xf32, #tpu.memory_space<vmem>>, vector<1x8x128xf32>
    %669 = vector.shape_cast %668 : vector<1x8x128xf32> to vector<8x128xf32>
    %670 = vector.shape_cast %667 : vector<8x128xf32> to vector<1x8x128xf32>
    tpu.vector_store %arg10[%c0_170, %c0_171, %c128_172], %670 {strides = array<i32>} : memref<8x8x256xf32, #tpu.memory_space<vmem>>, vector<1x8x128xf32>,
    %671 = vector.shape_cast %654 : vector<8x1xi1> to vector<8x1xi1>
    %672 = vector.broadcast %671 : vector<8x1xi1> to vector<8x128xi1>
    %673 = arith.select %672, %626, %590 : vector<8x128xi1>, vector<8x128xf32>
    %674 = vector.shape_cast %656 : vector<8x1xi1> to vector<8x1xi1>
    %675 = vector.broadcast %674 : vector<8x1xi1> to vector<8x128xi1>
    %676 = arith.select %675, %652, %593 : vector<8x128xi1>, vector<8x128xf32>
    %c0_173 = arith.constant 0 : index
    %c0_174 = arith.constant 0 : index
    %c0_175 = arith.constant 0 : index
    %677 = vector.load %arg10[%c0_173, %c0_174, %c0_175] : memref<8x8x256xf32, #tpu.memory_space<vmem>>, vector<8x8x256xf32>
    %cst_176 = arith.constant dense<0.000000e+00> : vector<8x8xf32>
    %678 = vector.multi_reduction <add>, %677, %cst_176 [2] : vector<8x8x256xf32> to vector<8x8xf32>
    %679 = vector.shape_cast %678 : vector<8x8xf32> to vector<8x8x1xf32>
    %cst_177 = arith.constant 2.560000e+02 : f32
    %680 = vector.broadcast %cst_177 : f32 to vector<8x8x1xf32>
    %681 = arith.divf %679, %680 : vector<8x8x1xf32>
    %682 = vector.broadcast %681 : vector<8x8x1xf32> to vector<8x8x256xf32>
    %683 = arith.subf %677, %682 : vector<8x8x256xf32>
    %684 = arith.mulf %683, %683 : vector<8x8x256xf32>
    %cst_178 = arith.constant dense<0.000000e+00> : vector<8x8xf32>
    %685 = vector.multi_reduction <add>, %684, %cst_178 [2] : vector<8x8x256xf32> to vector<8x8xf32>
    %686 = vector.shape_cast %685 : vector<8x8xf32> to vector<8x8x1xf32>
    %cst_179 = arith.constant 2.560000e+02 : f32
    %687 = vector.broadcast %cst_179 : f32 to vector<8x8x1xf32>
    %688 = arith.divf %686, %687 : vector<8x8x1xf32>
    %689 = vector.broadcast %681 : vector<8x8x1xf32> to vector<8x8x256xf32>
    %690 = arith.subf %677, %689 : vector<8x8x256xf32>
    %cst_180 = arith.constant 9.99999974E-6 : f32
    %691 = vector.broadcast %cst_180 : f32 to vector<8x8x1xf32>
    %692 = arith.addf %688, %691 : vector<8x8x1xf32>
    %693 = math.rsqrt %692 : vector<8x8x1xf32>
    %694 = vector.broadcast %693 : vector<8x8x1xf32> to vector<8x8x256xf32>
    %695 = arith.mulf %690, %694 : vector<8x8x256xf32>
    %c0_181 = arith.constant 0 : index
    %c0_182 = arith.constant 0 : index
    %696 = vector.load %arg6[%c0_181, %c0_182] : memref<1x256xf32, #tpu.memory_space<vmem>>, vector<1x256xf32>
    %697 = vector.shape_cast %696 : vector<1x256xf32> to vector<1x1x256xf32>
    %698 = vector.broadcast %697 : vector<1x1x256xf32> to vector<8x8x256xf32>
    %699 = arith.mulf %695, %698 : vector<8x8x256xf32>
    %c0_183 = arith.constant 0 : index
    %c0_184 = arith.constant 0 : index
    %700 = vector.load %arg7[%c0_183, %c0_184] : memref<1x256xf32, #tpu.memory_space<vmem>>, vector<1x256xf32>
    %701 = vector.shape_cast %700 : vector<1x256xf32> to vector<1x1x256xf32>
    %702 = vector.broadcast %701 : vector<1x1x256xf32> to vector<8x8x256xf32>
    %703 = arith.addf %699, %702 : vector<8x8x256xf32>
    %c0_185 = arith.constant 0 : index
    %c0_186 = arith.constant 0 : index
    %c0_187 = arith.constant 0 : index
    %704 = vector.load %arg10[%c0_185, %c0_186, %c0_187] : memref<8x8x256xf32, #tpu.memory_space<vmem>>, vector<8x8x256xf32>
    tpu.vector_store %arg10[%c0_185, %c0_186, %c0_187], %703 {strides = array<i32>} : memref<8x8x256xf32, #tpu.memory_space<vmem>>, vector<8x8x256xf32>,
    %c0_188 = arith.constant 0 : index
    %c0_189 = arith.constant 0 : index
    %705 = vector.load %arg8[%c0_188, %c0_189] : memref<1x128xf32, #tpu.memory_space<vmem>>, vector<1x128xf32>
    %c0_190 = arith.constant 0 : index
    %c0_191 = arith.constant 0 : index
    %706 = vector.load %arg9[%c0_190, %c0_191] : memref<1x128xf32, #tpu.memory_space<vmem>>, vector<1x128xf32>
    %cst_192 = arith.constant dense<0.000000e+00> : vector<8xf32>
    %707 = vector.multi_reduction <add>, %673, %cst_192 [1] : vector<8x128xf32> to vector<8xf32>
    %708 = vector.shape_cast %707 : vector<8xf32> to vector<8x1xf32>
    %cst_193 = arith.constant 1.280000e+02 : f32
    %709 = vector.broadcast %cst_193 : f32 to vector<8x1xf32>
    %710 = arith.divf %708, %709 : vector<8x1xf32>
    %711 = vector.broadcast %710 : vector<8x1xf32> to vector<8x128xf32>
    %712 = arith.subf %673, %711 : vector<8x128xf32>
    %713 = arith.mulf %712, %712 : vector<8x128xf32>
    %cst_194 = arith.constant dense<0.000000e+00> : vector<8xf32>
    %714 = vector.multi_reduction <add>, %713, %cst_194 [1] : vector<8x128xf32> to vector<8xf32>
    %715 = vector.shape_cast %714 : vector<8xf32> to vector<8x1xf32>
    %cst_195 = arith.constant 1.280000e+02 : f32
    %716 = vector.broadcast %cst_195 : f32 to vector<8x1xf32>
    %717 = arith.divf %715, %716 : vector<8x1xf32>
    %718 = vector.broadcast %710 : vector<8x1xf32> to vector<8x128xf32>
    %719 = arith.subf %673, %718 : vector<8x128xf32>
    %cst_196 = arith.constant 9.99999974E-6 : f32
    %720 = vector.broadcast %cst_196 : f32 to vector<8x1xf32>
    %721 = arith.addf %717, %720 : vector<8x1xf32>
    %722 = math.rsqrt %721 : vector<8x1xf32>
    %723 = vector.broadcast %722 : vector<8x1xf32> to vector<8x128xf32>
    %724 = arith.mulf %719, %723 : vector<8x128xf32>
    %725 = vector.broadcast %705 : vector<1x128xf32> to vector<8x128xf32>
    %726 = arith.mulf %724, %725 : vector<8x128xf32>
    %727 = vector.broadcast %706 : vector<1x128xf32> to vector<8x128xf32>
    %728 = arith.addf %726, %727 : vector<8x128xf32>
    %cst_197 = arith.constant dense<0.000000e+00> : vector<8xf32>
    %729 = vector.multi_reduction <add>, %676, %cst_197 [1] : vector<8x128xf32> to vector<8xf32>
    %730 = vector.shape_cast %729 : vector<8xf32> to vector<8x1xf32>
    %cst_198 = arith.constant 1.280000e+02 : f32
    %731 = vector.broadcast %cst_198 : f32 to vector<8x1xf32>
    %732 = arith.divf %730, %731 : vector<8x1xf32>
    %733 = vector.broadcast %732 : vector<8x1xf32> to vector<8x128xf32>
    %734 = arith.subf %676, %733 : vector<8x128xf32>
    %735 = arith.mulf %734, %734 : vector<8x128xf32>
    %cst_199 = arith.constant dense<0.000000e+00> : vector<8xf32>
    %736 = vector.multi_reduction <add>, %735, %cst_199 [1] : vector<8x128xf32> to vector<8xf32>
    %737 = vector.shape_cast %736 : vector<8xf32> to vector<8x1xf32>
    %cst_200 = arith.constant 1.280000e+02 : f32
    %738 = vector.broadcast %cst_200 : f32 to vector<8x1xf32>
    %739 = arith.divf %737, %738 : vector<8x1xf32>
    %740 = vector.broadcast %732 : vector<8x1xf32> to vector<8x128xf32>
    %741 = arith.subf %676, %740 : vector<8x128xf32>
    %cst_201 = arith.constant 9.99999974E-6 : f32
    %742 = vector.broadcast %cst_201 : f32 to vector<8x1xf32>
    %743 = arith.addf %739, %742 : vector<8x1xf32>
    %744 = math.rsqrt %743 : vector<8x1xf32>
    %745 = vector.broadcast %744 : vector<8x1xf32> to vector<8x128xf32>
    %746 = arith.mulf %741, %745 : vector<8x128xf32>
    %747 = vector.broadcast %705 : vector<1x128xf32> to vector<8x128xf32>
    %748 = arith.mulf %746, %747 : vector<8x128xf32>
    %749 = vector.broadcast %706 : vector<1x128xf32> to vector<8x128xf32>
    %750 = arith.addf %748, %749 : vector<8x128xf32>
    %c0_202 = arith.constant 0 : index
    %c0_203 = arith.constant 0 : index
    %c0_204 = arith.constant 0 : index
    %751 = vector.load %arg12[%c0_202, %c0_203, %c0_204] : memref<2x8x128xf32, #tpu.memory_space<vmem>>, vector<1x8x128xf32>
    %752 = vector.shape_cast %751 : vector<1x8x128xf32> to vector<8x128xf32>
    %753 = vector.shape_cast %728 : vector<8x128xf32> to vector<1x8x128xf32>
    tpu.vector_store %arg12[%c0_202, %c0_203, %c0_204], %753 {strides = array<i32>} : memref<2x8x128xf32, #tpu.memory_space<vmem>>, vector<1x8x128xf32>,
    %c1_205 = arith.constant 1 : index
    %c0_206 = arith.constant 0 : index
    %c0_207 = arith.constant 0 : index
    %754 = vector.load %arg12[%c1_205, %c0_206, %c0_207] : memref<2x8x128xf32, #tpu.memory_space<vmem>>, vector<1x8x128xf32>
    %755 = vector.shape_cast %754 : vector<1x8x128xf32> to vector<8x128xf32>
    %756 = vector.shape_cast %750 : vector<8x128xf32> to vector<1x8x128xf32>
    tpu.vector_store %arg12[%c1_205, %c0_206, %c0_207], %756 {strides = array<i32>} : memref<2x8x128xf32, #tpu.memory_space<vmem>>, vector<1x8x128xf32>,
    %c0_208 = arith.constant 0 : index
    %c0_209 = arith.constant 0 : index
    %757 = vector.load %arg11[%c0_208, %c0_209] : memref<8x256xf32, #tpu.memory_space<vmem>>, vector<8x128xf32>
    tpu.vector_store %arg11[%c0_208, %c0_209], %728 {strides = array<i32>} : memref<8x256xf32, #tpu.memory_space<vmem>>, vector<8x128xf32>,
    %c0_210 = arith.constant 0 : index
    %c128_211 = arith.constant 128 : index
    %758 = vector.load %arg11[%c0_210, %c128_211] : memref<8x256xf32, #tpu.memory_space<vmem>>, vector<8x128xf32>
    tpu.vector_store %arg11[%c0_210, %c128_211], %750 {strides = array<i32>} : memref<8x256xf32, #tpu.memory_space<vmem>>, vector<8x128xf32>,
    return
  }
}

</mosaic_0001>

<bundles_post_ra>
// kernel: sentence_encoder_forward.1
= control target key start
LH: loop header
LB: loop body
LE: loop exit
PB: predicated region body
PF: predicated region fallthrough
CT: control target
= control target key end

     0   :  { %18 = vsyncpa [#allocation4], 0  ;;  %s12502_s0 = inlined_call_operand.vmem [shape: bf16[64,384], index: 0, kind: input, shape index: {}]   ;;  %s12503_s1 = inlined_call_operand.vmem [shape: s32[8,1], index: 1, kind: input, shape index: {}]   ;;  %s12504_s2 = inlined_call_operand.hbm [shape: bf16[384,768], index: 2, kind: input, shape index: {}]   ;;  %s12505_s3 = inlined_call_operand.vmem [shape: f32[1,768], index: 3, kind: input, shape index: {}]   ;;  %s12506_s4 = inlined_call_operand.hbm [shape: bf16[256,768], index: 4, kind: input, shape index: {}]   ;;  %s12507_s5 = inlined_call_operand.vmem [shape: f32[1,768], index: 5, kind: input, shape index: {}]   ;;  %s12508_s6 = inlined_call_operand.vmem [shape: f32[1,256], index: 6, kind: input, shape index: {}]   ;;  %s12509_s7 = inlined_call_operand.vmem [shape: f32[1,256], index: 7, kind: input, shape index: {}]   ;;  %s12510_s8 = inlined_call_operand.vmem [shape: f32[1,128], index: 8, kind: input, shape index: {}]   ;;  %s12511_s9 = inlined_call_operand.vmem [shape: f32[1,128], index: 9, kind: input, shape index: {}]   ;;  %s12512_s10 = inlined_call_operand.vmem [shape: f32[8,8,256], index: 10, kind: output, shape index: {0}]   ;;  %s12513_s11 = inlined_call_operand.vmem [shape: f32[8,256], index: 11, kind: output, shape index: {1}]   ;;  %s12514_s12 = inlined_call_operand.vmem [shape: f32[2,8,128], index: 12, kind: output, shape index: {2}]  }
   0x1   :  { %19 = vsyncpa [#allocation6], 0  ;;  %s10142_s21 = smov [#allocation3]   ;;  %s10094_s25 = scalar_lea.hbm %s12504_s2, 18432 }
   0x2   :  { %s29_s22 = sshll.u32 %s10142_s21, 4  ;;  %p10095_p0 = scmp.ne.s32.totalorder %s12504_s2, %s10094_s25  ;;  %s30_s22 = int_to_ptr.vmem [resolvable:$true] %s29_s22 }
   0x3   :  { %p10098_p1 = scmp.lt.u32.totalorder %s10094_s25, %s12504_s2 }
   0x5   :  { %p10100_p2 = pnand %p10098_p1, %p10095_p0 }
   0x7   :  { %10103 = shalt.err (!%p10100_p2)
}
   0x8   :  { %s10104_s30 = scalar_lea.vmem %s30_s22, 18432  ;;  %p10109_p4 = scmp.lt.s32.totalorder %s30_s22, %s30_s22 }
   0x9   :  { %p10105_p3 = scmp.ne.s32.totalorder %s30_s22, %s10104_s30  ;;  %p10110_p5 = scmp.lt.s32.totalorder %s10104_s30, %s10104_s30 }
   0xb   :  { %p10111_p6 = por %p10110_p5, %p10109_p4 }
   0xd   :  { %p10112_p7 = pnand %p10111_p6, %p10105_p3 }
   0xf   :  { %10115 = shalt.err (!%p10112_p7)
}
  0x10   :  { %s10143_s13 = smov 384   ;;  %s10144_s14 = smov 24  }
  0x11   :  { %35 = dma.hbm_to_vmem [thread:$0]  %s12504_s2, 18432, %s30_s22, [#allocation4], %s10143_s13, %s10143_s13, %s10144_s14  }
  0x12   :  { %s10145_s17 = smov [#allocation5]   ;;  %s10116_s21 = scalar_lea.hbm %s12506_s4, 12288 }
  0x13   :  { %s43_s18 = sshll.u32 %s10145_s17, 4  ;;  %p10117_p8 = scmp.ne.s32.totalorder %s12506_s4, %s10116_s21  ;;  %s44_s18 = int_to_ptr.vmem [resolvable:$true] %s43_s18 }
  0x14   :  { %p10120_p9 = scmp.lt.u32.totalorder %s10116_s21, %s12506_s4 }
  0x16   :  { %p10122_p10 = pnand %p10120_p9, %p10117_p8 }
  0x18   :  { %10125 = shalt.err (!%p10122_p10)
}
  0x19   :  { %s10126_s27 = scalar_lea.vmem %s44_s18, 12288  ;;  %p10131_p12 = scmp.lt.s32.totalorder %s44_s18, %s44_s18 }
  0x1a   :  { %p10127_p11 = scmp.ne.s32.totalorder %s44_s18, %s10126_s27  ;;  %p10132_p13 = scmp.lt.s32.totalorder %s10126_s27, %s10126_s27 }
  0x1c   :  { %p10133_p0 = por %p10132_p13, %p10131_p12 }
  0x1e   :  { %p10134_p1 = pnand %p10133_p0, %p10127_p11 }
  0x20   :  { %10137 = shalt.err (!%p10134_p1)
}
  0x21   :  { %49 = dma.hbm_to_vmem [thread:$0]  %s12506_s4, 12288, %s44_s18, [#allocation6], %s10143_s13, %s10143_s13, %s10144_s14  }
  0x22   :  { %10138 = dma.done.wait [#allocation4], 18432  }
  0x23   :  { %10139 = vsyncadd [#allocation4], 4294948864 }
  0x24   :  { %10140 = dma.done.wait [#allocation6], 12288  }
  0x25   :  { %10141 = vsyncadd [#allocation6], 4294955008  ;;  %v12515_v0 = vmov 0   ;;  %v9026_v1 = vld [vmem:[#allocation3 + $0x4] ss:$24 sps:$4 sm:$0xff]  }
  0x26   :  { %9024 = vset.pattern.permute.xlu0 %v12515_v0  ;;  %9025 = vset.pattern.permute.xlu1 %v12515_v0  ;;  %v9028_v2 = vld [vmem:[#allocation3 + $0xc] ss:$24 sps:$4 sm:$0xff]   ;;  %v9030_v3 = vld [vmem:[#allocation3] ss:$24 sps:$4 sm:$0xff]   ;;  %v9034_v6 = vld [vmem:[#allocation3 + $0x3c] ss:$24 sps:$4 sm:$0xff]  }
  0x27   :  { %1043 = vmatprep.subr.bf16.mxu0 %v9026_v1  ;;  %v9031_v4 = vld [vmem:[#allocation3 + $0x8] ss:$24 sps:$4 sm:$0xff]   ;;  %1189 = vmatprep.subr.bf16.mxu1 %v9028_v2  ;;  %v9032_v5 = vld [vmem:[#allocation3 + $0x34] ss:$24 sps:$4 sm:$0xff]   ;;  %v9037_v8 = vld [vmem:[#allocation3 + $0x38] ss:$24 sps:$4 sm:$0xff]  }
  0x28   :  { %1044 = vmatpush1.bf16.msra.mxu0 %v9030_v3  ;;  %1190 = vmatpush1.bf16.msra.mxu1 %v9031_v4  ;;  %v9036_v7 = vld [vmem:[#allocation3 + $0x30] ss:$24 sps:$4 sm:$0xff]   ;;  %v9038_v9 = vld [vmem:[#allocation3 + $0x64] ss:$24 sps:$4 sm:$0xff]   ;;  %v9042_v11 = vld [vmem:[#allocation3 + $0x60] ss:$24 sps:$4 sm:$0xff]  }
  0x29   :  { %1045 = vmatprep.subr.bf16.mxu0 %v9032_v5  ;;  %1191 = vmatprep.subr.bf16.mxu1 %v9034_v6  ;;  %v9040_v10 = vld [vmem:[#allocation3 + $0x6c] ss:$24 sps:$4 sm:$0xff]   ;;  %v9043_v12 = vld [vmem:[#allocation3 + $0x68] ss:$24 sps:$4 sm:$0xff]   ;;  %v9046_v14 = vld [vmem:[#allocation3 + $0x9c] ss:$24 sps:$4 sm:$0xff]  }
  0x2a   :  { %v9044_v13 = vld [vmem:[#allocation3 + $0x94] ss:$24 sps:$4 sm:$0xff]   ;;  %v9048_v15 = vld [vmem:[#allocation3 + $0x90] ss:$24 sps:$4 sm:$0xff]   ;;  %v9050_v17 = vld [vmem:[#allocation3 + $0xc4] ss:$24 sps:$4 sm:$0xff]  }
  0x2b   :  { %v9049_v16 = vld [vmem:[#allocation3 + $0x98] ss:$24 sps:$4 sm:$0xff]   ;;  %v9052_v18 = vld [vmem:[#allocation3 + $0xcc] ss:$24 sps:$4 sm:$0xff]   ;;  %v9055_v20 = vld [vmem:[#allocation3 + $0xc8] ss:$24 sps:$4 sm:$0xff]  }
  0x2c   :  { %1046 = vmatpush1.bf16.msra.mxu0 %v9036_v7  ;;  %1192 = vmatpush1.bf16.msra.mxu1 %v9037_v8  ;;  %v9054_v19 = vld [vmem:[#allocation3 + $0xc0] ss:$24 sps:$4 sm:$0xff]   ;;  %v9056_v21 = vld [vmem:[#allocation3 + $0xf4] ss:$24 sps:$4 sm:$0xff]   ;;  %v9060_v23 = vld [vmem:[#allocation3 + $0xf0] ss:$24 sps:$4 sm:$0xff]  }
  0x2d   :  { %1047 = vmatprep.subr.bf16.mxu0 %v9038_v9  ;;  %1193 = vmatprep.subr.bf16.mxu1 %v9040_v10  ;;  %v9058_v22 = vld [vmem:[#allocation3 + $0xfc] ss:$24 sps:$4 sm:$0xff]   ;;  %v9061_v24 = vld [vmem:[#allocation3 + $0xf8] ss:$24 sps:$4 sm:$0xff]   ;;  %v9064_v26 = vld [vmem:[#allocation3 + $0x12c] ss:$24 sps:$4 sm:$0xff]  }
  0x2e   :  { %v9062_v25 = vld [vmem:[#allocation3 + $0x124] ss:$24 sps:$4 sm:$0xff]   ;;  %v9066_v27 = vld [vmem:[#allocation3 + $0x120] ss:$24 sps:$4 sm:$0xff]   ;;  %v9068_v29 = vld [vmem:[#allocation3 + $0x154] ss:$24 sps:$4 sm:$0xff]  }
  0x2f   :  { %v9067_v28 = vld [vmem:[#allocation3 + $0x128] ss:$24 sps:$4 sm:$0xff]   ;;  %v9070_v30 = vld [vmem:[#allocation3 + $0x15c] ss:$24 sps:$4 sm:$0xff]   ;;  %v9073_v32 = vld [vmem:[#allocation3 + $0x158] ss:$24 sps:$4 sm:$0xff]  }
  0x30   :  { %1048 = vmatpush1.bf16.msra.mxu0 %v9042_v11  ;;  %1194 = vmatpush1.bf16.msra.mxu1 %v9043_v12  ;;  %v9072_v31 = vld [vmem:[#allocation3 + $0x150] ss:$24 sps:$4 sm:$0xff]   ;;  %v9074_v33 = vld [vmem:[#allocation3 + $0x184] ss:$24 sps:$4 sm:$0xff]   ;;  %v9078_v35 = vld [vmem:[#allocation3 + $0x180] ss:$24 sps:$4 sm:$0xff]  }
  0x31   :  { %1049 = vmatprep.subr.bf16.mxu0 %v9044_v13  ;;  %1195 = vmatprep.subr.bf16.mxu1 %v9046_v14  ;;  %v9076_v34 = vld [vmem:[#allocation3 + $0x18c] ss:$24 sps:$4 sm:$0xff]   ;;  %v9079_v36 = vld [vmem:[#allocation3 + $0x188] ss:$24 sps:$4 sm:$0xff]   ;;  %v9082_v38 = vld [vmem:[#allocation3 + $0x1bc] ss:$24 sps:$4 sm:$0xff]  }
  0x32   :  { %v9080_v37 = vld [vmem:[#allocation3 + $0x1b4] ss:$24 sps:$4 sm:$0xff]   ;;  %v9084_v39 = vld [vmem:[#allocation3 + $0x1b0] ss:$24 sps:$4 sm:$0xff]   ;;  %v9086_v41 = vld [vmem:[#allocation3 + $0x1e4] ss:$24 sps:$4 sm:$0xff]  }
  0x33   :  { %v9085_v40 = vld [vmem:[#allocation3 + $0x1b8] ss:$24 sps:$4 sm:$0xff]   ;;  %v9088_v42 = vld [vmem:[#allocation3 + $0x1ec] ss:$24 sps:$4 sm:$0xff]   ;;  %v9091_v44 = vld [vmem:[#allocation3 + $0x1e8] ss:$24 sps:$4 sm:$0xff]  }
  0x34   :  { %1050 = vmatpush1.bf16.msra.mxu0 %v9048_v15  ;;  %1196 = vmatpush1.bf16.msra.mxu1 %v9049_v16  ;;  %v9090_v43 = vld [vmem:[#allocation3 + $0x1e0] ss:$24 sps:$4 sm:$0xff]   ;;  %v9092_v45 = vld [vmem:[#allocation3 + $0x214] ss:$24 sps:$4 sm:$0xff]   ;;  %v9096_v47 = vld [vmem:[#allocation3 + $0x210] ss:$24 sps:$4 sm:$0xff]  }
  0x35   :  { %1051 = vmatprep.subr.bf16.mxu0 %v9050_v17  ;;  %1197 = vmatprep.subr.bf16.mxu1 %v9052_v18  ;;  %v9094_v46 = vld [vmem:[#allocation3 + $0x21c] ss:$24 sps:$4 sm:$0xff]   ;;  %v9097_v48 = vld [vmem:[#allocation3 + $0x218] ss:$24 sps:$4 sm:$0xff]   ;;  %v9100_v51 = vld [vmem:[#allocation3 + $0x24c] ss:$24 sps:$4 sm:$0xff]  }
  0x36   :  { %v10242_v49 = vld [vmem:[%s12502_s0 + $0x4] ss:$12 sps:$4 sm:$0xff]   ;;  %v9102_v52 = vld [vmem:[#allocation3 + $0x240] ss:$24 sps:$4 sm:$0xff]   ;;  %v9104_v54 = vld [vmem:[#allocation3 + $0x274] ss:$24 sps:$4 sm:$0xff]  }
  0x37   :  { %v9098_v50 = vld [vmem:[#allocation3 + $0x244] ss:$24 sps:$4 sm:$0xff]   ;;  %1075 = vmatprep.mubr.bf16.mxu0 %v10242_v49  ;;  %1221 = vmatprep.mubr.bf16.mxu1 %v10242_v49  ;;  %v9103_v53 = vld [vmem:[#allocation3 + $0x248] ss:$24 sps:$4 sm:$0xff]   ;;  %v9109_v57 = vld [vmem:[#allocation3 + $0x278] ss:$24 sps:$4 sm:$0xff]  }
  0x38   :  { %1052 = vmatpush1.bf16.msra.mxu0 %v9054_v19  ;;  %1198 = vmatpush1.bf16.msra.mxu1 %v9055_v20  ;;  %v9106_v55 = vld [vmem:[#allocation3 + $0x27c] ss:$24 sps:$4 sm:$0xff]   ;;  %v9108_v56 = vld [vmem:[#allocation3 + $0x270] ss:$24 sps:$4 sm:$0xff]   ;;  %v9112_v59 = vld [vmem:[#allocation3 + $0x2ac] ss:$24 sps:$4 sm:$0xff]  }
  0x39   :  { %1053 = vmatprep.subr.bf16.mxu0 %v9056_v21  ;;  %1199 = vmatprep.subr.bf16.mxu1 %v9058_v22  ;;  %v9110_v58 = vld [vmem:[#allocation3 + $0x2a4] ss:$24 sps:$4 sm:$0xff]   ;;  %v9114_v60 = vld [vmem:[#allocation3 + $0x2a0] ss:$24 sps:$4 sm:$0xff]   ;;  %v9116_v62 = vld [vmem:[#allocation3 + $0x2d4] ss:$24 sps:$4 sm:$0xff]  }
  0x3a   :  { %v9115_v61 = vld [vmem:[#allocation3 + $0x2a8] ss:$24 sps:$4 sm:$0xff]   ;;  %v9118_v63 = vld [vmem:[#allocation3 + $0x2dc] ss:$24 sps:$4 sm:$0xff]   ;;  %v9121_v2 = vld [vmem:[#allocation3 + $0x2d8] ss:$24 sps:$4 sm:$0xff]  }
  0x3b   :  { %v9120_v1 = vld [vmem:[#allocation3 + $0x2d0] ss:$24 sps:$4 sm:$0xff]   ;;  %v9127_v3 = vld [vmem:[#allocation3 + $0x304] ss:$24 sps:$4 sm:$0xff]   ;;  %v10249_v5 = vld [vmem:[%s12502_s0] ss:$12 sps:$4 sm:$0xff]  }
  0x3c   :  { %1054 = vmatpush1.bf16.msra.mxu0 %v9060_v23  ;;  %1200 = vmatpush1.bf16.msra.mxu1 %v9061_v24  ;;  %v9130_v4 = vld [vmem:[#allocation3 + $0x30c] ss:$24 sps:$4 sm:$0xff]   ;;  %v9125_v6 = vld [vmem:[#allocation3 + $0x300] ss:$24 sps:$4 sm:$0xff]   ;;  %v9136_v9 = vld [vmem:[#allocation3 + $0x33c] ss:$24 sps:$4 sm:$0xff]  }
  0x3d   :  { %1055 = vmatprep.subr.bf16.mxu0 %v9062_v25  ;;  %1201 = vmatprep.subr.bf16.mxu1 %v9064_v26  ;;  %v9128_v7 = vld [vmem:[#allocation3 + $0x308] ss:$24 sps:$4 sm:$0xff]   ;;  %v9133_v8 = vld [vmem:[#allocation3 + $0x334] ss:$24 sps:$4 sm:$0xff]   ;;  %v9134_v12 = vld [vmem:[#allocation3 + $0x338] ss:$24 sps:$4 sm:$0xff]  }
  0x3e   :  { %v10254_v10 = vld [vmem:[%s12502_s0 + $0x1c] ss:$12 sps:$4 sm:$0xff]   ;;  %v9145_v14 = vld [vmem:[#allocation3 + $0x36c] ss:$24 sps:$4 sm:$0xff]   ;;  %v9140_v16 = vld [vmem:[#allocation3 + $0x360] ss:$24 sps:$4 sm:$0xff]  }
  0x3f   :  { %v9131_v11 = vld [vmem:[#allocation3 + $0x330] ss:$24 sps:$4 sm:$0xff]   ;;  %v9142_v13 = vld [vmem:[#allocation3 + $0x364] ss:$24 sps:$4 sm:$0xff]   ;;  %v9148_v18 = vld [vmem:[#allocation3 + $0x394] ss:$24 sps:$4 sm:$0xff]  }
  0x40   :  { %1056 = vmatpush1.bf16.msra.mxu0 %v9066_v27  ;;  %1202 = vmatpush1.bf16.msra.mxu1 %v9067_v28  ;;  %v10263_v15 = vld [vmem:[%s12502_s0 + $0x18] ss:$12 sps:$4 sm:$0xff]   ;;  %v9143_v17 = vld [vmem:[#allocation3 + $0x368] ss:$24 sps:$4 sm:$0xff]   ;;  %v9151_v19 = vld [vmem:[#allocation3 + $0x39c] ss:$24 sps:$4 sm:$0xff]  }
  0x41   :  { %1057 = vmatprep.subr.bf16.mxu0 %v9068_v29  ;;  %1203 = vmatprep.subr.bf16.mxu1 %v9070_v30  ;;  %v10268_v20 = vld [vmem:[%s12502_s0 + $0x34] ss:$12 sps:$4 sm:$0xff]   ;;  %v9146_v21 = vld [vmem:[#allocation3 + $0x390] ss:$24 sps:$4 sm:$0xff]   ;;  %v9157_v23 = vld [vmem:[#allocation3 + $0x3c4] ss:$24 sps:$4 sm:$0xff]  }
  0x42   :  { %v9149_v22 = vld [vmem:[#allocation3 + $0x398] ss:$24 sps:$4 sm:$0xff]   ;;  %v9160_v24 = vld [vmem:[#allocation3 + $0x3cc] ss:$24 sps:$4 sm:$0xff]   ;;  %v9158_v27 = vld [vmem:[#allocation3 + $0x3c8] ss:$24 sps:$4 sm:$0xff]  }
  0x43   :  { %v10277_v25 = vld [vmem:[%s12502_s0 + $0x30] ss:$12 sps:$4 sm:$0xff]   ;;  %v9155_v26 = vld [vmem:[#allocation3 + $0x3c0] ss:$24 sps:$4 sm:$0xff]   ;;  %v9163_v28 = vld [vmem:[#allocation3 + $0x3f4] ss:$24 sps:$4 sm:$0xff]  }
  0x44   :  { %1058 = vmatpush1.bf16.msra.mxu0 %v9072_v31  ;;  %1204 = vmatpush1.bf16.msra.mxu1 %v9073_v32  ;;  %v9166_v29 = vld [vmem:[#allocation3 + $0x3fc] ss:$24 sps:$4 sm:$0xff]   ;;  %v10282_v30 = vld [vmem:[%s12502_s0 + $0x4c] ss:$12 sps:$4 sm:$0xff]   ;;  %v9161_v31 = vld [vmem:[#allocation3 + $0x3f0] ss:$24 sps:$4 sm:$0xff]  }
  0x45   :  { %1059 = vmatprep.subr.bf16.mxu0 %v9074_v33  ;;  %1205 = vmatprep.subr.bf16.mxu1 %v9076_v34  ;;  %v9164_v32 = vld [vmem:[#allocation3 + $0x3f8] ss:$24 sps:$4 sm:$0xff]   ;;  %v9172_v33 = vld [vmem:[#allocation3 + $0x424] ss:$24 sps:$4 sm:$0xff]  }
  0x46   :  { %v9175_v34 = vld [vmem:[#allocation3 + $0x42c] ss:$24 sps:$4 sm:$0xff]  }
  0x48   :  { %1060 = vmatpush1.bf16.msra.mxu0 %v9078_v35  ;;  %1206 = vmatpush1.bf16.msra.mxu1 %v9079_v36  ;;  %v10291_v35 = vld [vmem:[%s12502_s0 + $0x48] ss:$12 sps:$4 sm:$0xff]   ;;  %v9170_v36 = vld [vmem:[#allocation3 + $0x420] ss:$24 sps:$4 sm:$0xff]  }
  0x49   :  { %1061 = vmatprep.subr.bf16.mxu0 %v9080_v37  ;;  %1207 = vmatprep.subr.bf16.mxu1 %v9082_v38  ;;  %v9173_v37 = vld [vmem:[#allocation3 + $0x428] ss:$24 sps:$4 sm:$0xff]   ;;  %v9178_v38 = vld [vmem:[#allocation3 + $0x454] ss:$24 sps:$4 sm:$0xff]  }
  0x4c   :  { %1062 = vmatpush1.bf16.msra.mxu0 %v9084_v39  ;;  %1208 = vmatpush1.bf16.msra.mxu1 %v9085_v40  ;;  %v9181_v39 = vld [vmem:[#allocation3 + $0x45c] ss:$24 sps:$4 sm:$0xff]   ;;  %v9176_v40 = vld [vmem:[#allocation3 + $0x450] ss:$24 sps:$4 sm:$0xff]  }
  0x4d   :  { %1063 = vmatprep.subr.bf16.mxu0 %v9086_v41  ;;  %1209 = vmatprep.subr.bf16.mxu1 %v9088_v42  ;;  %v9179_v41 = vld [vmem:[#allocation3 + $0x458] ss:$24 sps:$4 sm:$0xff]   ;;  %v9185_v42 = vld [vmem:[#allocation3 + $0x14] ss:$24 sps:$4 sm:$0xff]  }
  0x50   :  { %1064 = vmatpush1.bf16.msra.mxu0 %v9090_v43  ;;  %1210 = vmatpush1.bf16.msra.mxu1 %v9091_v44  ;;  %v9188_v43 = vld [vmem:[#allocation5 + $0x4] ss:$24 sps:$4 sm:$0xff]   ;;  %v10300_v44 = vld [vmem:[%s12502_s0 + $0x8] ss:$12 sps:$4 sm:$0xff]  }
  0x51   :  { %1065 = vmatprep.subr.bf16.mxu0 %v9092_v45  ;;  %1211 = vmatprep.subr.bf16.mxu1 %v9094_v46  ;;  %v9183_v45 = vld [vmem:[#allocation3 + $0x10] ss:$24 sps:$4 sm:$0xff]   ;;  %v9186_v46 = vld [vmem:[#allocation5] ss:$24 sps:$4 sm:$0xff]  }
  0x54   :  { %1066 = vmatpush1.bf16.msra.mxu0 %v9096_v47  ;;  %1212 = vmatpush1.bf16.msra.mxu1 %v9097_v48  ;;  %v9191_v47 = vld [vmem:[#allocation3 + $0x44] ss:$24 sps:$4 sm:$0xff]   ;;  %v9194_v48 = vld [vmem:[#allocation5 + $0x34] ss:$24 sps:$4 sm:$0xff]  }
  0x55   :  { %1067 = vmatprep.subr.bf16.mxu0 %v9098_v50  ;;  %1213 = vmatprep.subr.bf16.mxu1 %v9100_v51  ;;  %v9189_v50 = vld [vmem:[#allocation3 + $0x40] ss:$24 sps:$4 sm:$0xff]   ;;  %v9192_v51 = vld [vmem:[#allocation5 + $0x30] ss:$24 sps:$4 sm:$0xff]  }
  0x58   :  { %1068 = vmatpush1.bf16.msra.mxu0 %v9102_v52  ;;  %1214 = vmatpush1.bf16.msra.mxu1 %v9103_v53  ;;  %v9198_v52 = vld [vmem:[#allocation3 + $0x74] ss:$24 sps:$4 sm:$0xff]   ;;  %v9201_v53 = vld [vmem:[#allocation5 + $0x64] ss:$24 sps:$4 sm:$0xff]  }
  0x59   :  { %1069 = vmatprep.subr.bf16.mxu0 %v9104_v54  ;;  %1215 = vmatprep.subr.bf16.mxu1 %v9106_v55  ;;  %v10309_v54 = vld [vmem:[%s12502_s0 + $0x20] ss:$12 sps:$4 sm:$0xff]   ;;  %v9196_v55 = vld [vmem:[#allocation3 + $0x70] ss:$24 sps:$4 sm:$0xff]  }
  0x5c   :  { %1070 = vmatpush1.bf16.msra.mxu0 %v9108_v56  ;;  %1216 = vmatpush1.bf16.msra.mxu1 %v9109_v57  ;;  %v9199_v56 = vld [vmem:[#allocation5 + $0x60] ss:$24 sps:$4 sm:$0xff]   ;;  %v9204_v57 = vld [vmem:[#allocation3 + $0xa4] ss:$24 sps:$4 sm:$0xff]  }
  0x5d   :  { %1071 = vmatprep.subr.bf16.mxu0 %v9110_v58  ;;  %1217 = vmatprep.subr.bf16.mxu1 %v9112_v59  ;;  %v9207_v58 = vld [vmem:[#allocation5 + $0x94] ss:$24 sps:$4 sm:$0xff]   ;;  %v9202_v59 = vld [vmem:[#allocation3 + $0xa0] ss:$24 sps:$4 sm:$0xff]  }
  0x60   :  { %1072 = vmatpush1.bf16.msra.mxu0 %v9114_v60  ;;  %1218 = vmatpush1.bf16.msra.mxu1 %v9115_v61  ;;  %v9205_v60 = vld [vmem:[#allocation5 + $0x90] ss:$24 sps:$4 sm:$0xff]   ;;  %v9211_v61 = vld [vmem:[#allocation3 + $0xd4] ss:$24 sps:$4 sm:$0xff]  }
  0x61   :  { %1073 = vmatprep.subr.bf16.mxu0 %v9116_v62  ;;  %1219 = vmatprep.subr.bf16.mxu1 %v9118_v63  ;;  %v9214_v62 = vld [vmem:[#allocation5 + $0xc4] ss:$24 sps:$4 sm:$0xff]  }
  0x62   :  { %v10318_v63 = vld [vmem:[%s12502_s0 + $0x38] ss:$12 sps:$4 sm:$0xff]  }
  0x64   :  { %1074 = vmatpush1.bf16.msra.mxu0 %v9120_v1  ;;  %1220 = vmatpush1.bf16.msra.mxu1 %v9121_v2  ;;  %v9209_v1 = vld [vmem:[#allocation3 + $0xd0] ss:$24 sps:$4 sm:$0xff]   ;;  %v9212_v2 = vld [vmem:[#allocation5 + $0xc0] ss:$24 sps:$4 sm:$0xff]  }
  0x65   :  { %1116 = vmatprep.subr.bf16.mxu0 %v9127_v3  ;;  %1262 = vmatprep.subr.bf16.mxu1 %v9130_v4  ;;  %v9217_v3 = vld [vmem:[#allocation3 + $0x104] ss:$24 sps:$4 sm:$0xff]   ;;  %v9220_v4 = vld [vmem:[#allocation5 + $0xf4] ss:$24 sps:$4 sm:$0xff]  }
  0x67   :  { %1076 = vmatmul.mubr.bf16.vlgmr.msra.gmra.mrb[0].mxu0 %v10249_v5  ;;  %1222 = vmatmul.mubr.bf16.vlgmr.msra.gmra.mrb[0].mxu1 %v10249_v5 }
  0x68   :  { %1117 = vmatpush1.bf16.msra.mxu0 %v9125_v6  ;;  %1263 = vmatpush1.bf16.msra.mxu1 %v9128_v7  ;;  %v9215_v6 = vld [vmem:[#allocation3 + $0x100] ss:$24 sps:$4 sm:$0xff]   ;;  %v9218_v7 = vld [vmem:[#allocation5 + $0xf0] ss:$24 sps:$4 sm:$0xff]  }
  0x69   :  { %1118 = vmatprep.subr.bf16.mxu0 %v9133_v8  ;;  %1264 = vmatprep.subr.bf16.mxu1 %v9136_v9  ;;  %v9224_v8 = vld [vmem:[#allocation3 + $0x134] ss:$24 sps:$4 sm:$0xff]   ;;  %v9227_v9 = vld [vmem:[#allocation5 + $0x124] ss:$24 sps:$4 sm:$0xff]  }
  0x6a   :  { %1085 = vmatprep.mubr.bf16.mxu0 %v10254_v10  ;;  %1231 = vmatprep.mubr.bf16.mxu1 %v10254_v10 }
  0x6c   :  { %1119 = vmatpush1.bf16.msra.mxu0 %v9131_v11  ;;  %1265 = vmatpush1.bf16.msra.mxu1 %v9134_v12  ;;  %v10327_v11 = vld [vmem:[%s12502_s0 + $0x50] ss:$12 sps:$4 sm:$0xff]  }
  0x6d   :  { %1120 = vmatprep.subr.bf16.mxu0 %v9142_v13  ;;  %1266 = vmatprep.subr.bf16.mxu1 %v9145_v14  ;;  %v9222_v12 = vld [vmem:[#allocation3 + $0x130] ss:$24 sps:$4 sm:$0xff]   ;;  %v9225_v13 = vld [vmem:[#allocation5 + $0x120] ss:$24 sps:$4 sm:$0xff]   ;;  %v9230_v14 = vld [vmem:[#allocation3 + $0x164] ss:$24 sps:$4 sm:$0xff]  }
  0x6f   :  { %1086 = vmatmul.mubr.bf16.gmra.mrb[4].mxu0 %v10263_v15  ;;  %1232 = vmatmul.mubr.bf16.gmra.mrb[4].mxu1 %v10263_v15 }
  0x70   :  { %1121 = vmatpush1.bf16.msra.mxu0 %v9140_v16  ;;  %1267 = vmatpush1.bf16.msra.mxu1 %v9143_v17  ;;  %v9233_v16 = vld [vmem:[#allocation5 + $0x154] ss:$24 sps:$4 sm:$0xff]   ;;  %v9228_v17 = vld [vmem:[#allocation3 + $0x160] ss:$24 sps:$4 sm:$0xff]  }
  0x71   :  { %1122 = vmatprep.subr.bf16.mxu0 %v9148_v18  ;;  %1268 = vmatprep.subr.bf16.mxu1 %v9151_v19  ;;  %v9231_v18 = vld [vmem:[#allocation5 + $0x150] ss:$24 sps:$4 sm:$0xff]   ;;  %v9236_v19 = vld [vmem:[#allocation3 + $0x194] ss:$24 sps:$4 sm:$0xff]  }
  0x72   :  { %1095 = vmatprep.mubr.bf16.mxu0 %v10268_v20  ;;  %1241 = vmatprep.mubr.bf16.mxu1 %v10268_v20 }
  0x74   :  { %1123 = vmatpush1.bf16.msra.mxu0 %v9146_v21  ;;  %1269 = vmatpush1.bf16.msra.mxu1 %v9149_v22  ;;  %v9239_v21 = vld [vmem:[#allocation5 + $0x184] ss:$24 sps:$4 sm:$0xff]   ;;  %v10147_v22 = vmov 0.0|0.0  }
  0x75   :  { %1124 = vmatprep.subr.bf16.mxu0 %v9157_v23  ;;  %1270 = vmatprep.subr.bf16.mxu1 %v9160_v24  ;;  %v9234_v23 = vld [vmem:[#allocation3 + $0x190] ss:$24 sps:$4 sm:$0xff]   ;;  %v9237_v24 = vld [vmem:[#allocation5 + $0x180] ss:$24 sps:$4 sm:$0xff]  }
  0x77   :  { %1096 = vmatmul.mubr.bf16.gmra.mrb[8].mxu0 %v10277_v25  ;;  %1242 = vmatmul.mubr.bf16.gmra.mrb[8].mxu1 %v10277_v25 }
  0x78   :  { %1125 = vmatpush1.bf16.msra.mxu0 %v9155_v26  ;;  %1271 = vmatpush1.bf16.msra.mxu1 %v9158_v27  ;;  %v9242_v26 = vld [vmem:[#allocation3 + $0x1c4] ss:$24 sps:$4 sm:$0xff]   ;;  %v9245_v27 = vld [vmem:[#allocation5 + $0x1b4] ss:$24 sps:$4 sm:$0xff]  }
  0x79   :  { %1126 = vmatprep.subr.bf16.mxu0 %v9163_v28  ;;  %1272 = vmatprep.subr.bf16.mxu1 %v9166_v29  ;;  %v9240_v28 = vld [vmem:[#allocation3 + $0x1c0] ss:$24 sps:$4 sm:$0xff]   ;;  %v9243_v29 = vld [vmem:[#allocation5 + $0x1b0] ss:$24 sps:$4 sm:$0xff]  }
  0x7a   :  { %1105 = vmatprep.mubr.bf16.mxu0 %v10282_v30  ;;  %1251 = vmatprep.mubr.bf16.mxu1 %v10282_v30 }
  0x7c   :  { %1127 = vmatpush1.bf16.msra.mxu0 %v9161_v31  ;;  %1273 = vmatpush1.bf16.msra.mxu1 %v9164_v32  ;;  %v9248_v31 = vld [vmem:[#allocation3 + $0x1f4] ss:$24 sps:$4 sm:$0xff]   ;;  %v9251_v32 = vld [vmem:[#allocation5 + $0x1e4] ss:$24 sps:$4 sm:$0xff]  }
  0x7d   :  { %1128 = vmatprep.subr.bf16.mxu0 %v9172_v33  ;;  %1274 = vmatprep.subr.bf16.mxu1 %v9175_v34  ;;  %v9249_v33 = vld [vmem:[#allocation5 + $0x1e0] ss:$24 sps:$4 sm:$0xff]   ;;  %v9254_v34 = vld [vmem:[#allocation3 + $0x224] ss:$24 sps:$4 sm:$0xff]  }
  0x7f   :  { %1106 = vmatmul.mubr.bf16.gmra.mrb[12].mxu0 %v10291_v35  ;;  %1252 = vmatmul.mubr.bf16.gmra.mrb[12].mxu1 %v10291_v35 }
  0x80   :  { %1129 = vmatpush1.bf16.msra.mxu0 %v9170_v36  ;;  %1275 = vmatpush1.bf16.msra.mxu1 %v9173_v37  ;;  %v9257_v36 = vld [vmem:[#allocation5 + $0x214] ss:$24 sps:$4 sm:$0xff]   ;;  %v9252_v37 = vld [vmem:[#allocation3 + $0x220] ss:$24 sps:$4 sm:$0xff]  }
  0x81   :  { %1130 = vmatprep.subr.bf16.mxu0 %v9178_v38  ;;  %1276 = vmatprep.subr.bf16.mxu1 %v9181_v39  ;;  %v9255_v38 = vld [vmem:[#allocation5 + $0x210] ss:$24 sps:$4 sm:$0xff]   ;;  %v9260_v39 = vld [vmem:[#allocation3 + $0x254] ss:$24 sps:$4 sm:$0xff]  }
  0x82   :  { %1148 = vmatprep.mubr.bf16.mxu0 %v12515_v0  ;;  %1294 = vmatprep.mubr.bf16.mxu1 %v12515_v0 }
  0x84   :  { %1131 = vmatpush1.bf16.msra.mxu0 %v9176_v40  ;;  %1277 = vmatpush1.bf16.msra.mxu1 %v9179_v41  ;;  %v9263_v40 = vld [vmem:[#allocation5 + $0x244] ss:$24 sps:$4 sm:$0xff]   ;;  %v9258_v41 = vld [vmem:[#allocation3 + $0x250] ss:$24 sps:$4 sm:$0xff]  }
  0x85   :  { %1335 = vmatprep.subr.bf16.mxu0 %v9185_v42  ;;  %2145 = vmatprep.subr.bf16.mxu1 %v9188_v43  ;;  %v9261_v42 = vld [vmem:[#allocation5 + $0x240] ss:$24 sps:$4 sm:$0xff]   ;;  %v9266_v43 = vld [vmem:[#allocation3 + $0x284] ss:$24 sps:$4 sm:$0xff]  }
  0x87   :  { %1149 = vmatmul.mubr.bf16.vlgmr.msra.gmra.mrb[0].mxu0 %v10300_v44  ;;  %1295 = vmatmul.mubr.bf16.vlgmr.msra.gmra.mrb[0].mxu1 %v10300_v44 }
  0x88   :  { %1336 = vmatpush1.bf16.msra.mxu0 %v9183_v45  ;;  %2146 = vmatpush1.bf16.msra.mxu1 %v9186_v46  ;;  %v9269_v45 = vld [vmem:[#allocation5 + $0x274] ss:$24 sps:$4 sm:$0xff]   ;;  %v9264_v46 = vld [vmem:[#allocation3 + $0x280] ss:$24 sps:$4 sm:$0xff]  }
  0x89   :  { %1337 = vmatprep.subr.bf16.mxu0 %v9191_v47  ;;  %2147 = vmatprep.subr.bf16.mxu1 %v9194_v48  ;;  %v9267_v47 = vld [vmem:[#allocation5 + $0x270] ss:$24 sps:$4 sm:$0xff]   ;;  %v9272_v48 = vld [vmem:[#allocation3 + $0x2b4] ss:$24 sps:$4 sm:$0xff]  }
  0x8a   :  { %1158 = vmatprep.mubr.bf16.mxu0 %v12515_v0  ;;  %1304 = vmatprep.mubr.bf16.mxu1 %v12515_v0 }
  0x8c   :  { %1338 = vmatpush1.bf16.msra.mxu0 %v9189_v50  ;;  %2148 = vmatpush1.bf16.msra.mxu1 %v9192_v51  ;;  %v9275_v50 = vld [vmem:[#allocation5 + $0x2a4] ss:$24 sps:$4 sm:$0xff]   ;;  %v9270_v51 = vld [vmem:[#allocation3 + $0x2b0] ss:$24 sps:$4 sm:$0xff]  }
  0x8d   :  { %1339 = vmatprep.subr.bf16.mxu0 %v9198_v52  ;;  %2149 = vmatprep.subr.bf16.mxu1 %v9201_v53  ;;  %v9273_v52 = vld [vmem:[#allocation5 + $0x2a0] ss:$24 sps:$4 sm:$0xff]   ;;  %v9278_v53 = vld [vmem:[#allocation3 + $0x2e4] ss:$24 sps:$4 sm:$0xff]  }
  0x8f   :  { %1159 = vmatmul.mubr.bf16.gmra.mrb[4].mxu0 %v10309_v54  ;;  %1305 = vmatmul.mubr.bf16.gmra.mrb[4].mxu1 %v10309_v54 }
  0x90   :  { %1340 = vmatpush1.bf16.msra.mxu0 %v9196_v55  ;;  %2150 = vmatpush1.bf16.msra.mxu1 %v9199_v56  ;;  %v9281_v55 = vld [vmem:[#allocation5 + $0x2d4] ss:$24 sps:$4 sm:$0xff]   ;;  %v9276_v56 = vld [vmem:[#allocation3 + $0x2e0] ss:$24 sps:$4 sm:$0xff]  }
  0x91   :  { %1341 = vmatprep.subr.bf16.mxu0 %v9204_v57  ;;  %2151 = vmatprep.subr.bf16.mxu1 %v9207_v58  ;;  %v9279_v57 = vld [vmem:[#allocation5 + $0x2d0] ss:$24 sps:$4 sm:$0xff]   ;;  %v9284_v58 = vld [vmem:[#allocation3 + $0x314] ss:$24 sps:$4 sm:$0xff]  }
  0x92   :  { %1168 = vmatprep.mubr.bf16.mxu0 %v12515_v0  ;;  %1314 = vmatprep.mubr.bf16.mxu1 %v12515_v0 }
  0x94   :  { %1342 = vmatpush1.bf16.msra.mxu0 %v9202_v59  ;;  %2152 = vmatpush1.bf16.msra.mxu1 %v9205_v60  ;;  %v10333_v59 = vld [vmem:[#allocation5 + $0xc] ss:$24 sps:$4 sm:$0xff]   ;;  %v9282_v60 = vld [vmem:[#allocation3 + $0x310] ss:$24 sps:$4 sm:$0xff]  }
  0x95   :  { %1343 = vmatprep.subr.bf16.mxu0 %v9211_v61  ;;  %2153 = vmatprep.subr.bf16.mxu1 %v9214_v62  ;;  %v10335_v61 = vld [vmem:[#allocation5 + $0x8] ss:$24 sps:$4 sm:$0xff]   ;;  %v9290_v62 = vld [vmem:[#allocation3 + $0x344] ss:$24 sps:$4 sm:$0xff]  }
  0x97   :  { %1169 = vmatmul.mubr.bf16.gmra.mrb[8].mxu0 %v10318_v63  ;;  %1315 = vmatmul.mubr.bf16.gmra.mrb[8].mxu1 %v10318_v63 }
  0x98   :  { %1344 = vmatpush1.bf16.msra.mxu0 %v9209_v1  ;;  %2154 = vmatpush1.bf16.msra.mxu1 %v9212_v2  ;;  %v10338_v1 = vld [vmem:[#allocation5 + $0x3c] ss:$24 sps:$4 sm:$0xff]   ;;  %v9288_v2 = vld [vmem:[#allocation3 + $0x340] ss:$24 sps:$4 sm:$0xff]  }
  0x99   :  { %1345 = vmatprep.subr.bf16.mxu0 %v9217_v3  ;;  %2155 = vmatprep.subr.bf16.mxu1 %v9220_v4  ;;  %v10342_v3 = vld [vmem:[#allocation5 + $0x38] ss:$24 sps:$4 sm:$0xff]   ;;  %v9296_v4 = vld [vmem:[#allocation3 + $0x374] ss:$24 sps:$4 sm:$0xff]  }
  0x9a   :  { %1178 = vmatprep.mubr.bf16.mxu0 %v12515_v0  ;;  %1324 = vmatprep.mubr.bf16.mxu1 %v12515_v0 }
  0x9c   :  { %1346 = vmatpush1.bf16.msra.mxu0 %v9215_v6  ;;  %2156 = vmatpush1.bf16.msra.mxu1 %v9218_v7  ;;  %v10346_v6 = vld [vmem:[#allocation5 + $0x6c] ss:$24 sps:$4 sm:$0xff]   ;;  %v9294_v7 = vld [vmem:[#allocation3 + $0x370] ss:$24 sps:$4 sm:$0xff]  }
  0x9d   :  { %1347 = vmatprep.subr.bf16.mxu0 %v9224_v8  ;;  %2157 = vmatprep.subr.bf16.mxu1 %v9227_v9  ;;  %v9302_v8 = vld [vmem:[#allocation3 + $0x3a4] ss:$24 sps:$4 sm:$0xff]  }
  0x9e   :  { %v10354_v9 = vld [vmem:[#allocation5 + $0x9c] ss:$24 sps:$4 sm:$0xff]  }
  0x9f   :  { %1179 = vmatmul.mubr.bf16.gmra.mrb[12].mxu0 %v10327_v11  ;;  %1325 = vmatmul.mubr.bf16.gmra.mrb[12].mxu1 %v10327_v11 }
  0xa0   :  { %1348 = vmatpush1.bf16.msra.mxu0 %v9222_v12  ;;  %2158 = vmatpush1.bf16.msra.mxu1 %v9225_v13  ;;  %v9300_v12 = vld [vmem:[#allocation3 + $0x3a0] ss:$24 sps:$4 sm:$0xff]  }
  0xa1   :  { %1349 = vmatprep.subr.bf16.mxu0 %v9230_v14  ;;  %2159 = vmatprep.subr.bf16.mxu1 %v9233_v16  ;;  %v10356_v13 = vld [vmem:[#allocation5 + $0x98] ss:$24 sps:$4 sm:$0xff]   ;;  %v10359_v14 = vld [vmem:[#allocation5 + $0xcc] ss:$24 sps:$4 sm:$0xff]  }
  0xa2   :  { %1367 = vmatprep.mubr.bf16.mxu0 %v10242_v49  ;;  %2177 = vmatprep.mubr.bf16.mxu1 %v10147_v22  ;;  %v9246_v49 = vld [vmem:[#allocation3 + $0x1f0] ss:$24 sps:$4 sm:$0xff]  }
  0xa3   :  { %v9306_v16 = vld [vmem:[#allocation3 + $0x3d0] ss:$24 sps:$4 sm:$0xff]  }
  0xa4   :  { %1350 = vmatpush1.bf16.msra.mxu0 %v9228_v17  ;;  %2160 = vmatpush1.bf16.msra.mxu1 %v9231_v18  ;;  %v10364_v17 = vld [vmem:[#allocation5 + $0xc8] ss:$24 sps:$4 sm:$0xff]   ;;  %v9314_v18 = vld [vmem:[#allocation3 + $0x404] ss:$24 sps:$4 sm:$0xff]  }
  0xa5   :  { %1351 = vmatprep.subr.bf16.mxu0 %v9236_v19  ;;  %2161 = vmatprep.subr.bf16.mxu1 %v9239_v21  ;;  %v10366_v19 = vld [vmem:[#allocation5 + $0xfc] ss:$24 sps:$4 sm:$0xff]   ;;  %v10370_v21 = vld [vmem:[#allocation5 + $0xf8] ss:$24 sps:$4 sm:$0xff]  }
  0xa8   :  { %1352 = vmatpush1.bf16.msra.mxu0 %v9234_v23  ;;  %2162 = vmatpush1.bf16.msra.mxu1 %v9237_v24  ;;  %v9320_v23 = vld [vmem:[#allocation3 + $0x434] ss:$24 sps:$4 sm:$0xff]  }
  0xa9   :  { %1353 = vmatprep.subr.bf16.mxu0 %v9242_v26  ;;  %2163 = vmatprep.subr.bf16.mxu1 %v9245_v27  ;;  %v10373_v24 = vld [vmem:[#allocation5 + $0x12c] ss:$24 sps:$4 sm:$0xff]   ;;  %v10378_v26 = vld [vmem:[#allocation5 + $0x128] ss:$24 sps:$4 sm:$0xff]  }
  0xaa   :  { %v9326_v27 = vld [vmem:[#allocation3 + $0x464] ss:$24 sps:$4 sm:$0xff]  }
  0xac   :  { %1354 = vmatpush1.bf16.msra.mxu0 %v9240_v28  ;;  %2164 = vmatpush1.bf16.msra.mxu1 %v9243_v29  ;;  %v10380_v28 = vld [vmem:[#allocation5 + $0x15c] ss:$24 sps:$4 sm:$0xff]   ;;  %v10384_v29 = vld [vmem:[#allocation5 + $0x158] ss:$24 sps:$4 sm:$0xff]  }
  0xad   :  { %1355 = vmatprep.subr.bf16.mxu0 %v9248_v31  ;;  %2165 = vmatprep.subr.bf16.mxu1 %v9251_v32  ;;  %v10387_v31 = vld [vmem:[#allocation5 + $0x18c] ss:$24 sps:$4 sm:$0xff]   ;;  %v10392_v32 = vld [vmem:[#allocation5 + $0x188] ss:$24 sps:$4 sm:$0xff]  }
  0xb0   :  { %1356 = vmatpush1.bf16.msra.mxu0 %v9246_v49  ;;  %2166 = vmatpush1.bf16.msra.mxu1 %v9249_v33  ;;  %v9333_v49 = vld [vmem:[#allocation5 + $0x10] ss:$24 sps:$4 sm:$0xff]   ;;  %v10394_v33 = vld [vmem:[#allocation5 + $0x1bc] ss:$24 sps:$4 sm:$0xff]  }
  0xb1   :  { %1357 = vmatprep.subr.bf16.mxu0 %v9254_v34  ;;  %2167 = vmatprep.subr.bf16.mxu1 %v9257_v36  ;;  %v9341_v34 = vld [vmem:[#allocation5 + $0x44] ss:$24 sps:$4 sm:$0xff]   ;;  %v9339_v36 = vld [vmem:[#allocation5 + $0x40] ss:$24 sps:$4 sm:$0xff]  }
  0xb4   :  { %1358 = vmatpush1.bf16.msra.mxu0 %v9252_v37  ;;  %2168 = vmatpush1.bf16.msra.mxu1 %v9255_v38  ;;  %v10401_v37 = vld [vmem:[#allocation5 + $0x1ec] ss:$24 sps:$4 sm:$0xff]  }
  0xb5   :  { %1359 = vmatprep.subr.bf16.mxu0 %v9260_v39  ;;  %2169 = vmatprep.subr.bf16.mxu1 %v9263_v40  ;;  %v9347_v38 = vld [vmem:[#allocation5 + $0x74] ss:$24 sps:$4 sm:$0xff]   ;;  %v10407_v39 = vld [vmem:[%s12503_s1] sm:$0xff] }
  0xb6   :  { %vm2311_vm0 = vcmp.gt.s32.totalorder %v10407_v39, 7  ;;  %v10412_v40 = vld [vmem:[#allocation5 + $0x1e8] ss:$24 sps:$4 sm:$0xff]   ;;  %vm2310_vm1 = vcmp.gt.s32.totalorder %v10407_v39, 0  ;;  %vm3846_vm2 = vcmp.gt.s32.totalorder %v10407_v39, 5  ;;  %vm4615_vm3 = vcmp.gt.s32.totalorder %v10407_v39, 4 }
  0xb8   :  { %1360 = vmatpush1.bf16.msra.mxu0 %v9258_v41  ;;  %2170 = vmatpush1.bf16.msra.mxu1 %v9261_v42  ;;  %v2319_v41 = vsel %vm2311_vm0, 1, %v12515_v0  ;;  %v10415_v42 = vld [vmem:[#allocation5 + $0x21c] ss:$24 sps:$4 sm:$0xff]  }
  0xb9   :  { %1361 = vmatprep.subr.bf16.mxu0 %v9266_v43  ;;  %2171 = vmatprep.subr.bf16.mxu1 %v9269_v45  ;;  %v9353_v43 = vld [vmem:[#allocation5 + $0xa4] ss:$24 sps:$4 sm:$0xff]   ;;  %v10420_v45 = vld [vmem:[#allocation5 + $0x218] ss:$24 sps:$4 sm:$0xff]  }
  0xba   :  { %2321 = vperm.xlu0 %9024, %v2319_v41   ;;  %v10474_v41 = vld [vmem:[#allocation5 + $0x2e0] ss:$24 sps:$4 sm:$0xff]  }
  0xbc   :  { %1362 = vmatpush1.bf16.msra.mxu0 %v9264_v46  ;;  %2172 = vmatpush1.bf16.msra.mxu1 %v9267_v47  ;;  %v9351_v46 = vld [vmem:[#allocation5 + $0xa0] ss:$24 sps:$4 sm:$0xff]   ;;  %v2312_v47 = vsel %vm2310_vm1, 1, %v12515_v0 }
  0xbd   :  { %1363 = vmatprep.subr.bf16.mxu0 %v9272_v48  ;;  %2173 = vmatprep.subr.bf16.mxu1 %v9275_v50  ;;  %v10424_v48 = vld [vmem:[#allocation5 + $0x24c] ss:$24 sps:$4 sm:$0xff]  }
  0xbe   :  { %v9359_v50 = vld [vmem:[#allocation5 + $0xd4] ss:$24 sps:$4 sm:$0xff]   ;;  %2314 = vperm.xlu0 %9024, %v2312_v47  }
  0xc0   :  { %1364 = vmatpush1.bf16.msra.mxu0 %v9270_v51  ;;  %2174 = vmatpush1.bf16.msra.mxu1 %v9273_v52  ;;  %v10429_v51 = vld [vmem:[#allocation5 + $0x248] ss:$24 sps:$4 sm:$0xff]  }
  0xc1   :  { %1365 = vmatprep.subr.bf16.mxu0 %v9278_v53  ;;  %2175 = vmatprep.subr.bf16.mxu1 %v9281_v55  ;;  %v9357_v52 = vld [vmem:[#allocation5 + $0xd0] ss:$24 sps:$4 sm:$0xff]   ;;  %v10431_v53 = vld [vmem:[#allocation5 + $0x27c] ss:$24 sps:$4 sm:$0xff]  }
  0xc2   :  { %v9365_v55 = vld [vmem:[#allocation5 + $0x104] ss:$24 sps:$4 sm:$0xff]  }
  0xc4   :  { %1366 = vmatpush1.bf16.msra.mxu0 %v9276_v56  ;;  %2176 = vmatpush1.bf16.msra.mxu1 %v9279_v57  ;;  %v9363_v56 = vld [vmem:[#allocation5 + $0x100] ss:$24 sps:$4 sm:$0xff]   ;;  %v10439_v57 = vld [vmem:[#allocation5 + $0x2ac] ss:$24 sps:$4 sm:$0xff]  }
  0xc5   :  { %1408 = vmatprep.subr.bf16.mxu0 %v9284_v58  ;;  %2186 = vmatprep.subr.bf16.mxu1 %v10333_v59  ;;  %v9371_v58 = vld [vmem:[#allocation5 + $0x134] ss:$24 sps:$4 sm:$0xff]  }
  0xc7   :  { %1368 = vmatmul.mubr.bf16.vlgmr.msra.gmra.mrb[16].mxu0 %v10249_v5  ;;  %2178 = vmatmul.mubr.bf16.vlgmr.msra.gmra.mrb[16].mxu1 %v10147_v22  ;;  %v10351_v5 = vld [vmem:[#allocation5 + $0x68] ss:$24 sps:$4 sm:$0xff]  }
  0xc8   :  { %1409 = vmatpush1.bf16.msra.mxu0 %v9282_v60  ;;  %2187 = vmatpush1.bf16.msra.mxu1 %v10335_v61  ;;  %v3855_v60 = vsel %vm3846_vm2, 1, %v12515_v0 }
  0xc9   :  { %1410 = vmatprep.subr.bf16.mxu0 %v9290_v62  ;;  %2188 = vmatprep.subr.bf16.mxu1 %v10338_v1  ;;  %v10445_v62 = vld [vmem:[#allocation5 + $0x2a8] ss:$24 sps:$4 sm:$0xff]  }
  0xca   :  { %1377 = vmatprep.mubr.bf16.mxu0 %v10254_v10  ;;  %2218 = vmatprep.mubr.bf16.mxu1 %v10147_v22  ;;  %v9308_v10 = vld [vmem:[#allocation3 + $0x3d4] ss:$24 sps:$4 sm:$0xff]  }
  0xcb   :  { %3857 = vperm.xlu0 %9024, %v3855_v60  }
  0xcc   :  { %1411 = vmatpush1.bf16.msra.mxu0 %v9288_v2  ;;  %2189 = vmatpush1.bf16.msra.mxu1 %v10342_v3  ;;  %v9369_v2 = vld [vmem:[#allocation5 + $0x130] ss:$24 sps:$4 sm:$0xff]  }
  0xcd   :  { %1412 = vmatprep.subr.bf16.mxu0 %v9296_v4  ;;  %2190 = vmatprep.subr.bf16.mxu1 %v10346_v6  ;;  %v10447_v4 = vld [vmem:[#allocation5 + $0x2dc] ss:$24 sps:$4 sm:$0xff]  }
  0xcf   :  { %1378 = vmatmul.mubr.bf16.gmra.mrb[20].mxu0 %v10263_v15  ;;  %v9312_v15 = vld [vmem:[#allocation3 + $0x400] ss:$24 sps:$4 sm:$0xff]  }
  0xd0   :  { %1413 = vmatpush1.bf16.msra.mxu0 %v9294_v7  ;;  %2191 = vmatpush1.bf16.msra.mxu1 %v10351_v5  ;;  %v10451_v7 = vld [vmem:[#allocation5 + $0x2d8] ss:$24 sps:$4 sm:$0xff]  }
  0xd1   :  { %1414 = vmatprep.subr.bf16.mxu0 %v9302_v8  ;;  %2192 = vmatprep.subr.bf16.mxu1 %v10354_v9  ;;  %v9375_v8 = vld [vmem:[#allocation5 + $0x160] ss:$24 sps:$4 sm:$0xff]  }
  0xd2   :  { %1387 = vmatprep.mubr.bf16.mxu0 %v10268_v20  ;;  %v9318_v20 = vld [vmem:[#allocation3 + $0x430] ss:$24 sps:$4 sm:$0xff]  }
  0xd4   :  { %1415 = vmatpush1.bf16.msra.mxu0 %v9300_v12  ;;  %2193 = vmatpush1.bf16.msra.mxu1 %v10356_v13  ;;  %v9380_v12 = vld [vmem:[#allocation5 + $0x194] ss:$24 sps:$4 sm:$0xff]  }
  0xd5   :  { %1416 = vmatprep.subr.bf16.mxu0 %v9308_v10  ;;  %2194 = vmatprep.subr.bf16.mxu1 %v10359_v14  ;;  %v9378_v10 = vld [vmem:[#allocation5 + $0x190] ss:$24 sps:$4 sm:$0xff]  }
  0xd7   :  { %1388 = vmatmul.mubr.bf16.gmra.mrb[24].mxu0 %v10277_v25  ;;  %v9324_v25 = vld [vmem:[#allocation3 + $0x460] ss:$24 sps:$4 sm:$0xff]  }
  0xd8   :  { %1417 = vmatpush1.bf16.msra.mxu0 %v9306_v16  ;;  %2195 = vmatpush1.bf16.msra.mxu1 %v10364_v17  ;;  %v9383_v16 = vld [vmem:[#allocation5 + $0x1c4] ss:$24 sps:$4 sm:$0xff]  }
  0xd9   :  { %1418 = vmatprep.subr.bf16.mxu0 %v9314_v18  ;;  %2196 = vmatprep.subr.bf16.mxu1 %v10366_v19  ;;  %v9381_v18 = vld [vmem:[#allocation5 + $0x1c0] ss:$24 sps:$4 sm:$0xff]  }
  0xda   :  { %1397 = vmatprep.mubr.bf16.mxu0 %v10282_v30  ;;  %v9335_v30 = vld [vmem:[#allocation5 + $0x14] ss:$24 sps:$4 sm:$0xff]  }
  0xdc   :  { %1419 = vmatpush1.bf16.msra.mxu0 %v9312_v15  ;;  %2197 = vmatpush1.bf16.msra.mxu1 %v10370_v21  ;;  %v9386_v15 = vld [vmem:[#allocation5 + $0x1f4] ss:$24 sps:$4 sm:$0xff]  }
  0xdd   :  { %1420 = vmatprep.subr.bf16.mxu0 %v9320_v23  ;;  %2198 = vmatprep.subr.bf16.mxu1 %v10373_v24  ;;  %v9389_v23 = vld [vmem:[#allocation5 + $0x224] ss:$24 sps:$4 sm:$0xff]  }
  0xdf   :  { %1398 = vmatmul.mubr.bf16.gmra.mrb[28].mxu0 %v10291_v35  ;;  %v10398_v35 = vld [vmem:[#allocation5 + $0x1b8] ss:$24 sps:$4 sm:$0xff]  }
  0xe0   :  { %1421 = vmatpush1.bf16.msra.mxu0 %v9318_v20  ;;  %2199 = vmatpush1.bf16.msra.mxu1 %v10378_v26  ;;  %v9387_v20 = vld [vmem:[#allocation5 + $0x220] ss:$24 sps:$4 sm:$0xff]  }
  0xe1   :  { %1422 = vmatprep.subr.bf16.mxu0 %v9326_v27  ;;  %2200 = vmatprep.subr.bf16.mxu1 %v10380_v28  ;;  %v9392_v27 = vld [vmem:[#allocation5 + $0x254] ss:$24 sps:$4 sm:$0xff]  }
  0xe2   :  { %1440 = vmatprep.mubr.bf16.mxu0 %v12515_v0 }
  0xe4   :  { %1423 = vmatpush1.bf16.msra.mxu0 %v9324_v25  ;;  %2201 = vmatpush1.bf16.msra.mxu1 %v10384_v29  ;;  %v9390_v25 = vld [vmem:[#allocation5 + $0x250] ss:$24 sps:$4 sm:$0xff]  }
  0xe5   :  { %2202 = vmatprep.subr.bf16.mxu1 %v10387_v31  ;;  %2227 = vmatprep.subr.bf16.mxu0 %v9335_v30  ;;  %v10459_v30 = vld [vmem:[#allocation5 + $0x284] ss:$24 sps:$4 sm:$0xff]  }
  0xe7   :  { %1441 = vmatmul.mubr.bf16.vlgmr.msra.gmra.mrb[16].mxu0 %v10300_v44  ;;  %v9345_v44 = vld [vmem:[#allocation5 + $0x70] ss:$24 sps:$4 sm:$0xff]  }
  0xe8   :  { %2203 = vmatpush1.bf16.msra.mxu1 %v10392_v32  ;;  %2228 = vmatpush1.bf16.msra.mxu0 %v9333_v49  ;;  %v10461_v49 = vld [vmem:[#allocation5 + $0x280] ss:$24 sps:$4 sm:$0xff]  }
  0xe9   :  { %2204 = vmatprep.subr.bf16.mxu1 %v10394_v33  ;;  %2229 = vmatprep.subr.bf16.mxu0 %v9341_v34  ;;  %v10463_v34 = vld [vmem:[#allocation5 + $0x2b4] ss:$24 sps:$4 sm:$0xff]  }
  0xea   :  { %1450 = vmatprep.mubr.bf16.mxu0 %v12515_v0 }
  0xec   :  { %2205 = vmatpush1.bf16.msra.mxu1 %v10398_v35  ;;  %2230 = vmatpush1.bf16.msra.mxu0 %v9339_v36  ;;  %v10466_v36 = vld [vmem:[#allocation5 + $0x2b0] ss:$24 sps:$4 sm:$0xff]  }
  0xed   :  { %2206 = vmatprep.subr.bf16.mxu1 %v10401_v37  ;;  %2231 = vmatprep.subr.bf16.mxu0 %v9347_v38  ;;  %v10469_v38 = vld [vmem:[#allocation5 + $0x2e4] ss:$24 sps:$4 sm:$0xff]  }
  0xef   :  { %1451 = vmatmul.mubr.bf16.gmra.mrb[20].mxu0 %v10309_v54  ;;  %v10435_v54 = vld [vmem:[#allocation5 + $0x278] ss:$24 sps:$4 sm:$0xff]  }
  0xf0   :  { %2207 = vmatpush1.bf16.msra.mxu1 %v10412_v40  ;;  %2232 = vmatpush1.bf16.msra.mxu0 %v9345_v44  ;;  %v4624_v44 = vsel %vm4615_vm3, 1, %v12515_v0 }
  0xf1   :  { %2208 = vmatprep.subr.bf16.mxu1 %v10415_v42  ;;  %2233 = vmatprep.subr.bf16.mxu0 %v9353_v43  ;;  %v10563_v43 = vld [vmem:[#allocation5] ss:$24 sps:$4 sm:$0xff]  }
  0xf2   :  { %1460 = vmatprep.mubr.bf16.mxu0 %v12515_v0  ;;  %4626 = vperm.xlu0 %9024, %v4624_v44  }
  0xf4   :  { %2209 = vmatpush1.bf16.msra.mxu1 %v10420_v45  ;;  %2234 = vmatpush1.bf16.msra.mxu0 %v9351_v46 }
  0xf5   :  { %2210 = vmatprep.subr.bf16.mxu1 %v10424_v48  ;;  %2235 = vmatprep.subr.bf16.mxu0 %v9359_v50 }
  0xf7   :  { %1461 = vmatmul.mubr.bf16.gmra.mrb[24].mxu0 %v10318_v63  ;;  %v9377_v63 = vld [vmem:[#allocation5 + $0x164] ss:$24 sps:$4 sm:$0xff]  }
  0xf8   :  { %2211 = vmatpush1.bf16.msra.mxu1 %v10429_v51  ;;  %2236 = vmatpush1.bf16.msra.mxu0 %v9357_v52  ;;  %v10574_v52 = vld [vmem:[#allocation5 + $0x34] ss:$24 sps:$4 sm:$0xff]  }
  0xf9   :  { %2212 = vmatprep.subr.bf16.mxu1 %v10431_v53  ;;  %2237 = vmatprep.subr.bf16.mxu0 %v9365_v55 }
  0xfa   :  { %1470 = vmatprep.mubr.bf16.mxu0 %v12515_v0 }
  0xfc   :  { %2213 = vmatpush1.bf16.msra.mxu1 %v10435_v54  ;;  %2238 = vmatpush1.bf16.msra.mxu0 %v9363_v56 }
  0xfd   :  { %2214 = vmatprep.subr.bf16.mxu1 %v10439_v57  ;;  %2239 = vmatprep.subr.bf16.mxu0 %v9371_v58 }
  0xff   :  { %1471 = vmatmul.mubr.bf16.gmra.mrb[28].mxu0 %v10327_v11  ;;  %v9384_v11 = vld [vmem:[#allocation5 + $0x1f0] ss:$24 sps:$4 sm:$0xff]  }
 0x100   :  { %2215 = vmatpush1.bf16.msra.mxu1 %v10445_v62  ;;  %2240 = vmatpush1.bf16.msra.mxu0 %v9369_v2 }
 0x101   :  { %2216 = vmatprep.subr.bf16.mxu1 %v10447_v4  ;;  %2241 = vmatprep.subr.bf16.mxu0 %v9377_v63 }
 0x102   :  { %2259 = vmatprep.mubr.bf16.mxu0 %v10147_v22 }
 0x104   :  { %2217 = vmatpush1.bf16.msra.mxu1 %v10451_v7  ;;  %2242 = vmatpush1.bf16.msra.mxu0 %v9375_v8  ;;  %v10601_v8 = vld [vmem:[#allocation5 + $0x60] ss:$24 sps:$4 sm:$0xff]  }
 0x105   :  { %2243 = vmatprep.subr.bf16.mxu0 %v9380_v12 }
 0x107   :  { %2219 = vmatmul.mubr.bf16.vlgmr.msra.gmra.mrb[20].mxu1 %v10147_v22 }
 0x108   :  { %2244 = vmatpush1.bf16.msra.mxu0 %v9378_v10 }
 0x109   :  { %2245 = vmatprep.subr.bf16.mxu0 %v9383_v16 }
 0x10c   :  { %2246 = vmatpush1.bf16.msra.mxu0 %v9381_v18 }
 0x10d   :  { %2247 = vmatprep.subr.bf16.mxu0 %v9386_v15 }
 0x110   :  { %2248 = vmatpush1.bf16.msra.mxu0 %v9384_v11 }
 0x111   :  { %2249 = vmatprep.subr.bf16.mxu0 %v9389_v23  ;;  %v10611_v23 = vld [vmem:[#allocation5 + $0x94] ss:$24 sps:$4 sm:$0xff]  }
 0x114   :  { %2250 = vmatpush1.bf16.msra.mxu0 %v9387_v20 }
 0x115   :  { %2251 = vmatprep.subr.bf16.mxu0 %v9392_v27 }
 0x118   :  { %2252 = vmatpush1.bf16.msra.mxu0 %v9390_v25 }
 0x119   :  { %2253 = vmatprep.subr.bf16.mxu0 %v10459_v30 }
 0x11c   :  { %2254 = vmatpush1.bf16.msra.mxu0 %v10461_v49 }
 0x11d   :  { %2255 = vmatprep.subr.bf16.mxu0 %v10463_v34 }
 0x120   :  { %2256 = vmatpush1.bf16.msra.mxu0 %v10466_v36 }
 0x121   :  { %2257 = vmatprep.subr.bf16.mxu0 %v10469_v38 }
 0x124   :  { %2258 = vmatpush1.bf16.msra.mxu0 %v10474_v41 }
 0x125   :  { %2952 = vmatprep.subr.bf16.mxu0 %v10333_v59 }
 0x127   :  { %2260 = vmatmul.mubr.bf16.vlgmr.msra.gmra.mrb[32].mxu0 %v10147_v22  ;;  %v229_v22 = vlaneseq }
 0x128   :  { %2953 = vmatpush1.bf16.msra.mxu0 %v10335_v61 }
 0x129   :  { %2954 = vmatprep.subr.bf16.mxu0 %v10338_v1  ;;  %v10501_v59 = vshrl.u32 %v229_v22, 7  ;;  %v10510_v1 = vld [vmem:[%s12505_s3] sm:$0x3f]  ;;  %v10619_v22 = vld [vmem:[#allocation5 + $0x90] ss:$24 sps:$4 sm:$0xff]  }
 0x12b   :  { %v12517_v61 = vsub.s32 3, %v10501_v59 }
 0x12c   :  { %2955 = vmatpush1.bf16.msra.mxu0 %v10342_v3  ;;  %v10514_v3 = vsub.s32 0, %v10501_v59 }
 0x12d   :  { %2956 = vmatprep.subr.bf16.mxu0 %v10346_v6  ;;  %v12518_v6 = vsub.s32 2, %v10501_v59 }
 0x12e   :  { %12600 = vst [vmem:[#allocation9_spill] sm:$0xff] %v10514_v3 }
 0x130   :  { %2957 = vmatpush1.bf16.msra.mxu0 %v10351_v5  ;;  %v10518_v5 = vsub.s32 1, %v10501_v59 }
 0x131   :  { %2958 = vmatprep.subr.bf16.mxu0 %v10354_v9  ;;  %v10523_v9 = vrot.slane %v10510_v1, %v12517_v61 }
 0x132   :  { %12601 = vst [vmem:[#allocation10_spill] sm:$0xff] %v10518_v5 }
 0x134   :  { %2959 = vmatpush1.bf16.msra.mxu0 %v10356_v13 }
 0x135   :  { %2960 = vmatprep.subr.bf16.mxu0 %v10359_v14 }
 0x138   :  { %2961 = vmatpush1.bf16.msra.mxu0 %v10364_v17  ;;  %v10533_v17 = vrot.slane %v10510_v1, %v10514_v3 }
 0x139   :  { %2962 = vmatprep.subr.bf16.mxu0 %v10366_v19  ;;  %v10538_v19 = vrot.slane %v10510_v1, %v12518_v6  ;;  %v10688_v6 = vld [vmem:[#allocation5 + $0x1b4] ss:$24 sps:$4 sm:$0xff]  }
 0x13c   :  { %2963 = vmatpush1.bf16.msra.mxu0 %v10370_v21 }
 0x13d   :  { %2964 = vmatprep.subr.bf16.mxu0 %v10373_v24 }
 0x140   :  { %2965 = vmatpush1.bf16.msra.mxu0 %v10378_v26  ;;  %v10544_v26 = vrot.slane %v10510_v1, %v10518_v5 }
 0x141   :  { %2966 = vmatprep.subr.bf16.mxu0 %v10380_v28 }
 0x144   :  { %2967 = vmatpush1.bf16.msra.mxu0 %v10384_v29 }
 0x145   :  { %2968 = vmatprep.subr.bf16.mxu0 %v10387_v31 }
 0x148   :  { %2969 = vmatpush1.bf16.msra.mxu0 %v10392_v32 }
 0x149   :  { %2970 = vmatprep.subr.bf16.mxu0 %v10394_v33 }
 0x14c   :  { %2971 = vmatpush1.bf16.msra.mxu0 %v10398_v35 }
 0x14d   :  { %2972 = vmatprep.subr.bf16.mxu0 %v10401_v37 }
 0x150   :  { %2973 = vmatpush1.bf16.msra.mxu0 %v10412_v40 }
 0x151   :  { %2974 = vmatprep.subr.bf16.mxu0 %v10415_v42  ;;  %v9404_v42 = vld [vmem:[#allocation5 + $0x4] ss:$24 sps:$4 sm:$0xff]  }
 0x152   :  { %2911 = vmatprep.subr.bf16.mxu1 %v9404_v42 }
 0x153   :  { %2912 = vmatpush1.bf16.msra.mxu1 %v10563_v43 }
 0x154   :  { %2975 = vmatpush1.bf16.msra.mxu0 %v10420_v45  ;;  %2913 = vmatprep.subr.bf16.mxu1 %v10574_v52 }
 0x155   :  { %2976 = vmatprep.subr.bf16.mxu0 %v10424_v48 }
 0x158   :  { %2977 = vmatpush1.bf16.msra.mxu0 %v10429_v51 }
 0x159   :  { %2978 = vmatprep.subr.bf16.mxu0 %v10431_v53 }
 0x15a   :  { %v10527_v13 = vpop.f32.mrb[0].mxu0  ;;  %v10529_v14 = vpop.f32.mrb[0].mxu1 }
 0x15b   :  { %v10540_v21 = vpop.f32.mrb[1].mxu0  ;;  %v1298_v24 = vpop.f32.mrb[1].mxu1 }
 0x15c   :  { %v10547_v28 = vadd.f32 %v1298_v24, %v10523_v9  ;;  %v1154_v29 = vpop.f32.mrb[2].mxu0  ;;  %v1300_v31 = vpop.f32.mrb[2].mxu1  ;;  %2979 = vmatpush1.bf16.msra.mxu0 %v10435_v54 }
 0x15d   :  { %v10551_v32 = vadd.f32 %v1154_v29, %v10533_v17  ;;  %v10554_v33 = vadd.f32 %v1300_v31, %v10538_v19  ;;  %v1156_v35 = vpop.f32.mrb[3].mxu0  ;;  %v1302_v37 = vpop.f32.mrb[3].mxu1  ;;  %2980 = vmatprep.subr.bf16.mxu0 %v10439_v57  ;;  %v10582_v57 = vld [vmem:[#allocation5 + $0x30] ss:$24 sps:$4 sm:$0xff]  }
 0x15e   :  { %12602 = vst [vmem:[#allocation11_spill] sm:$0xff] %v10547_v28  ;;  %v10558_v39 = vadd.f32 %v1156_v35, %v10544_v26  ;;  %v10561_v40 = vadd.f32 %v1302_v37, %v10523_v9  ;;  %2914 = vmatpush1.bf16.msra.mxu1 %v10582_v57  ;;  %v10694_v28 = vld [vmem:[#allocation5 + $0x1e4] ss:$24 sps:$4 sm:$0xff]  }
 0x15f   :  { %12603 = vst [vmem:[#allocation12_spill] sm:$0xff] %v10551_v32  ;;  %12604 = vst [vmem:[#allocation13_spill] sm:$0xff] %v10554_v33  ;;  %v10749_v33 = vld [vmem:[#allocation5 + $0x14] ss:$24 sps:$4 sm:$0xff]  }
 0x160   :  { %12605 = vst [vmem:[#allocation14_spill] sm:$0xff] %v10558_v39  ;;  %12606 = vst [vmem:[#allocation15_spill] sm:$0xff] %v10561_v40  ;;  %2981 = vmatpush1.bf16.msra.mxu0 %v10445_v62  ;;  %v10706_v40 = vld [vmem:[#allocation5 + $0x240] ss:$24 sps:$4 sm:$0xff]  }
 0x161   :  { %2982 = vmatprep.subr.bf16.mxu0 %v10447_v4 }
 0x162   :  { %v1160_v45 = vpop.f32.mrb[4].mxu0  ;;  %v1306_v46 = vpop.f32.mrb[4].mxu1 }
 0x163   :  { %v10569_v47 = vadd.f32 %v1160_v45, %v10533_v17  ;;  %v10572_v48 = vadd.f32 %v1306_v46, %v10538_v19  ;;  %v1162_v50 = vpop.f32.mrb[5].mxu0  ;;  %v1308_v51 = vpop.f32.mrb[5].mxu1  ;;  %v10635_v45 = vld [vmem:[#allocation5 + $0xc4] ss:$24 sps:$4 sm:$0xff]   ;;  %v10637_v46 = vld [vmem:[#allocation5 + $0xc0] ss:$24 sps:$4 sm:$0xff]  }
 0x164   :  { %v10577_v53 = vadd.f32 %v1162_v50, %v10544_v26  ;;  %v10580_v55 = vadd.f32 %v1308_v51, %v10523_v9  ;;  %v1164_v54 = vpop.f32.mrb[6].mxu0  ;;  %v1310_v56 = vpop.f32.mrb[6].mxu1  ;;  %2983 = vmatpush1.bf16.msra.mxu0 %v10451_v7  ;;  %v10599_v7 = vld [vmem:[#allocation5 + $0x64] ss:$24 sps:$4 sm:$0xff]   ;;  %v10640_v50 = vld [vmem:[#allocation5 + $0xf4] ss:$24 sps:$4 sm:$0xff]  }
 0x165   :  { %12607 = vst [vmem:[#allocation16_spill] sm:$0xff] %v10569_v47  ;;  %12608 = vst [vmem:[#allocation17_spill] sm:$0xff] %v10572_v48  ;;  %v10586_v58 = vadd.f32 %v1164_v54, %v10533_v17  ;;  %v10589_v60 = vadd.f32 %v1310_v56, %v10538_v19  ;;  %v1166_v62 = vpop.f32.mrb[7].mxu0  ;;  %v1312_v2 = vpop.f32.mrb[7].mxu1  ;;  %3680 = vmatprep.subr.bf16.mxu0 %v9404_v42  ;;  %2915 = vmatprep.subr.bf16.mxu1 %v10599_v7  ;;  %v10643_v56 = vld [vmem:[#allocation5 + $0xf0] ss:$24 sps:$4 sm:$0xff]  }
 0x166   :  { %12609 = vst [vmem:[#allocation18_spill] sm:$0xff] %v10577_v53  ;;  %12610 = vst [vmem:[#allocation19_spill] sm:$0xff] %v10580_v55  ;;  %v10593_v4 = vadd.f32 %v1166_v62, %v10544_v26  ;;  %v10596_v63 = vadd.f32 %v1312_v2, %v10523_v9  ;;  %2916 = vmatpush1.bf16.msra.mxu1 %v10601_v8  ;;  %v10717_v55 = vld [vmem:[#allocation5 + $0x2a4] ss:$24 sps:$4 sm:$0xff]  }
 0x167   :  { %12611 = vst [vmem:[#allocation20_spill] sm:$0xff] %v10586_v58  ;;  %12612 = vst [vmem:[#allocation21_spill] sm:$0xff] %v10589_v60  ;;  %2917 = vmatprep.subr.bf16.mxu1 %v10611_v23  ;;  %v10739_v60 = vld [vmem:[#allocation5 + $0x2d0] ss:$24 sps:$4 sm:$0xff]   ;;  %v8923_v58 = vadd.f32 %v10540_v21, %v10544_v26 }
 0x168   :  { %12613 = vst [vmem:[#allocation22_spill] sm:$0xff] %v10593_v4  ;;  %12614 = vst [vmem:[#allocation23_spill] sm:$0xff] %v10596_v63  ;;  %v10732_v63 = vld [vmem:[#allocation5 + $0x2d4] ss:$24 sps:$4 sm:$0xff]  }
 0x16a   :  { %v1170_v12 = vpop.f32.mrb[8].mxu0  ;;  %v1316_v10 = vpop.f32.mrb[8].mxu1  ;;  %2918 = vmatpush1.bf16.msra.mxu1 %v10619_v22 }
 0x16b   :  { %v10606_v16 = vadd.f32 %v1170_v12, %v10533_v17  ;;  %v10609_v18 = vadd.f32 %v1316_v10, %v10538_v19  ;;  %v1172_v15 = vpop.f32.mrb[9].mxu0  ;;  %v1318_v11 = vpop.f32.mrb[9].mxu1  ;;  %2919 = vmatprep.subr.bf16.mxu1 %v10635_v45 }
 0x16c   :  { %v10614_v20 = vadd.f32 %v1172_v15, %v10544_v26  ;;  %v10617_v27 = vadd.f32 %v1318_v11, %v10523_v9  ;;  %v1174_v25 = vpop.f32.mrb[10].mxu0  ;;  %v1320_v44 = vpop.f32.mrb[10].mxu1  ;;  %v10652_v15 = vld [vmem:[#allocation5 + $0x124] ss:$24 sps:$4 sm:$0xff]  }
 0x16d   :  { %12615 = vst [vmem:[#allocation24_spill] sm:$0xff] %v10606_v16  ;;  %12616 = vst [vmem:[#allocation25_spill] sm:$0xff] %v10609_v18  ;;  %v10622_v24 = vadd.f32 %v1174_v25, %v10533_v17  ;;  %v10625_v29 = vadd.f32 %v1320_v44, %v10538_v19  ;;  %v1176_v31 = vpop.f32.mrb[11].mxu0  ;;  %v1322_v35 = vpop.f32.mrb[11].mxu1 }
 0x16e   :  { %12617 = vst [vmem:[#allocation26_spill] sm:$0xff] %v10614_v20  ;;  %12618 = vst [vmem:[#allocation27_spill] sm:$0xff] %v10617_v27  ;;  %v10629_v37 = vadd.f32 %v1176_v31, %v10544_v26  ;;  %v10632_v42 = vadd.f32 %v1322_v35, %v10523_v9  ;;  %2920 = vmatpush1.bf16.msra.mxu1 %v10637_v46  ;;  %v8922_v27 = vadd.f32 %v10527_v13, %v10533_v17 }
 0x16f   :  { %12619 = vst [vmem:[#allocation28_spill] sm:$0xff] %v10622_v24  ;;  %12620 = vst [vmem:[#allocation29_spill] sm:$0xff] %v10625_v29  ;;  %2921 = vmatprep.subr.bf16.mxu1 %v10640_v50  ;;  %v10714_v29 = vld [vmem:[#allocation5 + $0x270] ss:$24 sps:$4 sm:$0xff]   ;;  %v10725_v24 = vld [vmem:[#allocation5 + $0x2a0] ss:$24 sps:$4 sm:$0xff]  }
 0x170   :  { %12621 = vst [vmem:[#allocation30_spill] sm:$0xff] %v10629_v37  ;;  %12622 = vst [vmem:[#allocation31_spill] sm:$0xff] %v10632_v42  ;;  %v10722_v37 = vld [vmem:[%s12507_s5] sm:$0x3f]  ;;  %v12523_v13 = vsub.s32 4, %v10501_v59 }
 0x171   :  { %v10729_v18 = vrot.slane %v10722_v37, %v10514_v3  ;;  %v10736_v20 = vrot.slane %v10722_v37, %v10518_v5 }
 0x172   :  { %v1180_v51 = vpop.f32.mrb[12].mxu0  ;;  %v1326_v54 = vpop.f32.mrb[12].mxu1  ;;  %2922 = vmatpush1.bf16.msra.mxu1 %v10643_v56  ;;  %v10757_v21 = vrot.slane %v10510_v1, %v12523_v13 }
 0x173   :  { %v10646_v62 = vadd.f32 %v1180_v51, %v10533_v17  ;;  %v10649_v2 = vadd.f32 %v1326_v54, %v10538_v19  ;;  %v1182_v12 = vpop.f32.mrb[13].mxu0  ;;  %v1328_v10 = vpop.f32.mrb[13].mxu1  ;;  %2923 = vmatprep.subr.bf16.mxu1 %v10652_v15  ;;  %12630 = vst [vmem:[#allocation39_spill] sm:$0xff] %v10729_v18  ;;  %12631 = vst [vmem:[#allocation40_spill] sm:$0xff] %v10736_v20 }
 0x174   :  { %v10655_v11 = vadd.f32 %v1182_v12, %v10544_v26  ;;  %v10658_v25 = vadd.f32 %v1328_v10, %v10523_v9  ;;  %v1184_v44 = vpop.f32.mrb[14].mxu0  ;;  %v1330_v31 = vpop.f32.mrb[14].mxu1  ;;  %v10672_v12 = vld [vmem:[#allocation5 + $0x120] ss:$24 sps:$4 sm:$0xff]   ;;  %v10676_v10 = vld [vmem:[#allocation5 + $0x154] ss:$24 sps:$4 sm:$0xff]  }
 0x175   :  { %12623 = vst [vmem:[#allocation32_spill] sm:$0xff] %v10646_v62  ;;  %12624 = vst [vmem:[#allocation33_spill] sm:$0xff] %v10649_v2  ;;  %v10661_v35 = vadd.f32 %v1184_v44, %v10533_v17  ;;  %v10664_v51 = vadd.f32 %v1330_v31, %v10538_v19  ;;  %v1186_v54 = vpop.f32.mrb[15].mxu0  ;;  %v10666_v0 = vpop.f32.mrb[15].mxu1  ;;  %v10678_v44 = vld [vmem:[#allocation5 + $0x150] ss:$24 sps:$4 sm:$0xff]  }
 0x176   :  { %12625 = vst [vmem:[#allocation34_spill] sm:$0xff] %v10655_v11  ;;  %12626 = vst [vmem:[#allocation35_spill] sm:$0xff] %v10658_v25  ;;  %v10669_v61 = vadd.f32 %v1186_v54, %v10544_v26  ;;  %2924 = vmatpush1.bf16.msra.mxu1 %v10672_v12  ;;  %v10682_v31 = vld [vmem:[#allocation5 + $0x184] ss:$24 sps:$4 sm:$0xff]   ;;  %v10684_v54 = vld [vmem:[#allocation5 + $0x180] ss:$24 sps:$4 sm:$0xff]  }
 0x177   :  { %12627 = vst [vmem:[#allocation36_spill] sm:$0xff] %v10661_v35  ;;  %12628 = vst [vmem:[#allocation37_spill] sm:$0xff] %v10664_v51  ;;  %2925 = vmatprep.subr.bf16.mxu1 %v10676_v10  ;;  %v10690_v51 = vld [vmem:[#allocation5 + $0x1b0] ss:$24 sps:$4 sm:$0xff]   ;;  %v10700_v35 = vld [vmem:[#allocation5 + $0x214] ss:$24 sps:$4 sm:$0xff]  }
 0x178   :  { %12629 = vst [vmem:[#allocation38_spill] sm:$0xff] %v10669_v61  ;;  %v10696_v61 = vld [vmem:[#allocation5 + $0x1e0] ss:$24 sps:$4 sm:$0xff]   ;;  %v10702_v2 = vld [vmem:[#allocation5 + $0x210] ss:$24 sps:$4 sm:$0xff]   ;;  %v12524_v17 = vsub.s32 5, %v10501_v59 }
 0x179   :  { %v10708_v11 = vld [vmem:[#allocation5 + $0x244] ss:$24 sps:$4 sm:$0xff]   ;;  %v10710_v62 = vld [vmem:[#allocation5 + $0x274] ss:$24 sps:$4 sm:$0xff]  }
 0x17a   :  { %2926 = vmatpush1.bf16.msra.mxu1 %v10678_v44 }
 0x17b   :  { %2927 = vmatprep.subr.bf16.mxu1 %v10682_v31 }
 0x17e   :  { %2928 = vmatpush1.bf16.msra.mxu1 %v10684_v54 }
 0x17f   :  { %2929 = vmatprep.subr.bf16.mxu1 %v10688_v6 }
 0x182   :  { %2930 = vmatpush1.bf16.msra.mxu1 %v10690_v51 }
 0x183   :  { %2931 = vmatprep.subr.bf16.mxu1 %v10694_v28 }
 0x186   :  { %2932 = vmatpush1.bf16.msra.mxu1 %v10696_v61 }
 0x187   :  { %2933 = vmatprep.subr.bf16.mxu1 %v10700_v35 }
 0x18a   :  { %2934 = vmatpush1.bf16.msra.mxu1 %v10702_v2 }
 0x18b   :  { %2935 = vmatprep.subr.bf16.mxu1 %v10708_v11 }
 0x18e   :  { %2936 = vmatpush1.bf16.msra.mxu1 %v10706_v40 }
 0x18f   :  { %2937 = vmatprep.subr.bf16.mxu1 %v10710_v62 }
 0x192   :  { %2938 = vmatpush1.bf16.msra.mxu1 %v10714_v29 }
 0x193   :  { %2939 = vmatprep.subr.bf16.mxu1 %v10717_v55 }
 0x196   :  { %2940 = vmatpush1.bf16.msra.mxu1 %v10725_v24 }
 0x197   :  { %2941 = vmatprep.subr.bf16.mxu1 %v10732_v63 }
 0x19a   :  { %v2179_v16 = vpop.f32.mrb[16].mxu1  ;;  %2942 = vmatpush1.bf16.msra.mxu1 %v10739_v60 }
 0x19b   :  { %v2180_v4 = vadd.f32 %v2179_v16, %v10729_v18  ;;  %v2181_v3 = vpop.f32.mrb[17].mxu1  ;;  %2993 = vmatprep.subr.bf16.mxu1 %v10749_v33 }
 0x19c   :  { %v2182_v48 = vadd.f32 %v2181_v3, %v10736_v20  ;;  %v2183_v5 = vpop.f32.mrb[18].mxu1  ;;  %v10762_v3 = vrot.slane %v10510_v1, %v12524_v17 }
 0x19d   :  { %v2268_v42 = vadd.f32 %v8922_v27, %v2180_v4  ;;  %v2184_v53 = vpop.f32.mrb[19].mxu1 }
 0x19e   :  { %v2275_v47 = vadd.f32 %v8923_v58, %v2182_v48 }
 0x19f   :  { %v8183_v4 = vmul.f32 -1.442695, %v2268_v42 }
 0x1a1   :  { %9897 = vpow2.f32 %v8183_v4 }
 0x1ba   :  { %v1442_v5 = vpop.f32.mrb[16].mxu0 }
 0x1bb   :  { %v10765_v26 = vadd.f32 %v1442_v5, %v10757_v21  ;;  %v1444_v48 = vpop.f32.mrb[17].mxu0 }
 0x1bc   :  { %v10768_v53 = vadd.f32 %v1444_v48, %v10762_v3  ;;  %v1446_v58 = vpop.f32.mrb[18].mxu0 }
 0x1bd   :  { %12632 = vst [vmem:[#allocation41_spill] sm:$0xff] %v10765_v26  ;;  %v10771_v16 = vadd.f32 %v1446_v58, %v10757_v21  ;;  %v1448_v27 = vpop.f32.mrb[19].mxu0 }
 0x1be   :  { %12633 = vst [vmem:[#allocation42_spill] sm:$0xff] %v10768_v53  ;;  %v10774_v13 = vadd.f32 %v1448_v27, %v10762_v3 }
 0x1bf   :  { %12634 = vst [vmem:[#allocation43_spill] sm:$0xff] %v10771_v16  ;;  %v8184_v16 = vmul.f32 -1.442695, %v2275_v47 }
 0x1c0   :  { %12635 = vst [vmem:[#allocation44_spill] sm:$0xff] %v10774_v13  ;;  %v9898_v13 = vpop.eup %9897 }
 0x1c1   :  { %9899 = vpow2.f32 %v8184_v16 }
 0x1c2   :  { %v1452_v1 = vpop.f32.mrb[20].mxu0 }
 0x1c3   :  { %v10777_v17 = vadd.f32 %v1452_v1, %v10757_v21  ;;  %v1454_v5 = vpop.f32.mrb[21].mxu0 }
 0x1c4   :  { %v10780_v26 = vadd.f32 %v1454_v5, %v10762_v3  ;;  %v1456_v48 = vpop.f32.mrb[22].mxu0 }
 0x1c5   :  { %12636 = vst [vmem:[#allocation45_spill] sm:$0xff] %v10777_v17  ;;  %v10783_v53 = vadd.f32 %v1456_v48, %v10757_v21  ;;  %v1458_v42 = vpop.f32.mrb[23].mxu0 }
 0x1c6   :  { %12637 = vst [vmem:[#allocation46_spill] sm:$0xff] %v10780_v26  ;;  %v10786_v58 = vadd.f32 %v1458_v42, %v10762_v3 }
 0x1c7   :  { %12638 = vst [vmem:[#allocation47_spill] sm:$0xff] %v10783_v53  ;;  %v2272_v53 = vadd.f32 1.0, %v9898_v13  ;;  %v12648_v13 = vsub.s32 3, %v10501_v59 }
 0x1c8   :  { %12639 = vst [vmem:[#allocation48_spill] sm:$0xff] %v10786_v58 }
 0x1c9   :  { %9901 = vrcp.f32 %v2272_v53  ;;  %v10814_v53 = vrot.slane %v10722_v37, %v12648_v13 }
 0x1ca   :  { %v1462_v27 = vpop.f32.mrb[24].mxu0 }
 0x1cb   :  { %v10789_v4 = vadd.f32 %v1462_v27, %v10757_v21  ;;  %v1464_v1 = vpop.f32.mrb[25].mxu0  ;;  %12649 = vst [vmem:[#allocation56_spill] sm:$0xff] %v10814_v53 }
 0x1cc   :  { %v10792_v17 = vadd.f32 %v1464_v1, %v10762_v3  ;;  %v1466_v5 = vpop.f32.mrb[26].mxu0 }
 0x1cd   :  { %12640 = vst [vmem:[#allocation49_spill] sm:$0xff] %v10789_v4  ;;  %v10795_v26 = vadd.f32 %v1466_v5, %v10757_v21  ;;  %v1468_v48 = vpop.f32.mrb[27].mxu0  ;;  %v9900_v4 = vpop.eup %9899  ;;  %v12646_v5 = vsub.s32 2, %v10501_v59 }
 0x1ce   :  { %12641 = vst [vmem:[#allocation50_spill] sm:$0xff] %v10792_v17  ;;  %v10798_v42 = vadd.f32 %v1468_v48, %v10762_v3  ;;  %v2279_v48 = vadd.f32 1.0, %v9900_v4 }
 0x1cf   :  { %12642 = vst [vmem:[#allocation51_spill] sm:$0xff] %v10795_v26  ;;  %v10809_v26 = vrot.slane %v10722_v37, %v12646_v5  ;;  %v8938_v5 = vadd.f32 %v10529_v14, %v10538_v19 }
 0x1d0   :  { %12643 = vst [vmem:[#allocation52_spill] sm:$0xff] %v10798_v42  ;;  %9903 = vrcp.f32 %v2279_v48 }
 0x1d1   :  { %12647 = vst [vmem:[#allocation55_spill] sm:$0xff] %v10809_v26 }
 0x1d2   :  { %v1472_v47 = vpop.f32.mrb[28].mxu0 }
 0x1d3   :  { %v10801_v58 = vadd.f32 %v1472_v47, %v10757_v21  ;;  %v1474_v27 = vpop.f32.mrb[29].mxu0 }
 0x1d4   :  { %v10804_v16 = vadd.f32 %v1474_v27, %v10762_v3  ;;  %v1476_v1 = vpop.f32.mrb[30].mxu0  ;;  %v9902_v27 = vpop.eup %9901 }
 0x1d5   :  { %12644 = vst [vmem:[#allocation53_spill] sm:$0xff] %v10801_v58  ;;  %v1478_v17 = vpop.f32.mrb[31].mxu0 }
 0x1d6   :  { %12645 = vst [vmem:[#allocation54_spill] sm:$0xff] %v10804_v16  ;;  %v8953_v16 = vadd.f32 %v10666_v0, %v10523_v9  ;;  %v12650_v0 = vmov 0  }
 0x1da   :  { %v2220_v47 = vpop.f32.mrb[20].mxu1  ;;  %v9904_v19 = vpop.eup %9903 }
 0x1db   :  { %v2221_v42 = vadd.f32 %v2220_v47, %v10809_v26  ;;  %v2222_v58 = vpop.f32.mrb[21].mxu1  ;;  %v10077_v47 = vld [vmem:[%s12503_s1] sm:$0xff] }
 0x1dc   :  { %v2223_v25 = vadd.f32 %v2222_v58, %v10814_v53  ;;  %v2224_v39 = vpop.f32.mrb[22].mxu1  ;;  %vm3077_vm4 = vcmp.gt.s32.totalorder %v10077_v47, 6  ;;  %vm3076_vm5 = vcmp.gt.s32.totalorder %v10077_v47, 1  ;;  %vm3845_vm6 = vcmp.gt.s32.totalorder %v10077_v47, 2 }
 0x1dd   :  { %v2282_v32 = vmul.f32 %v9902_v27, %v2221_v42  ;;  %v2225_v20 = vpop.f32.mrb[23].mxu1  ;;  %v3086_v9 = vsel %vm3077_vm4, 1, %v12650_v0  ;;  %v10826_v39 = vpop.permute.xlu0 %2321  ;;  %v3078_v14 = vsel %vm3076_vm5, 1, %v12650_v0  ;;  %vm4614_vm7 = vcmp.gt.s32.totalorder %v10077_v47, 3 }
 0x1de   :  { %v2289_v13 = vadd.f32 %v8953_v16, %v2223_v25  ;;  %12651 = vst [vmem:[#allocation57_spill] sm:$0xff] %v10826_v39  ;;  %3088 = vperm.xlu1 %9025, %v3086_v9   ;;  %v2285_v20 = vsub.f32 1.0, %v9904_v19  ;;  %v2287_v16 = vmul.f32 0.0, %v9904_v19  ;;  %v4616_v48 = vsel %vm4614_vm7, 1, %v12650_v0 }
 0x1df   :  { %v2283_v18 = vadd.f32 %v8938_v5, %v2282_v32  ;;  %v3847_v32 = vsel %vm3845_vm6, 1, %v12650_v0  ;;  %v12656_v0 = vsub.s32 5, %v10501_v59  ;;  %v8968_v19 = vadd.f32 %v1476_v1, %v10757_v21 }
 0x1e0   :  { %v8185_v4 = vmul.f32 -1.442695, %v2289_v13  ;;  %vm2323_vm9 = vcmp.eq.s32.totalorder %v10826_v39, 1 }
 0x1e1   :  { %9905 = vtanh.f32 %v2283_v18  ;;  %v10830_v18 = vpop.permute.xlu0 %2314  ;;  %v10850_v9 = vrot.slane %v10722_v37, %v12656_v0  ;;  %vm8284_vm10 = vmpackc.low %vm2323_vm9, %vm2323_vm9 }
 0x1e2   :  { %9907 = vpow2.f32 %v8185_v4  ;;  %3080 = vperm.xlu1 %9025, %v3078_v14   ;;  %12652 = vst [vmem:[#allocation58_spill] sm:$0xff] %v10830_v18  ;;  %vm2316_vm8 = vcmp.eq.s32.totalorder %v10830_v18, 1  ;;  %v12654_v4 = vsub.s32 4, %v10501_v59 }
 0x1e3   :  { %12657 = vst [vmem:[#allocation61_spill] sm:$0xff] %v10850_v9  ;;  %vm10877_vm11 = vmpackc.low %vm2316_vm8, %vm2316_vm8 }
 0x1e4   :  { %v10845_v47 = vrot.slane %v10722_v37, %v12654_v4 }
 0x1e6   :  { %3849 = vperm.xlu1 %9025, %v3847_v32   ;;  %12655 = vst [vmem:[#allocation60_spill] sm:$0xff] %v10845_v47 }
 0x1ea   :  { %4618 = vperm.xlu1 %9025, %v4616_v48  }
 0x1eb   :  { %v9906_v25 = vpop.eup %9905 }
 0x1ec   :  { %v9908_v58 = vpop.eup %9907  ;;  %v2286_v42 = vmul.f32 %v9906_v25, %v2285_v20 }
 0x1ed   :  { %v2293_v5 = vadd.f32 1.0, %v9908_v58 }
 0x1ee   :  { %v2288_v27 = vadd.f32 %v2287_v16, %v2286_v42 }
 0x1ef   :  { %9909 = vrcp.f32 %v2293_v5  ;;  %v8969_v5 = vadd.f32 %v1478_v17, %v10762_v3 }
 0x1f0   :  { %v10836_v13 = vsel %vm2316_vm8, %v2288_v27, 0.0  ;;  %v10863_v3 = vpack.c.bf16 %v2288_v27, %v2288_v27  ;;  %v10888_v27 = vld [vmem:[#allocation5 + $0x40] ss:$24 sps:$4 sm:$0xff]  }
 0x1f1   :  { %12653 = vst [vmem:[#allocation59_spill] sm:$0xff] %v10836_v13  ;;  %2318 = vst [vmem:[%s12512_s10] sm:$0xff] %v10836_v13 }
 0x1f9   :  { %v9910_v42 = vpop.eup %9909 }
 0x1fa   :  { %v2261_v14 = vpop.f32.mrb[32].mxu0 }
 0x1fb   :  { %v2262_v32 = vadd.f32 %v2261_v14, %v10845_v47  ;;  %v2263_v20 = vpop.f32.mrb[33].mxu0 }
 0x1fc   :  { %v2264_v25 = vadd.f32 %v2263_v20, %v10850_v9  ;;  %v2265_v58 = vpop.f32.mrb[34].mxu0 }
 0x1fd   :  { %v2296_v16 = vadd.f32 %v8968_v19, %v2262_v32  ;;  %v2266_v48 = vpop.f32.mrb[35].mxu0  ;;  %v10857_v32 = vld [vmem:[#allocation5 + $0x10] ss:$24 sps:$4 sm:$0xff]   ;;  %v10899_v58 = vld [vmem:[#allocation5 + $0xa4] ss:$24 sps:$4 sm:$0xff]  }
 0x1fe   :  { %v2303_v4 = vmul.f32 %v9910_v42, %v2264_v25  ;;  %v10896_v25 = vld [vmem:[#allocation5 + $0x70] ss:$24 sps:$4 sm:$0xff]   ;;  %v10904_v42 = vld [vmem:[#allocation5 + $0xa0] ss:$24 sps:$4 sm:$0xff]  }
 0x1ff   :  { %v8186_v13 = vmul.f32 -1.442695, %v2296_v16  ;;  %v11011_v16 = vld [vmem:[#allocation5 + $0x1ec] ss:$24 sps:$4 sm:$0xff]   ;;  %v11013_v48 = vld [vmem:[#allocation5 + $0x1e8] ss:$24 sps:$4 sm:$0xff]  }
 0x200   :  { %v2304_v59 = vadd.f32 %v8969_v5, %v2303_v4  ;;  %v11017_v5 = vld [vmem:[#allocation5 + $0x21c] ss:$24 sps:$4 sm:$0xff]   ;;  %v11019_v4 = vld [vmem:[#allocation5 + $0x218] ss:$24 sps:$4 sm:$0xff]  }
 0x201   :  { %9911 = vpow2.f32 %v8186_v13  ;;  %v10868_v13 = vld [vmem:[#allocation5 + $0x44] ss:$24 sps:$4 sm:$0xff]  }
 0x20b   :  { %v9912_v37 = vpop.eup %9911 }
 0x20c   :  { %v2300_v0 = vadd.f32 1.0, %v9912_v37  ;;  %v11025_v37 = vld [vmem:[#allocation5 + $0x248] ss:$24 sps:$4 sm:$0xff]  }
 0x20e   :  { %9913 = vrcp.f32 %v2300_v0  ;;  %v11028_v0 = vld [vmem:[#allocation5 + $0x27c] ss:$24 sps:$4 sm:$0xff]  }
 0x20f   :  { %9915 = vtanh.f32 %v2304_v59  ;;  %v11021_v59 = vld [vmem:[#allocation5 + $0x24c] ss:$24 sps:$4 sm:$0xff]  }
 0x218   :  { %v9914_v21 = vpop.eup %9913 }
 0x219   :  { %v2306_v1 = vsub.f32 1.0, %v9914_v21  ;;  %v9916_v14 = vpop.eup %9915  ;;  %v2308_v26 = vmul.f32 0.0, %v9914_v21  ;;  %v11031_v21 = vld [vmem:[#allocation5 + $0x278] ss:$24 sps:$4 sm:$0xff]  }
 0x21b   :  { %v2307_v47 = vmul.f32 %v9916_v14, %v2306_v1  ;;  %v11034_v1 = vld [vmem:[#allocation5 + $0x2ac] ss:$24 sps:$4 sm:$0xff]   ;;  %v11037_v14 = vld [vmem:[#allocation5 + $0x2a8] ss:$24 sps:$4 sm:$0xff]  }
 0x21d   :  { %v2309_v20 = vadd.f32 %v2308_v26, %v2307_v47  ;;  %v10891_v47 = vld [vmem:[#allocation5 + $0x74] ss:$24 sps:$4 sm:$0xff]  }
 0x21f   :  { %v8285_v19 = vpack.c.bf16 %v2309_v20, %v2309_v20  ;;  %v10861_v17 = vsel %vm2323_vm9, %v2309_v20, 0.0  ;;  %v11040_v20 = vld [vmem:[#allocation5 + $0x2dc] ss:$24 sps:$4 sm:$0xff]  }
 0x220   :  { %8187 = vst [vmem:[%s12512_s10 + $0x78] sm:$0xff] %v10861_v17 }
 0x221   :  { %8286 = vmatprep.mubr.msk.bf16.mxu1 %vm8284_vm10, %v8285_v19  ;;  %8292 = vmatprep.mubr.msk.bf16.mxu0 %vm8284_vm10, %v8285_v19 }
 0x222   :  { %8289 = vmatmul.mubr.msk.bf16.vlgmr.msra.gmra.mrb[24].mxu1 %vm10877_vm11, %v10863_v3  ;;  %8295 = vmatmul.mubr.msk.bf16.vlgmr.msra.gmra.mrb[36].mxu0 %vm10877_vm11, %v10863_v3 }
 0x223   :  { %2994 = vmatpush1.bf16.msra.mxu1 %v10857_v32  ;;  %8298 = vmatprep.mubr.msk.bf16.mxu1 %vm8284_vm10, %v8285_v19  ;;  %v11043_v19 = vld [vmem:[#allocation5 + $0x2d8] ss:$24 sps:$4 sm:$0xff]  }
 0x224   :  { %2995 = vmatprep.subr.bf16.mxu1 %v10868_v13  ;;  %3681 = vmatpush1.bf16.msra.mxu0 %v10563_v43  ;;  %v10907_v43 = vld [vmem:[#allocation5 + $0xd4] ss:$24 sps:$4 sm:$0xff]   ;;  %12660 = vst [vmem:[#allocation62_spill] sm:$0xff] %v11043_v19 }
 0x225   :  { %3682 = vmatprep.subr.bf16.mxu0 %v10574_v52  ;;  %v10912_v52 = vld [vmem:[#allocation5 + $0xd0] ss:$24 sps:$4 sm:$0xff]  }
 0x227   :  { %2996 = vmatpush1.bf16.msra.mxu1 %v10888_v27 }
 0x228   :  { %2997 = vmatprep.subr.bf16.mxu1 %v10891_v47  ;;  %3683 = vmatpush1.bf16.msra.mxu0 %v10582_v57  ;;  %v10078_v57 = vld [vmem:[#allocation5 + $0x104] ss:$24 sps:$4 sm:$0xff]  }
 0x229   :  { %3684 = vmatprep.subr.bf16.mxu0 %v10599_v7  ;;  %v10079_v7 = vld [vmem:[#allocation5 + $0x100] ss:$24 sps:$4 sm:$0xff]  }
 0x22b   :  { %2998 = vmatpush1.bf16.msra.mxu1 %v10896_v25 }
 0x22c   :  { %2999 = vmatprep.subr.bf16.mxu1 %v10899_v58  ;;  %3685 = vmatpush1.bf16.msra.mxu0 %v10601_v8  ;;  %v10080_v8 = vld [vmem:[#allocation5 + $0x134] ss:$24 sps:$4 sm:$0xff]  }
 0x22d   :  { %3686 = vmatprep.subr.bf16.mxu0 %v10611_v23  ;;  %v10081_v23 = vld [vmem:[#allocation5 + $0x130] ss:$24 sps:$4 sm:$0xff]  }
 0x22f   :  { %3000 = vmatpush1.bf16.msra.mxu1 %v10904_v42 }
 0x230   :  { %3001 = vmatprep.subr.bf16.mxu1 %v10907_v43  ;;  %3687 = vmatpush1.bf16.msra.mxu0 %v10619_v22  ;;  %v10082_v22 = vld [vmem:[#allocation5 + $0x164] ss:$24 sps:$4 sm:$0xff]  }
 0x231   :  { %3688 = vmatprep.subr.bf16.mxu0 %v10635_v45  ;;  %v10083_v45 = vld [vmem:[#allocation5 + $0x160] ss:$24 sps:$4 sm:$0xff]  }
 0x233   :  { %3002 = vmatpush1.bf16.msra.mxu1 %v10912_v52 }
 0x234   :  { %3003 = vmatprep.subr.bf16.mxu1 %v10078_v57  ;;  %3689 = vmatpush1.bf16.msra.mxu0 %v10637_v46  ;;  %v10084_v46 = vld [vmem:[#allocation5 + $0x194] ss:$24 sps:$4 sm:$0xff]  }
 0x235   :  { %3690 = vmatprep.subr.bf16.mxu0 %v10640_v50  ;;  %v10085_v50 = vld [vmem:[#allocation5 + $0x190] ss:$24 sps:$4 sm:$0xff]  }
 0x236   :  { %v12661_v57 = vld [vmem:[#allocation39_spill] sm:$0xff] }
 0x237   :  { %3004 = vmatpush1.bf16.msra.mxu1 %v10079_v7 }
 0x238   :  { %3005 = vmatprep.subr.bf16.mxu1 %v10080_v8  ;;  %3691 = vmatpush1.bf16.msra.mxu0 %v10643_v56  ;;  %v10086_v56 = vld [vmem:[#allocation5 + $0x1c4] ss:$24 sps:$4 sm:$0xff]  }
 0x239   :  { %3692 = vmatprep.subr.bf16.mxu0 %v10652_v15  ;;  %v10087_v15 = vld [vmem:[#allocation5 + $0x1c0] ss:$24 sps:$4 sm:$0xff]  }
 0x23b   :  { %3006 = vmatpush1.bf16.msra.mxu1 %v10081_v23 }
 0x23c   :  { %3007 = vmatprep.subr.bf16.mxu1 %v10082_v22  ;;  %3693 = vmatpush1.bf16.msra.mxu0 %v10672_v12  ;;  %v10088_v12 = vld [vmem:[#allocation5 + $0x1f4] ss:$24 sps:$4 sm:$0xff]   ;;  %v12662_v22 = vld [vmem:[#allocation40_spill] sm:$0xff] }
 0x23d   :  { %3694 = vmatprep.subr.bf16.mxu0 %v10676_v10  ;;  %v10089_v10 = vld [vmem:[#allocation5 + $0x1f0] ss:$24 sps:$4 sm:$0xff]  }
 0x23f   :  { %3008 = vmatpush1.bf16.msra.mxu1 %v10083_v45 }
 0x240   :  { %3009 = vmatprep.subr.bf16.mxu1 %v10084_v46  ;;  %3695 = vmatpush1.bf16.msra.mxu0 %v10678_v44  ;;  %v10090_v44 = vld [vmem:[#allocation5 + $0x224] ss:$24 sps:$4 sm:$0xff]  }
 0x241   :  { %3696 = vmatprep.subr.bf16.mxu0 %v10682_v31  ;;  %v10091_v31 = vld [vmem:[#allocation5 + $0x220] ss:$24 sps:$4 sm:$0xff]  }
 0x243   :  { %3010 = vmatpush1.bf16.msra.mxu1 %v10085_v50 }
 0x244   :  { %3011 = vmatprep.subr.bf16.mxu1 %v10086_v56  ;;  %3697 = vmatpush1.bf16.msra.mxu0 %v10684_v54  ;;  %v10092_v54 = vld [vmem:[#allocation5 + $0x254] ss:$24 sps:$4 sm:$0xff]  }
 0x245   :  { %3698 = vmatprep.subr.bf16.mxu0 %v10688_v6  ;;  %v10093_v6 = vld [vmem:[#allocation5 + $0x250] ss:$24 sps:$4 sm:$0xff]  }
 0x247   :  { %3012 = vmatpush1.bf16.msra.mxu1 %v10087_v15  ;;  %v12663_v15 = vld [vmem:[#allocation12_spill] sm:$0xff] }
 0x248   :  { %3013 = vmatprep.subr.bf16.mxu1 %v10088_v12  ;;  %3699 = vmatpush1.bf16.msra.mxu0 %v10690_v51  ;;  %v11007_v51 = vld [vmem:[#allocation5 + $0x1b8] ss:$24 sps:$4 sm:$0xff]  }
 0x249   :  { %3700 = vmatprep.subr.bf16.mxu0 %v10694_v28  ;;  %v10971_v28 = vld [vmem:[#allocation5 + $0x9c] ss:$24 sps:$4 sm:$0xff]  }
 0x24b   :  { %3014 = vmatpush1.bf16.msra.mxu1 %v10089_v10 }
 0x24c   :  { %3015 = vmatprep.subr.bf16.mxu1 %v10090_v44  ;;  %3701 = vmatpush1.bf16.msra.mxu0 %v10696_v61  ;;  %v10969_v61 = vld [vmem:[#allocation5 + $0x98] ss:$24 sps:$4 sm:$0xff]  }
 0x24d   :  { %3702 = vmatprep.subr.bf16.mxu0 %v10700_v35  ;;  %v11005_v35 = vld [vmem:[#allocation5 + $0x1bc] ss:$24 sps:$4 sm:$0xff]  }
 0x24f   :  { %3016 = vmatpush1.bf16.msra.mxu1 %v10091_v31  ;;  %v12664_v31 = vld [vmem:[#allocation14_spill] sm:$0xff] }
 0x250   :  { %3017 = vmatprep.subr.bf16.mxu1 %v10092_v54  ;;  %3703 = vmatpush1.bf16.msra.mxu0 %v10702_v2  ;;  %v10999_v2 = vld [vmem:[#allocation5 + $0x18c] ss:$24 sps:$4 sm:$0xff]  }
 0x251   :  { %3704 = vmatprep.subr.bf16.mxu0 %v10708_v11  ;;  %v11001_v11 = vld [vmem:[#allocation5 + $0x188] ss:$24 sps:$4 sm:$0xff]  }
 0x253   :  { %3018 = vmatpush1.bf16.msra.mxu1 %v10093_v6  ;;  %v12665_v6 = vld [vmem:[#allocation35_spill] sm:$0xff] }
 0x254   :  { %3019 = vmatprep.subr.bf16.mxu1 %v10459_v30  ;;  %3705 = vmatpush1.bf16.msra.mxu0 %v10706_v40  ;;  %v10951_v30 = vld [vmem:[#allocation5 + $0x8] ss:$24 sps:$4 sm:$0xff]  }
 0x255   :  { %3706 = vmatprep.subr.bf16.mxu0 %v10710_v62  ;;  %v10977_v40 = vld [vmem:[#allocation5 + $0xc8] ss:$24 sps:$4 sm:$0xff]   ;;  %v10995_v62 = vld [vmem:[#allocation5 + $0x158] ss:$24 sps:$4 sm:$0xff]  }
 0x257   :  { %3020 = vmatpush1.bf16.msra.mxu1 %v10461_v49  ;;  %v10953_v49 = vld [vmem:[#allocation5 + $0xc] ss:$24 sps:$4 sm:$0xff]  }
 0x258   :  { %3021 = vmatprep.subr.bf16.mxu1 %v10463_v34  ;;  %3707 = vmatpush1.bf16.msra.mxu0 %v10714_v29  ;;  %v10955_v34 = vld [vmem:[#allocation5 + $0x3c] ss:$24 sps:$4 sm:$0xff]  }
 0x259   :  { %3708 = vmatprep.subr.bf16.mxu0 %v10717_v55  ;;  %v10980_v55 = vld [vmem:[#allocation5 + $0xfc] ss:$24 sps:$4 sm:$0xff]  }
 0x25a   :  { %v10993_v29 = vld [vmem:[#allocation5 + $0x15c] ss:$24 sps:$4 sm:$0xff]  }
 0x25b   :  { %3022 = vmatpush1.bf16.msra.mxu1 %v10466_v36  ;;  %v10959_v36 = vld [vmem:[#allocation5 + $0x38] ss:$24 sps:$4 sm:$0xff]  }
 0x25c   :  { %3023 = vmatprep.subr.bf16.mxu1 %v10469_v38  ;;  %3709 = vmatpush1.bf16.msra.mxu0 %v10725_v24  ;;  %v10963_v38 = vld [vmem:[#allocation5 + $0x6c] ss:$24 sps:$4 sm:$0xff]   ;;  %v10989_v24 = vld [vmem:[#allocation5 + $0x128] ss:$24 sps:$4 sm:$0xff]  }
 0x25d   :  { %3710 = vmatprep.subr.bf16.mxu0 %v10732_v63  ;;  %v10987_v63 = vld [vmem:[#allocation5 + $0x12c] ss:$24 sps:$4 sm:$0xff]  }
 0x25f   :  { %3024 = vmatpush1.bf16.msra.mxu1 %v10474_v41  ;;  %v10965_v41 = vld [vmem:[#allocation5 + $0x68] ss:$24 sps:$4 sm:$0xff]  }
 0x260   :  { %3711 = vmatpush1.bf16.msra.mxu0 %v10739_v60  ;;  %3721 = vmatprep.subr.bf16.mxu1 %v10953_v49  ;;  %v10983_v60 = vld [vmem:[#allocation5 + $0xf8] ss:$24 sps:$4 sm:$0xff]  }
 0x261   :  { %3762 = vmatprep.subr.bf16.mxu0 %v10749_v33  ;;  %v10973_v33 = vld [vmem:[#allocation5 + $0xcc] ss:$24 sps:$4 sm:$0xff]  }
 0x262   :  { %8301 = vmatmul.mubr.msk.bf16.vlgmr.msra.gmra.mrb[28].mxu1 %vm10877_vm11, %v10863_v3 }
 0x263   :  { %3722 = vmatpush1.bf16.msra.mxu1 %v10951_v30 }
 0x264   :  { %3723 = vmatprep.subr.bf16.mxu1 %v10955_v34 }
 0x267   :  { %3724 = vmatpush1.bf16.msra.mxu1 %v10959_v36 }
 0x268   :  { %3725 = vmatprep.subr.bf16.mxu1 %v10963_v38 }
 0x26b   :  { %3726 = vmatpush1.bf16.msra.mxu1 %v10965_v41 }
 0x26c   :  { %3727 = vmatprep.subr.bf16.mxu1 %v10971_v28 }
 0x26f   :  { %3728 = vmatpush1.bf16.msra.mxu1 %v10969_v61 }
 0x270   :  { %3729 = vmatprep.subr.bf16.mxu1 %v10973_v33 }
 0x273   :  { %3730 = vmatpush1.bf16.msra.mxu1 %v10977_v40 }
 0x274   :  { %3731 = vmatprep.subr.bf16.mxu1 %v10980_v55 }
 0x277   :  { %3732 = vmatpush1.bf16.msra.mxu1 %v10983_v60 }
 0x278   :  { %3733 = vmatprep.subr.bf16.mxu1 %v10987_v63 }
 0x27b   :  { %3734 = vmatpush1.bf16.msra.mxu1 %v10989_v24 }
 0x27c   :  { %3735 = vmatprep.subr.bf16.mxu1 %v10993_v29 }
 0x27f   :  { %3736 = vmatpush1.bf16.msra.mxu1 %v10995_v62 }
 0x280   :  { %3737 = vmatprep.subr.bf16.mxu1 %v10999_v2 }
 0x283   :  { %3738 = vmatpush1.bf16.msra.mxu1 %v11001_v11 }
 0x284   :  { %3739 = vmatprep.subr.bf16.mxu1 %v11005_v35 }
 0x287   :  { %3740 = vmatpush1.bf16.msra.mxu1 %v11007_v51 }
 0x288   :  { %3741 = vmatprep.subr.bf16.mxu1 %v11011_v16 }
 0x28b   :  { %3742 = vmatpush1.bf16.msra.mxu1 %v11013_v48 }
 0x28c   :  { %3743 = vmatprep.subr.bf16.mxu1 %v11017_v5 }
 0x28f   :  { %3744 = vmatpush1.bf16.msra.mxu1 %v11019_v4 }
 0x290   :  { %3745 = vmatprep.subr.bf16.mxu1 %v11021_v59 }
 0x293   :  { %3746 = vmatpush1.bf16.msra.mxu1 %v11025_v37 }
 0x294   :  { %3747 = vmatprep.subr.bf16.mxu1 %v11028_v0 }
 0x297   :  { %3748 = vmatpush1.bf16.msra.mxu1 %v11031_v21 }
 0x298   :  { %3749 = vmatprep.subr.bf16.mxu1 %v11034_v1 }
 0x29b   :  { %3750 = vmatpush1.bf16.msra.mxu1 %v11037_v14 }
 0x29c   :  { %3751 = vmatprep.subr.bf16.mxu1 %v11040_v20 }
 0x29f   :  { %3752 = vmatpush1.bf16.msra.mxu1 %v11043_v19 }
 0x2f5   :  { %v2945_v3 = vpop.f32.mrb[24].mxu1  ;;  %v2986_v26 = vpop.f32.mrb[36].mxu0 }
 0x2f6   :  { %v2946_v7 = vadd.f32 %v2945_v3, %v12661_v57  ;;  %v2947_v8 = vpop.f32.mrb[25].mxu1  ;;  %v2988_v23 = vpop.f32.mrb[37].mxu0 }
 0x2f7   :  { %v2948_v45 = vadd.f32 %v2947_v8, %v12662_v22  ;;  %v2989_v46 = vadd.f32 %v2988_v23, %v10814_v53  ;;  %v2949_v50 = vpop.f32.mrb[26].mxu1  ;;  %v2990_v56 = vpop.f32.mrb[38].mxu0  ;;  %v12666_v23 = vld [vmem:[#allocation55_spill] sm:$0xff] }
 0x2f8   :  { %v3034_v12 = vadd.f32 %v12663_v15, %v2946_v7  ;;  %v2950_v10 = vpop.f32.mrb[27].mxu1  ;;  %v2991_v44 = vpop.f32.mrb[39].mxu0  ;;  %v2987_v50 = vadd.f32 %v2986_v26, %v12666_v23  ;;  %v12667_v7 = vld [vmem:[#allocation13_spill] sm:$0xff] }
 0x2f9   :  { %v3041_v54 = vadd.f32 %v12664_v31, %v2948_v45  ;;  %v3055_v18 = vadd.f32 %v12665_v6, %v2989_v46  ;;  %v11055_v10 = vpop.permute.xlu1 %3088  ;;  %v12670_v44 = vld [vmem:[#allocation59_spill] sm:$0xff]  ;;  %v12671_v6 = vld [vmem:[#allocation60_spill] sm:$0xff] }
 0x2fa   :  { %v8302_v39 = vmul.f32 -1.442695, %v3034_v12  ;;  %12668 = vst [vmem:[#allocation12_spill] sm:$0xff] %v11055_v10  ;;  %vm3090_vm13 = vcmp.eq.s32.totalorder %v11055_v10, 1  ;;  %v12691_v10 = vld [vmem:[#allocation40_spill] sm:$0xff] }
 0x2fb   :  { %v8303_v19 = vmul.f32 -1.442695, %v3041_v54  ;;  %v8304_v45 = vmul.f32 -1.442695, %v3055_v18 }
 0x2fc   :  { %9917 = vpow2.f32 %v8302_v39 }
 0x2fd   :  { %9919 = vpow2.f32 %v8303_v19  ;;  %v11057_v46 = vpop.permute.xlu1 %3080 }
 0x2fe   :  { %12669 = vst [vmem:[#allocation14_spill] sm:$0xff] %v11057_v46  ;;  %vm3082_vm12 = vcmp.eq.s32.totalorder %v11057_v46, 1 }
 0x306   :  { %v9918_v3 = vpop.eup %9917 }
 0x307   :  { %v3038_v57 = vadd.f32 1.0, %v9918_v3  ;;  %v9920_v8 = vpop.eup %9919 }
 0x308   :  { %v3045_v22 = vadd.f32 1.0, %v9920_v8 }
 0x309   :  { %9921 = vrcp.f32 %v3038_v57 }
 0x30a   :  { %9923 = vrcp.f32 %v3045_v22 }
 0x313   :  { %v9922_v56 = vpop.eup %9921 }
 0x314   :  { %v3048_v53 = vmul.f32 %v9922_v56, %v2987_v50  ;;  %v9924_v39 = vpop.eup %9923 }
 0x315   :  { %v3051_v19 = vsub.f32 1.0, %v9924_v39  ;;  %v3053_v31 = vmul.f32 %v9924_v39, %v12670_v44 }
 0x316   :  { %v3049_v15 = vadd.f32 %v12667_v7, %v3048_v53 }
 0x318   :  { %9925 = vtanh.f32 %v3049_v15  ;;  %v12672_v15 = vld [vmem:[#allocation53_spill] sm:$0xff] }
 0x319   :  { %9927 = vpow2.f32 %v8304_v45 }
 0x322   :  { %v9926_v12 = vpop.eup %9925 }
 0x323   :  { %v3052_v57 = vmul.f32 %v9926_v12, %v3051_v19  ;;  %v9928_v54 = vpop.eup %9927 }
 0x324   :  { %v3059_v18 = vadd.f32 1.0, %v9928_v54 }
 0x325   :  { %v3054_v26 = vadd.f32 %v3053_v31, %v3052_v57  ;;  %v12673_v57 = vld [vmem:[#allocation54_spill] sm:$0xff] }
 0x326   :  { %9929 = vrcp.f32 %v3059_v18 }
 0x327   :  { %v3083_v53 = vsel %vm3082_vm12, %v3054_v26, 0.0 }
 0x328   :  { %8306 = vst [vmem:[%s12512_s10 + $0x10] sm:$0xff] %v3083_v53 }
 0x330   :  { %v9930_v7 = vpop.eup %9929 }
 0x335   :  { %v3027_v22 = vpop.f32.mrb[28].mxu1 }
 0x336   :  { %v3028_v3 = vadd.f32 %v3027_v22, %v12671_v6  ;;  %v3029_v8 = vpop.f32.mrb[29].mxu1 }
 0x337   :  { %v3030_v50 = vadd.f32 %v3029_v8, %v10850_v9  ;;  %v3031_v56 = vpop.f32.mrb[30].mxu1 }
 0x338   :  { %v3062_v45 = vadd.f32 %v12672_v15, %v3028_v3  ;;  %v3032_v39 = vpop.f32.mrb[31].mxu1  ;;  %v11075_v3 = vsel %vm3082_vm12, %v3054_v26, %v12670_v44  ;;  %v11129_v44 = vld [vmem:[#allocation5 + $0x1f4] ss:$24 sps:$4 sm:$0xff]   ;;  %v11132_v26 = vld [vmem:[#allocation5 + $0x1f0] ss:$24 sps:$4 sm:$0xff]  }
 0x339   :  { %v3069_v19 = vmul.f32 %v9930_v7, %v3030_v50  ;;  %v3102_v7 = vpack.c.bf16 %v11075_v3, %v11075_v3  ;;  %v11135_v15 = vld [vmem:[#allocation5 + $0x224] ss:$24 sps:$4 sm:$0xff]   ;;  %v11141_v39 = vld [vmem:[#allocation5 + $0x254] ss:$24 sps:$4 sm:$0xff]  }
 0x33a   :  { %v8305_v12 = vmul.f32 -1.442695, %v3062_v45  ;;  %v11138_v45 = vld [vmem:[#allocation5 + $0x220] ss:$24 sps:$4 sm:$0xff]  }
 0x33b   :  { %v3070_v31 = vadd.f32 %v12673_v57, %v3069_v19  ;;  %v11144_v19 = vld [vmem:[#allocation5 + $0x250] ss:$24 sps:$4 sm:$0xff]   ;;  %v11150_v57 = vld [vmem:[#allocation5 + $0x280] ss:$24 sps:$4 sm:$0xff]  }
 0x33c   :  { %9931 = vpow2.f32 %v8305_v12  ;;  %12674 = vst [vmem:[#allocation35_spill] sm:$0xff] %v11144_v19  ;;  %v11147_v12 = vld [vmem:[#allocation5 + $0x284] ss:$24 sps:$4 sm:$0xff]   ;;  %12676 = vst [vmem:[#allocation59_spill] sm:$0xff] %v11150_v57 }
 0x33d   :  { %12675 = vst [vmem:[#allocation13_spill] sm:$0xff] %v11147_v12 }
 0x346   :  { %v9932_v23 = vpop.eup %9931 }
 0x347   :  { %v3066_v53 = vadd.f32 1.0, %v9932_v23 }
 0x349   :  { %9933 = vrcp.f32 %v3066_v53  ;;  %v11156_v53 = vld [vmem:[#allocation5 + $0x2b0] ss:$24 sps:$4 sm:$0xff]  }
 0x34a   :  { %9935 = vtanh.f32 %v3070_v31  ;;  %v11153_v31 = vld [vmem:[#allocation5 + $0x2b4] ss:$24 sps:$4 sm:$0xff]   ;;  %12678 = vst [vmem:[#allocation54_spill] sm:$0xff] %v11156_v53 }
 0x34b   :  { %12677 = vst [vmem:[#allocation53_spill] sm:$0xff] %v11153_v31 }
 0x353   :  { %v9934_v54 = vpop.eup %9933 }
 0x354   :  { %v3072_v18 = vsub.f32 1.0, %v9934_v54  ;;  %v9936_v22 = vpop.eup %9935  ;;  %v3074_v8 = vmul.f32 %v9934_v54, %v10861_v17  ;;  %v11159_v54 = vld [vmem:[#allocation5 + $0x2e4] ss:$24 sps:$4 sm:$0xff]  }
 0x355   :  { %12679 = vst [vmem:[#allocation63_spill] sm:$0xff] %v11159_v54 }
 0x356   :  { %v3073_v6 = vmul.f32 %v9936_v22, %v3072_v18  ;;  %v11162_v18 = vld [vmem:[#allocation5 + $0x2e0] ss:$24 sps:$4 sm:$0xff]   ;;  %v11284_v22 = vld [vmem:[#allocation5 + $0x2d4] ss:$24 sps:$4 sm:$0xff]  }
 0x357   :  { %12680 = vst [vmem:[#allocation64_spill] sm:$0xff] %v11162_v18  ;;  %12687 = vst [vmem:[#allocation69_spill] sm:$0xff] %v11284_v22 }
 0x358   :  { %v3075_v56 = vadd.f32 %v3074_v8, %v3073_v6  ;;  %v11287_v8 = vld [vmem:[#allocation5 + $0x2d0] ss:$24 sps:$4 sm:$0xff]  }
 0x359   :  { %12688 = vst [vmem:[#allocation70_spill] sm:$0xff] %v11287_v8 }
 0x35a   :  { %v3091_v50 = vsel %vm3090_vm13, %v3075_v56, 0.0  ;;  %v11082_v23 = vsel %vm3090_vm13, %v3075_v56, %v10861_v17  ;;  %v11099_v17 = vld [vmem:[#allocation5 + $0x104] ss:$24 sps:$4 sm:$0xff]   ;;  %v11291_v56 = vld [vmem:[#allocation5 + $0x14] ss:$24 sps:$4 sm:$0xff]  }
 0x35b   :  { %8307 = vst [vmem:[%s12512_s10 + $0x68] sm:$0xff] %v3091_v50  ;;  %v3103_v6 = vpack.c.bf16 %v11082_v23, %v11082_v23  ;;  %12689 = vst [vmem:[#allocation71_spill] sm:$0xff] %v11291_v56 }
 0x35d   :  { %3712 = vmatprep.mubr.bf16.mxu0 %v3103_v6  ;;  %3753 = vmatprep.mubr.bf16.mxu1 %v3103_v6 }
 0x35e   :  { %3713 = vmatmul.mubr.bf16.vlgmr.msra.gmra.mrb[40].mxu0 %v3102_v7  ;;  %3754 = vmatmul.mubr.bf16.vlgmr.msra.gmra.mrb[32].mxu1 %v3102_v7 }
 0x35f   :  { %3763 = vmatpush1.bf16.msra.mxu0 %v10857_v32  ;;  %3794 = vmatprep.mubr.bf16.mxu0 %v3103_v6  ;;  %v11102_v32 = vld [vmem:[#allocation5 + $0x100] ss:$24 sps:$4 sm:$0xff]  }
 0x360   :  { %3764 = vmatprep.subr.bf16.mxu0 %v10868_v13  ;;  %v11105_v13 = vld [vmem:[#allocation5 + $0x134] ss:$24 sps:$4 sm:$0xff]  }
 0x363   :  { %3765 = vmatpush1.bf16.msra.mxu0 %v10888_v27  ;;  %v11108_v27 = vld [vmem:[#allocation5 + $0x130] ss:$24 sps:$4 sm:$0xff]  }
 0x364   :  { %3766 = vmatprep.subr.bf16.mxu0 %v10891_v47  ;;  %v11111_v47 = vld [vmem:[#allocation5 + $0x164] ss:$24 sps:$4 sm:$0xff]  }
 0x367   :  { %3767 = vmatpush1.bf16.msra.mxu0 %v10896_v25  ;;  %v11114_v25 = vld [vmem:[#allocation5 + $0x160] ss:$24 sps:$4 sm:$0xff]  }
 0x368   :  { %3768 = vmatprep.subr.bf16.mxu0 %v10899_v58  ;;  %v11117_v58 = vld [vmem:[#allocation5 + $0x194] ss:$24 sps:$4 sm:$0xff]  }
 0x36b   :  { %3769 = vmatpush1.bf16.msra.mxu0 %v10904_v42  ;;  %v11120_v42 = vld [vmem:[#allocation5 + $0x190] ss:$24 sps:$4 sm:$0xff]  }
 0x36c   :  { %3770 = vmatprep.subr.bf16.mxu0 %v10907_v43  ;;  %v11123_v43 = vld [vmem:[#allocation5 + $0x1c4] ss:$24 sps:$4 sm:$0xff]  }
 0x36f   :  { %3771 = vmatpush1.bf16.msra.mxu0 %v10912_v52  ;;  %v11126_v52 = vld [vmem:[#allocation5 + $0x1c0] ss:$24 sps:$4 sm:$0xff]  }
 0x370   :  { %3772 = vmatprep.subr.bf16.mxu0 %v11099_v17 }
 0x373   :  { %3773 = vmatpush1.bf16.msra.mxu0 %v11102_v32 }
 0x374   :  { %3774 = vmatprep.subr.bf16.mxu0 %v11105_v13 }
 0x377   :  { %3775 = vmatpush1.bf16.msra.mxu0 %v11108_v27 }
 0x378   :  { %3776 = vmatprep.subr.bf16.mxu0 %v11111_v47 }
 0x37b   :  { %3777 = vmatpush1.bf16.msra.mxu0 %v11114_v25 }
 0x37c   :  { %3778 = vmatprep.subr.bf16.mxu0 %v11117_v58 }
 0x37f   :  { %3779 = vmatpush1.bf16.msra.mxu0 %v11120_v42 }
 0x380   :  { %3780 = vmatprep.subr.bf16.mxu0 %v11123_v43 }
 0x383   :  { %3781 = vmatpush1.bf16.msra.mxu0 %v11126_v52 }
 0x384   :  { %3782 = vmatprep.subr.bf16.mxu0 %v11129_v44 }
 0x387   :  { %3783 = vmatpush1.bf16.msra.mxu0 %v11132_v26 }
 0x388   :  { %3784 = vmatprep.subr.bf16.mxu0 %v11135_v15 }
 0x38b   :  { %3785 = vmatpush1.bf16.msra.mxu0 %v11138_v45 }
 0x38c   :  { %3786 = vmatprep.subr.bf16.mxu0 %v11141_v39 }
 0x38f   :  { %3787 = vmatpush1.bf16.msra.mxu0 %v11144_v19 }
 0x390   :  { %3788 = vmatprep.subr.bf16.mxu0 %v11147_v12 }
 0x393   :  { %3789 = vmatpush1.bf16.msra.mxu0 %v11150_v57  ;;  %v12694_v57 = vld [vmem:[#allocation18_spill] sm:$0xff] }
 0x394   :  { %3790 = vmatprep.subr.bf16.mxu0 %v11153_v31 }
 0x397   :  { %3791 = vmatpush1.bf16.msra.mxu0 %v11156_v53 }
 0x398   :  { %3792 = vmatprep.subr.bf16.mxu0 %v11159_v54  ;;  %v12692_v54 = vld [vmem:[#allocation56_spill] sm:$0xff] }
 0x39b   :  { %3793 = vmatpush1.bf16.msra.mxu0 %v11162_v18 }
 0x39c   :  { %4490 = vmatprep.subr.bf16.mxu0 %v10953_v49  ;;  %v9548_v49 = vld [vmem:[#allocation5 + $0x4] ss:$24 sps:$4 sm:$0xff]  }
 0x39d   :  { %4449 = vmatprep.subr.bf16.mxu1 %v9548_v49 }
 0x39e   :  { %3795 = vmatmul.mubr.bf16.vlgmr.msra.gmra.mrb[44].mxu0 %v3102_v7  ;;  %v12690_v7 = vld [vmem:[#allocation39_spill] sm:$0xff] }
 0x39f   :  { %4491 = vmatpush1.bf16.msra.mxu0 %v10951_v30  ;;  %v11194_v30 = vld [vmem:[#allocation5] ss:$24 sps:$4 sm:$0xff]  }
 0x3a0   :  { %4492 = vmatprep.subr.bf16.mxu0 %v10955_v34  ;;  %v11197_v34 = vld [vmem:[#allocation5 + $0x34] ss:$24 sps:$4 sm:$0xff]   ;;  %4450 = vmatpush1.bf16.msra.mxu1 %v11194_v30 }
 0x3a1   :  { %4451 = vmatprep.subr.bf16.mxu1 %v11197_v34 }
 0x3a3   :  { %4493 = vmatpush1.bf16.msra.mxu0 %v10959_v36  ;;  %v11200_v36 = vld [vmem:[#allocation5 + $0x30] ss:$24 sps:$4 sm:$0xff]  }
 0x3a4   :  { %4494 = vmatprep.subr.bf16.mxu0 %v10963_v38  ;;  %v11204_v38 = vld [vmem:[#allocation5 + $0x64] ss:$24 sps:$4 sm:$0xff]   ;;  %4452 = vmatpush1.bf16.msra.mxu1 %v11200_v36 }
 0x3a5   :  { %4453 = vmatprep.subr.bf16.mxu1 %v11204_v38 }
 0x3a7   :  { %4495 = vmatpush1.bf16.msra.mxu0 %v10965_v41  ;;  %v11208_v41 = vld [vmem:[#allocation5 + $0x60] ss:$24 sps:$4 sm:$0xff]  }
 0x3a8   :  { %4496 = vmatprep.subr.bf16.mxu0 %v10971_v28  ;;  %v11212_v28 = vld [vmem:[#allocation5 + $0x94] ss:$24 sps:$4 sm:$0xff]   ;;  %4454 = vmatpush1.bf16.msra.mxu1 %v11208_v41 }
 0x3a9   :  { %4455 = vmatprep.subr.bf16.mxu1 %v11212_v28 }
 0x3ab   :  { %4497 = vmatpush1.bf16.msra.mxu0 %v10969_v61  ;;  %v12681_v61 = vld [vmem:[#allocation62_spill] sm:$0xff] }
 0x3ac   :  { %4498 = vmatprep.subr.bf16.mxu0 %v10973_v33  ;;  %v11215_v33 = vld [vmem:[#allocation5 + $0x90] ss:$24 sps:$4 sm:$0xff]  }
 0x3ad   :  { %4456 = vmatpush1.bf16.msra.mxu1 %v11215_v33 }
 0x3af   :  { %4499 = vmatpush1.bf16.msra.mxu0 %v10977_v40  ;;  %v11218_v40 = vld [vmem:[#allocation5 + $0xc4] ss:$24 sps:$4 sm:$0xff]  }
 0x3b0   :  { %4500 = vmatprep.subr.bf16.mxu0 %v10980_v55  ;;  %v11221_v55 = vld [vmem:[#allocation5 + $0xc0] ss:$24 sps:$4 sm:$0xff]   ;;  %4457 = vmatprep.subr.bf16.mxu1 %v11218_v40 }
 0x3b1   :  { %4458 = vmatpush1.bf16.msra.mxu1 %v11221_v55 }
 0x3b3   :  { %4501 = vmatpush1.bf16.msra.mxu0 %v10983_v60  ;;  %v11224_v60 = vld [vmem:[#allocation5 + $0xf4] ss:$24 sps:$4 sm:$0xff]  }
 0x3b4   :  { %4502 = vmatprep.subr.bf16.mxu0 %v10987_v63  ;;  %v11227_v63 = vld [vmem:[#allocation5 + $0xf0] ss:$24 sps:$4 sm:$0xff]   ;;  %4459 = vmatprep.subr.bf16.mxu1 %v11224_v60 }
 0x3b5   :  { %4460 = vmatpush1.bf16.msra.mxu1 %v11227_v63 }
 0x3b7   :  { %4503 = vmatpush1.bf16.msra.mxu0 %v10989_v24  ;;  %v11231_v24 = vld [vmem:[#allocation5 + $0x124] ss:$24 sps:$4 sm:$0xff]  }
 0x3b8   :  { %4504 = vmatprep.subr.bf16.mxu0 %v10993_v29  ;;  %v11233_v29 = vld [vmem:[#allocation5 + $0x120] ss:$24 sps:$4 sm:$0xff]   ;;  %4461 = vmatprep.subr.bf16.mxu1 %v11231_v24 }
 0x3b9   :  { %4462 = vmatpush1.bf16.msra.mxu1 %v11233_v29 }
 0x3bb   :  { %4505 = vmatpush1.bf16.msra.mxu0 %v10995_v62  ;;  %v11237_v62 = vld [vmem:[#allocation5 + $0x154] ss:$24 sps:$4 sm:$0xff]  }
 0x3bc   :  { %4506 = vmatprep.subr.bf16.mxu0 %v10999_v2  ;;  %v11239_v2 = vld [vmem:[#allocation5 + $0x150] ss:$24 sps:$4 sm:$0xff]   ;;  %4463 = vmatprep.subr.bf16.mxu1 %v11237_v62 }
 0x3bd   :  { %4464 = vmatpush1.bf16.msra.mxu1 %v11239_v2 }
 0x3bf   :  { %4507 = vmatpush1.bf16.msra.mxu0 %v11001_v11  ;;  %v11243_v11 = vld [vmem:[#allocation5 + $0x184] ss:$24 sps:$4 sm:$0xff]  }
 0x3c0   :  { %4508 = vmatprep.subr.bf16.mxu0 %v11005_v35  ;;  %v11245_v35 = vld [vmem:[#allocation5 + $0x180] ss:$24 sps:$4 sm:$0xff]   ;;  %4465 = vmatprep.subr.bf16.mxu1 %v11243_v11 }
 0x3c1   :  { %4466 = vmatpush1.bf16.msra.mxu1 %v11245_v35 }
 0x3c3   :  { %4509 = vmatpush1.bf16.msra.mxu0 %v11007_v51  ;;  %v11249_v51 = vld [vmem:[#allocation5 + $0x1b4] ss:$24 sps:$4 sm:$0xff]  }
 0x3c4   :  { %4510 = vmatprep.subr.bf16.mxu0 %v11011_v16  ;;  %v11251_v16 = vld [vmem:[#allocation5 + $0x1b0] ss:$24 sps:$4 sm:$0xff]   ;;  %4467 = vmatprep.subr.bf16.mxu1 %v11249_v51 }
 0x3c5   :  { %4468 = vmatpush1.bf16.msra.mxu1 %v11251_v16 }
 0x3c7   :  { %4511 = vmatpush1.bf16.msra.mxu0 %v11013_v48  ;;  %v11255_v48 = vld [vmem:[#allocation5 + $0x1e4] ss:$24 sps:$4 sm:$0xff]  }
 0x3c8   :  { %4512 = vmatprep.subr.bf16.mxu0 %v11017_v5  ;;  %v11257_v5 = vld [vmem:[#allocation5 + $0x1e0] ss:$24 sps:$4 sm:$0xff]   ;;  %4469 = vmatprep.subr.bf16.mxu1 %v11255_v48 }
 0x3c9   :  { %4470 = vmatpush1.bf16.msra.mxu1 %v11257_v5 }
 0x3cb   :  { %4513 = vmatpush1.bf16.msra.mxu0 %v11019_v4  ;;  %v11261_v4 = vld [vmem:[#allocation5 + $0x214] ss:$24 sps:$4 sm:$0xff]  }
 0x3cc   :  { %4514 = vmatprep.subr.bf16.mxu0 %v11021_v59  ;;  %v11263_v59 = vld [vmem:[#allocation5 + $0x210] ss:$24 sps:$4 sm:$0xff]   ;;  %4471 = vmatprep.subr.bf16.mxu1 %v11261_v4 }
 0x3cd   :  { %4472 = vmatpush1.bf16.msra.mxu1 %v11263_v59 }
 0x3cf   :  { %4515 = vmatpush1.bf16.msra.mxu0 %v11025_v37  ;;  %v11266_v37 = vld [vmem:[#allocation5 + $0x244] ss:$24 sps:$4 sm:$0xff]  }
 0x3d0   :  { %4516 = vmatprep.subr.bf16.mxu0 %v11028_v0  ;;  %v11269_v0 = vld [vmem:[#allocation5 + $0x240] ss:$24 sps:$4 sm:$0xff]   ;;  %4473 = vmatprep.subr.bf16.mxu1 %v11266_v37 }
 0x3d1   :  { %12682 = vst [vmem:[#allocation62_spill] sm:$0xff] %v11269_v0  ;;  %4474 = vmatpush1.bf16.msra.mxu1 %v11269_v0  ;;  %v12695_v0 = vld [vmem:[#allocation31_spill] sm:$0xff] }
 0x3d3   :  { %4517 = vmatpush1.bf16.msra.mxu0 %v11031_v21  ;;  %v11272_v21 = vld [vmem:[#allocation5 + $0x274] ss:$24 sps:$4 sm:$0xff]  }
 0x3d4   :  { %4518 = vmatprep.subr.bf16.mxu0 %v11034_v1  ;;  %12683 = vst [vmem:[#allocation65_spill] sm:$0xff] %v11272_v21  ;;  %v11275_v1 = vld [vmem:[#allocation5 + $0x270] ss:$24 sps:$4 sm:$0xff]   ;;  %4475 = vmatprep.subr.bf16.mxu1 %v11272_v21 }
 0x3d5   :  { %12684 = vst [vmem:[#allocation66_spill] sm:$0xff] %v11275_v1  ;;  %4476 = vmatpush1.bf16.msra.mxu1 %v11275_v1  ;;  %v12693_v1 = vld [vmem:[#allocation16_spill] sm:$0xff] }
 0x3d7   :  { %4519 = vmatpush1.bf16.msra.mxu0 %v11037_v14  ;;  %v11278_v14 = vld [vmem:[#allocation5 + $0x2a4] ss:$24 sps:$4 sm:$0xff]  }
 0x3d8   :  { %4520 = vmatprep.subr.bf16.mxu0 %v11040_v20  ;;  %12685 = vst [vmem:[#allocation67_spill] sm:$0xff] %v11278_v14  ;;  %v11281_v20 = vld [vmem:[#allocation5 + $0x2a0] ss:$24 sps:$4 sm:$0xff]   ;;  %4477 = vmatprep.subr.bf16.mxu1 %v11278_v14 }
 0x3d9   :  { %12686 = vst [vmem:[#allocation68_spill] sm:$0xff] %v11281_v20  ;;  %4478 = vmatpush1.bf16.msra.mxu1 %v11281_v20 }
 0x3da   :  { %4479 = vmatprep.subr.bf16.mxu1 %v11284_v22 }
 0x3db   :  { %4521 = vmatpush1.bf16.msra.mxu0 %v12681_v61 }
 0x3dc   :  { %5218 = vmatprep.subr.bf16.mxu0 %v9548_v49 }
 0x3dd   :  { %4480 = vmatpush1.bf16.msra.mxu1 %v11287_v8 }
 0x3de   :  { %4531 = vmatprep.subr.bf16.mxu1 %v11291_v56 }
 0x431   :  { %v3714_v50 = vpop.f32.mrb[40].mxu0  ;;  %v3755_v6 = vpop.f32.mrb[32].mxu1 }
 0x432   :  { %v3715_v49 = vadd.f32 %v3714_v50, %v12690_v7  ;;  %v3716_v61 = vpop.f32.mrb[41].mxu0  ;;  %v3757_v46 = vpop.f32.mrb[33].mxu1 }
 0x433   :  { %v3717_v18 = vadd.f32 %v3716_v61, %v12691_v10  ;;  %v3758_v20 = vadd.f32 %v3757_v46, %v12692_v54  ;;  %v3718_v53 = vpop.f32.mrb[42].mxu0  ;;  %v3759_v14 = vpop.f32.mrb[34].mxu1  ;;  %v12696_v46 = vld [vmem:[#allocation55_spill] sm:$0xff] }
 0x434   :  { %v3803_v22 = vadd.f32 %v12693_v1, %v3715_v49  ;;  %v3719_v31 = vpop.f32.mrb[43].mxu0  ;;  %v3760_v8 = vpop.f32.mrb[35].mxu1  ;;  %v3756_v53 = vadd.f32 %v3755_v6, %v12696_v46  ;;  %v12699_v6 = vld [vmem:[#allocation60_spill] sm:$0xff] }
 0x435   :  { %v3810_v21 = vadd.f32 %v12694_v57, %v3717_v18  ;;  %v3824_v56 = vadd.f32 %v12695_v0, %v3758_v20  ;;  %v12697_v31 = vld [vmem:[#allocation17_spill] sm:$0xff]  ;;  %v11303_v20 = vpop.permute.xlu1 %3849 }
 0x436   :  { %v8404_v12 = vmul.f32 -1.442695, %v3803_v22  ;;  %12698 = vst [vmem:[#allocation16_spill] sm:$0xff] %v11303_v20  ;;  %vm3851_vm14 = vcmp.eq.s32.totalorder %v11303_v20, 1 }
 0x437   :  { %v8405_v19 = vmul.f32 -1.442695, %v3810_v21  ;;  %v8406_v57 = vmul.f32 -1.442695, %v3824_v56 }
 0x438   :  { %9937 = vpow2.f32 %v8404_v12 }
 0x439   :  { %9939 = vpow2.f32 %v8405_v19 }
 0x442   :  { %v9938_v50 = vpop.eup %9937 }
 0x443   :  { %v3807_v7 = vadd.f32 1.0, %v9938_v50  ;;  %v9940_v61 = vpop.eup %9939 }
 0x444   :  { %v3814_v10 = vadd.f32 1.0, %v9940_v61 }
 0x445   :  { %9941 = vrcp.f32 %v3807_v7 }
 0x446   :  { %9943 = vrcp.f32 %v3814_v10 }
 0x44f   :  { %v9942_v14 = vpop.eup %9941 }
 0x450   :  { %v3817_v54 = vmul.f32 %v9942_v14, %v3756_v53  ;;  %v9944_v18 = vpop.eup %9943  ;;  %v12700_v14 = vld [vmem:[#allocation51_spill] sm:$0xff] }
 0x451   :  { %v3820_v0 = vsub.f32 1.0, %v9944_v18  ;;  %v3822_v19 = vmul.f32 %v9944_v18, %v11075_v3 }
 0x452   :  { %v3818_v1 = vadd.f32 %v12697_v31, %v3817_v54 }
 0x454   :  { %9945 = vtanh.f32 %v3818_v1 }
 0x455   :  { %9947 = vpow2.f32 %v8406_v57 }
 0x45e   :  { %v9946_v12 = vpop.eup %9945 }
 0x45f   :  { %v3821_v21 = vmul.f32 %v9946_v12, %v3820_v0  ;;  %v9948_v8 = vpop.eup %9947  ;;  %v12701_v0 = vld [vmem:[#allocation52_spill] sm:$0xff] }
 0x460   :  { %v3828_v54 = vadd.f32 1.0, %v9948_v8 }
 0x461   :  { %v3823_v22 = vadd.f32 %v3822_v19, %v3821_v21 }
 0x462   :  { %9949 = vrcp.f32 %v3828_v54 }
 0x463   :  { %v3852_v10 = vsel %vm3851_vm14, %v3823_v22, 0.0 }
 0x464   :  { %8408 = vst [vmem:[%s12512_s10 + $0x20] sm:$0xff] %v3852_v10 }
 0x46c   :  { %v9950_v53 = vpop.eup %9949 }
 0x471   :  { %v3796_v56 = vpop.f32.mrb[44].mxu0 }
 0x472   :  { %v3797_v7 = vadd.f32 %v3796_v56, %v12699_v6  ;;  %v3798_v49 = vpop.f32.mrb[45].mxu0 }
 0x473   :  { %v3799_v50 = vadd.f32 %v3798_v49, %v10850_v9  ;;  %v3800_v61 = vpop.f32.mrb[46].mxu0 }
 0x474   :  { %v3831_v31 = vadd.f32 %v12700_v14, %v3797_v7  ;;  %v3801_v1 = vpop.f32.mrb[47].mxu0  ;;  %v11316_v61 = vpop.permute.xlu0 %3857  ;;  %v11322_v7 = vsel %vm3851_vm14, %v3823_v22, %v11075_v3  ;;  %v11342_v22 = vld [vmem:[#allocation5 + $0x44] ss:$24 sps:$4 sm:$0xff]  }
 0x475   :  { %v3838_v57 = vmul.f32 %v9950_v53, %v3799_v50  ;;  %12702 = vst [vmem:[#allocation18_spill] sm:$0xff] %v11316_v61  ;;  %vm3859_vm15 = vcmp.eq.s32.totalorder %v11316_v61, 1  ;;  %v11340_v3 = vpack.c.bf16 %v11322_v7, %v11322_v7  ;;  %v11355_v1 = vld [vmem:[#allocation5 + $0x70] ss:$24 sps:$4 sm:$0xff]  }
 0x476   :  { %v8407_v18 = vmul.f32 -1.442695, %v3831_v31  ;;  %v11336_v31 = vld [vmem:[#allocation5 + $0x10] ss:$24 sps:$4 sm:$0xff]  }
 0x477   :  { %v3839_v12 = vadd.f32 %v12701_v0, %v3838_v57  ;;  %v11358_v57 = vld [vmem:[#allocation5 + $0xa4] ss:$24 sps:$4 sm:$0xff]   ;;  %v12726_v61 = vld [vmem:[#allocation27_spill] sm:$0xff] }
 0x478   :  { %9951 = vpow2.f32 %v8407_v18  ;;  %v11363_v18 = vld [vmem:[#allocation5 + $0xa0] ss:$24 sps:$4 sm:$0xff]   ;;  %v11490_v0 = vld [vmem:[#allocation5 + $0x21c] ss:$24 sps:$4 sm:$0xff]  }
 0x482   :  { %v9952_v21 = vpop.eup %9951 }
 0x483   :  { %v3835_v19 = vadd.f32 1.0, %v9952_v21  ;;  %v11494_v21 = vld [vmem:[#allocation5 + $0x24c] ss:$24 sps:$4 sm:$0xff]  }
 0x485   :  { %9953 = vrcp.f32 %v3835_v19  ;;  %v11498_v19 = vld [vmem:[#allocation5 + $0x248] ss:$24 sps:$4 sm:$0xff]  }
 0x486   :  { %9955 = vtanh.f32 %v3839_v12  ;;  %v11492_v12 = vld [vmem:[#allocation5 + $0x218] ss:$24 sps:$4 sm:$0xff]  }
 0x48f   :  { %v9954_v8 = vpop.eup %9953 }
 0x490   :  { %v3841_v10 = vsub.f32 1.0, %v9954_v8  ;;  %v9956_v54 = vpop.eup %9955  ;;  %v3843_v49 = vmul.f32 %v9954_v8, %v11082_v23  ;;  %v11501_v8 = vld [vmem:[#allocation5 + $0x27c] ss:$24 sps:$4 sm:$0xff]  }
 0x492   :  { %v3842_v56 = vmul.f32 %v9956_v54, %v3841_v10  ;;  %v11504_v10 = vld [vmem:[#allocation5 + $0x278] ss:$24 sps:$4 sm:$0xff]   ;;  %v11507_v54 = vld [vmem:[#allocation5 + $0x2ac] ss:$24 sps:$4 sm:$0xff]  }
 0x494   :  { %v3844_v9 = vadd.f32 %v3843_v49, %v3842_v56  ;;  %v11510_v56 = vld [vmem:[#allocation5 + $0x2a8] ss:$24 sps:$4 sm:$0xff]   ;;  %v11513_v49 = vld [vmem:[#allocation5 + $0x2dc] ss:$24 sps:$4 sm:$0xff]  }
 0x495   :  { %12718 = vst [vmem:[#allocation31_spill] sm:$0xff] %v11510_v56  ;;  %12719 = vst [vmem:[#allocation55_spill] sm:$0xff] %v11513_v49 }
 0x496   :  { %v3860_v50 = vsel %vm3859_vm15, %v3844_v9, 0.0  ;;  %v11329_v53 = vsel %vm3859_vm15, %v3844_v9, %v11082_v23  ;;  %v11347_v9 = vld [vmem:[#allocation5 + $0x40] ss:$24 sps:$4 sm:$0xff]   ;;  %v11350_v23 = vld [vmem:[#allocation5 + $0x74] ss:$24 sps:$4 sm:$0xff]  }
 0x497   :  { %8409 = vst [vmem:[%s12512_s10 + $0x58] sm:$0xff] %v3860_v50  ;;  %v3872_v14 = vpack.c.bf16 %v11329_v53, %v11329_v53  ;;  %v11516_v50 = vld [vmem:[#allocation5 + $0x2d8] ss:$24 sps:$4 sm:$0xff]  }
 0x498   :  { %12720 = vst [vmem:[#allocation17_spill] sm:$0xff] %v11516_v50 }
 0x499   :  { %4481 = vmatprep.mubr.bf16.mxu1 %v3872_v14  ;;  %4522 = vmatprep.mubr.bf16.mxu0 %v3872_v14 }
 0x49a   :  { %4482 = vmatmul.mubr.bf16.vlgmr.msra.gmra.mrb[36].mxu1 %v11340_v3  ;;  %4523 = vmatmul.mubr.bf16.vlgmr.msra.gmra.mrb[48].mxu0 %v11340_v3 }
 0x49b   :  { %4532 = vmatpush1.bf16.msra.mxu1 %v11336_v31  ;;  %4563 = vmatprep.mubr.bf16.mxu1 %v3872_v14 }
 0x49c   :  { %4533 = vmatprep.subr.bf16.mxu1 %v11342_v22  ;;  %5219 = vmatpush1.bf16.msra.mxu0 %v11194_v30  ;;  %v11366_v30 = vld [vmem:[#allocation5 + $0xd4] ss:$24 sps:$4 sm:$0xff]  }
 0x49d   :  { %5220 = vmatprep.subr.bf16.mxu0 %v11197_v34  ;;  %v11371_v34 = vld [vmem:[#allocation5 + $0xd0] ss:$24 sps:$4 sm:$0xff]  }
 0x49f   :  { %4534 = vmatpush1.bf16.msra.mxu1 %v11347_v9 }
 0x4a0   :  { %4535 = vmatprep.subr.bf16.mxu1 %v11350_v23  ;;  %5221 = vmatpush1.bf16.msra.mxu0 %v11200_v36  ;;  %v11424_v36 = vld [vmem:[#allocation5 + $0x8] ss:$24 sps:$4 sm:$0xff]  }
 0x4a1   :  { %5222 = vmatprep.subr.bf16.mxu0 %v11204_v38  ;;  %v11426_v38 = vld [vmem:[#allocation5 + $0xc] ss:$24 sps:$4 sm:$0xff]  }
 0x4a3   :  { %4536 = vmatpush1.bf16.msra.mxu1 %v11355_v1 }
 0x4a4   :  { %4537 = vmatprep.subr.bf16.mxu1 %v11358_v57  ;;  %5223 = vmatpush1.bf16.msra.mxu0 %v11208_v41  ;;  %v11428_v41 = vld [vmem:[#allocation5 + $0x3c] ss:$24 sps:$4 sm:$0xff]  }
 0x4a5   :  { %5224 = vmatprep.subr.bf16.mxu0 %v11212_v28  ;;  %v11432_v28 = vld [vmem:[#allocation5 + $0x38] ss:$24 sps:$4 sm:$0xff]  }
 0x4a7   :  { %4538 = vmatpush1.bf16.msra.mxu1 %v11363_v18 }
 0x4a8   :  { %4539 = vmatprep.subr.bf16.mxu1 %v11366_v30  ;;  %5225 = vmatpush1.bf16.msra.mxu0 %v11215_v33  ;;  %v11435_v33 = vld [vmem:[#allocation5 + $0x6c] ss:$24 sps:$4 sm:$0xff]  }
 0x4a9   :  { %5226 = vmatprep.subr.bf16.mxu0 %v11218_v40  ;;  %v11438_v40 = vld [vmem:[#allocation5 + $0x68] ss:$24 sps:$4 sm:$0xff]  }
 0x4ab   :  { %4540 = vmatpush1.bf16.msra.mxu1 %v11371_v34 }
 0x4ac   :  { %4541 = vmatprep.subr.bf16.mxu1 %v11099_v17  ;;  %5227 = vmatpush1.bf16.msra.mxu0 %v11221_v55  ;;  %v12703_v17 = vld [vmem:[#allocation35_spill] sm:$0xff] }
 0x4ad   :  { %5228 = vmatprep.subr.bf16.mxu0 %v11224_v60  ;;  %v11441_v55 = vld [vmem:[#allocation5 + $0x9c] ss:$24 sps:$4 sm:$0xff]   ;;  %v11444_v60 = vld [vmem:[#allocation5 + $0x98] ss:$24 sps:$4 sm:$0xff]  }
 0x4af   :  { %4542 = vmatpush1.bf16.msra.mxu1 %v11102_v32  ;;  %v12704_v32 = vld [vmem:[#allocation13_spill] sm:$0xff] }
 0x4b0   :  { %4543 = vmatprep.subr.bf16.mxu1 %v11105_v13  ;;  %5229 = vmatpush1.bf16.msra.mxu0 %v11227_v63  ;;  %v12705_v13 = vld [vmem:[#allocation62_spill] sm:$0xff] }
 0x4b1   :  { %5230 = vmatprep.subr.bf16.mxu0 %v11231_v24  ;;  %v11447_v63 = vld [vmem:[#allocation5 + $0xcc] ss:$24 sps:$4 sm:$0xff]   ;;  %v11450_v24 = vld [vmem:[#allocation5 + $0xc8] ss:$24 sps:$4 sm:$0xff]  }
 0x4b3   :  { %4544 = vmatpush1.bf16.msra.mxu1 %v11108_v27  ;;  %v12706_v27 = vld [vmem:[#allocation65_spill] sm:$0xff] }
 0x4b4   :  { %4545 = vmatprep.subr.bf16.mxu1 %v11111_v47  ;;  %5231 = vmatpush1.bf16.msra.mxu0 %v11233_v29  ;;  %v12707_v47 = vld [vmem:[#allocation59_spill] sm:$0xff] }
 0x4b5   :  { %5232 = vmatprep.subr.bf16.mxu0 %v11237_v62  ;;  %v11453_v29 = vld [vmem:[#allocation5 + $0xfc] ss:$24 sps:$4 sm:$0xff]   ;;  %v11456_v62 = vld [vmem:[#allocation5 + $0xf8] ss:$24 sps:$4 sm:$0xff]  }
 0x4b7   :  { %4546 = vmatpush1.bf16.msra.mxu1 %v11114_v25  ;;  %v12708_v25 = vld [vmem:[#allocation53_spill] sm:$0xff] }
 0x4b8   :  { %4547 = vmatprep.subr.bf16.mxu1 %v11117_v58  ;;  %5233 = vmatpush1.bf16.msra.mxu0 %v11239_v2  ;;  %v12709_v58 = vld [vmem:[#allocation66_spill] sm:$0xff] }
 0x4b9   :  { %5234 = vmatprep.subr.bf16.mxu0 %v11243_v11  ;;  %v11460_v2 = vld [vmem:[#allocation5 + $0x12c] ss:$24 sps:$4 sm:$0xff]   ;;  %v11462_v11 = vld [vmem:[#allocation5 + $0x128] ss:$24 sps:$4 sm:$0xff]  }
 0x4bb   :  { %4548 = vmatpush1.bf16.msra.mxu1 %v11120_v42  ;;  %v12710_v42 = vld [vmem:[#allocation67_spill] sm:$0xff] }
 0x4bc   :  { %4549 = vmatprep.subr.bf16.mxu1 %v11123_v43  ;;  %5235 = vmatpush1.bf16.msra.mxu0 %v11245_v35  ;;  %v12711_v43 = vld [vmem:[#allocation54_spill] sm:$0xff]  ;;  %v11466_v35 = vld [vmem:[#allocation5 + $0x15c] ss:$24 sps:$4 sm:$0xff]  }
 0x4bd   :  { %5236 = vmatprep.subr.bf16.mxu0 %v11249_v51  ;;  %v11468_v51 = vld [vmem:[#allocation5 + $0x158] ss:$24 sps:$4 sm:$0xff]  }
 0x4bf   :  { %4550 = vmatpush1.bf16.msra.mxu1 %v11126_v52  ;;  %v12712_v52 = vld [vmem:[#allocation63_spill] sm:$0xff] }
 0x4c0   :  { %4551 = vmatprep.subr.bf16.mxu1 %v11129_v44  ;;  %5237 = vmatpush1.bf16.msra.mxu0 %v11251_v16  ;;  %v12713_v44 = vld [vmem:[#allocation68_spill] sm:$0xff]  ;;  %v11472_v16 = vld [vmem:[#allocation5 + $0x18c] ss:$24 sps:$4 sm:$0xff]  }
 0x4c1   :  { %5238 = vmatprep.subr.bf16.mxu0 %v11255_v48  ;;  %v11474_v48 = vld [vmem:[#allocation5 + $0x188] ss:$24 sps:$4 sm:$0xff]  }
 0x4c3   :  { %4552 = vmatpush1.bf16.msra.mxu1 %v11132_v26  ;;  %v12714_v26 = vld [vmem:[#allocation69_spill] sm:$0xff] }
 0x4c4   :  { %4553 = vmatprep.subr.bf16.mxu1 %v11135_v15  ;;  %5239 = vmatpush1.bf16.msra.mxu0 %v11257_v5  ;;  %v12715_v15 = vld [vmem:[#allocation64_spill] sm:$0xff] }
 0x4c5   :  { %5240 = vmatprep.subr.bf16.mxu0 %v11261_v4  ;;  %v11478_v5 = vld [vmem:[#allocation5 + $0x1bc] ss:$24 sps:$4 sm:$0xff]   ;;  %v11480_v4 = vld [vmem:[#allocation5 + $0x1b8] ss:$24 sps:$4 sm:$0xff]  }
 0x4c7   :  { %4554 = vmatpush1.bf16.msra.mxu1 %v11138_v45  ;;  %v12716_v45 = vld [vmem:[#allocation70_spill] sm:$0xff] }
 0x4c8   :  { %4555 = vmatprep.subr.bf16.mxu1 %v11141_v39  ;;  %5241 = vmatpush1.bf16.msra.mxu0 %v11263_v59  ;;  %v12717_v39 = vld [vmem:[#allocation71_spill] sm:$0xff]  ;;  %v11484_v59 = vld [vmem:[#allocation5 + $0x1ec] ss:$24 sps:$4 sm:$0xff]  }
 0x4c9   :  { %5242 = vmatprep.subr.bf16.mxu0 %v11266_v37  ;;  %v11486_v37 = vld [vmem:[#allocation5 + $0x1e8] ss:$24 sps:$4 sm:$0xff]  }
 0x4cb   :  { %4556 = vmatpush1.bf16.msra.mxu1 %v12703_v17  ;;  %v12721_v17 = vld [vmem:[#allocation39_spill] sm:$0xff] }
 0x4cc   :  { %4557 = vmatprep.subr.bf16.mxu1 %v12704_v32  ;;  %5243 = vmatpush1.bf16.msra.mxu0 %v12705_v13 }
 0x4cd   :  { %5244 = vmatprep.subr.bf16.mxu0 %v12706_v27 }
 0x4cf   :  { %4558 = vmatpush1.bf16.msra.mxu1 %v12707_v47  ;;  %v12722_v47 = vld [vmem:[#allocation40_spill] sm:$0xff] }
 0x4d0   :  { %4559 = vmatprep.subr.bf16.mxu1 %v12708_v25  ;;  %5245 = vmatpush1.bf16.msra.mxu0 %v12709_v58  ;;  %v12723_v58 = vld [vmem:[#allocation56_spill] sm:$0xff] }
 0x4d1   :  { %5246 = vmatprep.subr.bf16.mxu0 %v12710_v42 }
 0x4d3   :  { %4560 = vmatpush1.bf16.msra.mxu1 %v12711_v43 }
 0x4d4   :  { %4561 = vmatprep.subr.bf16.mxu1 %v12712_v52  ;;  %5247 = vmatpush1.bf16.msra.mxu0 %v12713_v44  ;;  %v12724_v44 = vld [vmem:[#allocation20_spill] sm:$0xff] }
 0x4d5   :  { %5248 = vmatprep.subr.bf16.mxu0 %v12714_v26 }
 0x4d7   :  { %4562 = vmatpush1.bf16.msra.mxu1 %v12715_v15 }
 0x4d8   :  { %5249 = vmatpush1.bf16.msra.mxu0 %v12716_v45  ;;  %5259 = vmatprep.subr.bf16.mxu1 %v11426_v38 }
 0x4d9   :  { %5300 = vmatprep.subr.bf16.mxu0 %v12717_v39  ;;  %v12725_v39 = vld [vmem:[#allocation22_spill] sm:$0xff] }
 0x4da   :  { %4564 = vmatmul.mubr.bf16.vlgmr.msra.gmra.mrb[40].mxu1 %v11340_v3 }
 0x4db   :  { %5260 = vmatpush1.bf16.msra.mxu1 %v11424_v36 }
 0x4dc   :  { %5261 = vmatprep.subr.bf16.mxu1 %v11428_v41 }
 0x4df   :  { %5262 = vmatpush1.bf16.msra.mxu1 %v11432_v28 }
 0x4e0   :  { %5263 = vmatprep.subr.bf16.mxu1 %v11435_v33 }
 0x4e3   :  { %5264 = vmatpush1.bf16.msra.mxu1 %v11438_v40 }
 0x4e4   :  { %5265 = vmatprep.subr.bf16.mxu1 %v11441_v55 }
 0x4e7   :  { %5266 = vmatpush1.bf16.msra.mxu1 %v11444_v60 }
 0x4e8   :  { %5267 = vmatprep.subr.bf16.mxu1 %v11447_v63 }
 0x4eb   :  { %5268 = vmatpush1.bf16.msra.mxu1 %v11450_v24 }
 0x4ec   :  { %5269 = vmatprep.subr.bf16.mxu1 %v11453_v29 }
 0x4ef   :  { %5270 = vmatpush1.bf16.msra.mxu1 %v11456_v62 }
 0x4f0   :  { %5271 = vmatprep.subr.bf16.mxu1 %v11460_v2 }
 0x4f3   :  { %5272 = vmatpush1.bf16.msra.mxu1 %v11462_v11 }
 0x4f4   :  { %5273 = vmatprep.subr.bf16.mxu1 %v11466_v35 }
 0x4f7   :  { %5274 = vmatpush1.bf16.msra.mxu1 %v11468_v51 }
 0x4f8   :  { %5275 = vmatprep.subr.bf16.mxu1 %v11472_v16 }
 0x4fb   :  { %5276 = vmatpush1.bf16.msra.mxu1 %v11474_v48 }
 0x4fc   :  { %5277 = vmatprep.subr.bf16.mxu1 %v11478_v5 }
 0x4ff   :  { %5278 = vmatpush1.bf16.msra.mxu1 %v11480_v4 }
 0x500   :  { %5279 = vmatprep.subr.bf16.mxu1 %v11484_v59 }
 0x503   :  { %5280 = vmatpush1.bf16.msra.mxu1 %v11486_v37 }
 0x504   :  { %5281 = vmatprep.subr.bf16.mxu1 %v11490_v0 }
 0x507   :  { %5282 = vmatpush1.bf16.msra.mxu1 %v11492_v12 }
 0x508   :  { %5283 = vmatprep.subr.bf16.mxu1 %v11494_v21 }
 0x50b   :  { %5284 = vmatpush1.bf16.msra.mxu1 %v11498_v19 }
 0x50c   :  { %5285 = vmatprep.subr.bf16.mxu1 %v11501_v8 }
 0x50f   :  { %5286 = vmatpush1.bf16.msra.mxu1 %v11504_v10 }
 0x510   :  { %5287 = vmatprep.subr.bf16.mxu1 %v11507_v54 }
 0x513   :  { %5288 = vmatpush1.bf16.msra.mxu1 %v11510_v56 }
 0x514   :  { %5289 = vmatprep.subr.bf16.mxu1 %v11513_v49 }
 0x517   :  { %5290 = vmatpush1.bf16.msra.mxu1 %v11516_v50 }
 0x56d   :  { %v4483_v14 = vpop.f32.mrb[36].mxu1  ;;  %v4524_v3 = vpop.f32.mrb[48].mxu0 }
 0x56e   :  { %v4484_v32 = vadd.f32 %v4483_v14, %v12721_v17  ;;  %v4485_v13 = vpop.f32.mrb[37].mxu1  ;;  %v4526_v27 = vpop.f32.mrb[49].mxu0 }
 0x56f   :  { %v4486_v25 = vadd.f32 %v4485_v13, %v12722_v47  ;;  %v4527_v42 = vadd.f32 %v4526_v27, %v12723_v58  ;;  %v4487_v43 = vpop.f32.mrb[38].mxu1  ;;  %v4528_v52 = vpop.f32.mrb[50].mxu0  ;;  %v4525_v27 = vadd.f32 %v4524_v3, %v12696_v46 }
 0x570   :  { %v4572_v26 = vadd.f32 %v12724_v44, %v4484_v32  ;;  %v4488_v15 = vpop.f32.mrb[39].mxu1  ;;  %v4529_v45 = vpop.f32.mrb[51].mxu0  ;;  %v12727_v32 = vld [vmem:[#allocation21_spill] sm:$0xff] }
 0x571   :  { %v4579_v20 = vadd.f32 %v12725_v39, %v4486_v25  ;;  %v4593_v50 = vadd.f32 %v12726_v61, %v4527_v42  ;;  %v12728_v39 = vld [vmem:[#allocation61_spill] sm:$0xff] }
 0x572   :  { %v8506_v49 = vmul.f32 -1.442695, %v4572_v26 }
 0x573   :  { %v8507_v56 = vmul.f32 -1.442695, %v4579_v20  ;;  %v8508_v25 = vmul.f32 -1.442695, %v4593_v50 }
 0x574   :  { %9957 = vpow2.f32 %v8506_v49 }
 0x575   :  { %9959 = vpow2.f32 %v8507_v56 }
 0x57e   :  { %v9958_v14 = vpop.eup %9957 }
 0x57f   :  { %v4576_v17 = vadd.f32 1.0, %v9958_v14  ;;  %v9960_v13 = vpop.eup %9959 }
 0x580   :  { %v4583_v47 = vadd.f32 1.0, %v9960_v13 }
 0x581   :  { %9961 = vrcp.f32 %v4576_v17 }
 0x582   :  { %9963 = vrcp.f32 %v4583_v47 }
 0x58b   :  { %v9962_v43 = vpop.eup %9961 }
 0x58c   :  { %v4586_v52 = vmul.f32 %v9962_v43, %v4525_v27  ;;  %v9964_v61 = vpop.eup %9963  ;;  %v12729_v27 = vld [vmem:[#allocation49_spill] sm:$0xff] }
 0x58d   :  { %v4589_v42 = vsub.f32 1.0, %v9964_v61  ;;  %v4591_v56 = vmul.f32 %v9964_v61, %v11322_v7 }
 0x58e   :  { %v4587_v44 = vadd.f32 %v12727_v32, %v4586_v52 }
 0x590   :  { %9965 = vtanh.f32 %v4587_v44 }
 0x591   :  { %9967 = vpow2.f32 %v8508_v25  ;;  %v12730_v25 = vld [vmem:[#allocation50_spill] sm:$0xff] }
 0x59a   :  { %v9966_v49 = vpop.eup %9965 }
 0x59b   :  { %v4590_v20 = vmul.f32 %v9966_v49, %v4589_v42  ;;  %v9968_v17 = vpop.eup %9967 }
 0x59c   :  { %v4597_v15 = vadd.f32 1.0, %v9968_v17 }
 0x59d   :  { %v11529_v26 = vadd.f32 %v4591_v56, %v4590_v20 }
 0x59e   :  { %9969 = vrcp.f32 %v4597_v15  ;;  %v11535_v15 = vpop.permute.xlu1 %4618 }
 0x59f   :  { %vm4620_vm0 = vcmp.eq.s32.totalorder %v11535_v15, 1  ;;  %v11825_v15 = vld [vmem:[#allocation5 + $0x74] ss:$24 sps:$4 sm:$0xff]  }
 0x5a8   :  { %v9970_v50 = vpop.eup %9969 }
 0x5ad   :  { %v4565_v3 = vpop.f32.mrb[40].mxu1 }
 0x5ae   :  { %v4566_v45 = vadd.f32 %v4565_v3, %v12699_v6  ;;  %v4567_v47 = vpop.f32.mrb[41].mxu1  ;;  %v11537_v3 = vpop.permute.xlu0 %4626 }
 0x5af   :  { %v4568_v14 = vadd.f32 %v4567_v47, %v12728_v39  ;;  %v4569_v13 = vpop.f32.mrb[42].mxu1  ;;  %vm4628_vm1 = vcmp.eq.s32.totalorder %v11537_v3, 1  ;;  %v11809_v3 = vld [vmem:[#allocation5 + $0x10] ss:$24 sps:$4 sm:$0xff]  }
 0x5b0   :  { %v4600_v43 = vadd.f32 %v12729_v27, %v4566_v45  ;;  %v4570_v52 = vpop.f32.mrb[43].mxu1  ;;  %v11548_v13 = vsel %vm4620_vm0, %v11529_v26, %v11322_v7  ;;  %v11568_v7 = vld [vmem:[#allocation5 + $0x104] ss:$24 sps:$4 sm:$0xff]  }
 0x5b1   :  { %v4607_v32 = vmul.f32 %v9970_v50, %v4568_v14  ;;  %v11601_v52 = vld [vmem:[#allocation5 + $0x1f0] ss:$24 sps:$4 sm:$0xff]  }
 0x5b2   :  { %v8509_v44 = vmul.f32 -1.442695, %v4600_v43  ;;  %v4640_v43 = vpack.c.bf16 %v11548_v13, %v11548_v13 }
 0x5b3   :  { %v4608_v61 = vadd.f32 %v12730_v25, %v4607_v32  ;;  %v11604_v32 = vld [vmem:[#allocation5 + $0x224] ss:$24 sps:$4 sm:$0xff]   ;;  %v11610_v25 = vld [vmem:[#allocation5 + $0x254] ss:$24 sps:$4 sm:$0xff]  }
 0x5b4   :  { %9971 = vpow2.f32 %v8509_v44  ;;  %v11607_v44 = vld [vmem:[#allocation5 + $0x220] ss:$24 sps:$4 sm:$0xff]   ;;  %12732 = vst [vmem:[#allocation51_spill] sm:$0xff] %v11610_v25 }
 0x5b5   :  { %12731 = vst [vmem:[#allocation60_spill] sm:$0xff] %v11607_v44 }
 0x5be   :  { %v9972_v42 = vpop.eup %9971 }
 0x5bf   :  { %v4604_v49 = vadd.f32 1.0, %v9972_v42  ;;  %v11616_v42 = vld [vmem:[#allocation5 + $0x284] ss:$24 sps:$4 sm:$0xff]  }
 0x5c0   :  { %12734 = vst [vmem:[#allocation35_spill] sm:$0xff] %v11616_v42 }
 0x5c1   :  { %9973 = vrcp.f32 %v4604_v49  ;;  %v11619_v49 = vld [vmem:[#allocation5 + $0x280] ss:$24 sps:$4 sm:$0xff]  }
 0x5c2   :  { %9975 = vtanh.f32 %v4608_v61  ;;  %v11613_v61 = vld [vmem:[#allocation5 + $0x250] ss:$24 sps:$4 sm:$0xff]   ;;  %12735 = vst [vmem:[#allocation13_spill] sm:$0xff] %v11619_v49 }
 0x5c3   :  { %12733 = vst [vmem:[#allocation52_spill] sm:$0xff] %v11613_v61 }
 0x5cb   :  { %v9974_v20 = vpop.eup %9973 }
 0x5cc   :  { %v4610_v56 = vsub.f32 1.0, %v9974_v20  ;;  %v9976_v17 = vpop.eup %9975  ;;  %v4612_v45 = vmul.f32 %v9974_v20, %v11329_v53  ;;  %v11622_v20 = vld [vmem:[#allocation5 + $0x2b4] ss:$24 sps:$4 sm:$0xff]  }
 0x5cd   :  { %12736 = vst [vmem:[#allocation62_spill] sm:$0xff] %v11622_v20 }
 0x5ce   :  { %v4611_v47 = vmul.f32 %v9976_v17, %v4610_v56  ;;  %v11625_v56 = vld [vmem:[#allocation5 + $0x2b0] ss:$24 sps:$4 sm:$0xff]   ;;  %v11628_v17 = vld [vmem:[#allocation5 + $0x2e4] ss:$24 sps:$4 sm:$0xff]  }
 0x5cf   :  { %12737 = vst [vmem:[#allocation65_spill] sm:$0xff] %v11625_v56  ;;  %12738 = vst [vmem:[#allocation59_spill] sm:$0xff] %v11628_v17 }
 0x5d0   :  { %v11541_v14 = vadd.f32 %v4612_v45, %v4611_v47  ;;  %v11631_v47 = vld [vmem:[#allocation5 + $0x2e0] ss:$24 sps:$4 sm:$0xff]   ;;  %v11741_v45 = vld [vmem:[#allocation5 + $0x274] ss:$24 sps:$4 sm:$0xff]  }
 0x5d1   :  { %12739 = vst [vmem:[#allocation53_spill] sm:$0xff] %v11631_v47  ;;  %12748 = vst [vmem:[#allocation69_spill] sm:$0xff] %v11741_v45 }
 0x5d2   :  { %v11554_v50 = vsel %vm4628_vm1, %v11541_v14, %v11329_v53  ;;  %v11571_v53 = vld [vmem:[#allocation5 + $0x100] ss:$24 sps:$4 sm:$0xff]  }
 0x5d3   :  { %v4641_v27 = vpack.c.bf16 %v11554_v50, %v11554_v50 }
 0x5d5   :  { %5250 = vmatprep.mubr.bf16.mxu0 %v4641_v27  ;;  %5291 = vmatprep.mubr.bf16.mxu1 %v4641_v27 }
 0x5d6   :  { %5251 = vmatmul.mubr.bf16.vlgmr.msra.gmra.mrb[52].mxu0 %v4640_v43  ;;  %5292 = vmatmul.mubr.bf16.vlgmr.msra.gmra.mrb[44].mxu1 %v4640_v43 }
 0x5d7   :  { %5301 = vmatpush1.bf16.msra.mxu0 %v11336_v31  ;;  %5332 = vmatprep.mubr.bf16.mxu0 %v4641_v27  ;;  %v11574_v31 = vld [vmem:[#allocation5 + $0x134] ss:$24 sps:$4 sm:$0xff]   ;;  %v11744_v27 = vld [vmem:[#allocation5 + $0x270] ss:$24 sps:$4 sm:$0xff]  }
 0x5d8   :  { %5302 = vmatprep.subr.bf16.mxu0 %v11342_v22  ;;  %v11577_v22 = vld [vmem:[#allocation5 + $0x130] ss:$24 sps:$4 sm:$0xff]   ;;  %12749 = vst [vmem:[#allocation64_spill] sm:$0xff] %v11744_v27 }
 0x5db   :  { %5303 = vmatpush1.bf16.msra.mxu0 %v11347_v9  ;;  %v11580_v9 = vld [vmem:[#allocation5 + $0x164] ss:$24 sps:$4 sm:$0xff]  }
 0x5dc   :  { %5304 = vmatprep.subr.bf16.mxu0 %v11350_v23  ;;  %v11583_v23 = vld [vmem:[#allocation5 + $0x160] ss:$24 sps:$4 sm:$0xff]  }
 0x5df   :  { %5305 = vmatpush1.bf16.msra.mxu0 %v11355_v1  ;;  %v11586_v1 = vld [vmem:[#allocation5 + $0x194] ss:$24 sps:$4 sm:$0xff]  }
 0x5e0   :  { %5306 = vmatprep.subr.bf16.mxu0 %v11358_v57  ;;  %v11589_v57 = vld [vmem:[#allocation5 + $0x190] ss:$24 sps:$4 sm:$0xff]  }
 0x5e3   :  { %5307 = vmatpush1.bf16.msra.mxu0 %v11363_v18  ;;  %v11592_v18 = vld [vmem:[#allocation5 + $0x1c4] ss:$24 sps:$4 sm:$0xff]  }
 0x5e4   :  { %5308 = vmatprep.subr.bf16.mxu0 %v11366_v30  ;;  %v11595_v30 = vld [vmem:[#allocation5 + $0x1c0] ss:$24 sps:$4 sm:$0xff]  }
 0x5e7   :  { %5309 = vmatpush1.bf16.msra.mxu0 %v11371_v34  ;;  %v11598_v34 = vld [vmem:[#allocation5 + $0x1f4] ss:$24 sps:$4 sm:$0xff]  }
 0x5e8   :  { %5310 = vmatprep.subr.bf16.mxu0 %v11568_v7 }
 0x5eb   :  { %5311 = vmatpush1.bf16.msra.mxu0 %v11571_v53 }
 0x5ec   :  { %5312 = vmatprep.subr.bf16.mxu0 %v11574_v31 }
 0x5ef   :  { %5313 = vmatpush1.bf16.msra.mxu0 %v11577_v22 }
 0x5f0   :  { %5314 = vmatprep.subr.bf16.mxu0 %v11580_v9 }
 0x5f3   :  { %5315 = vmatpush1.bf16.msra.mxu0 %v11583_v23 }
 0x5f4   :  { %5316 = vmatprep.subr.bf16.mxu0 %v11586_v1 }
 0x5f7   :  { %5317 = vmatpush1.bf16.msra.mxu0 %v11589_v57 }
 0x5f8   :  { %5318 = vmatprep.subr.bf16.mxu0 %v11592_v18 }
 0x5fb   :  { %5319 = vmatpush1.bf16.msra.mxu0 %v11595_v30 }
 0x5fc   :  { %5320 = vmatprep.subr.bf16.mxu0 %v11598_v34 }
 0x5ff   :  { %5321 = vmatpush1.bf16.msra.mxu0 %v11601_v52 }
 0x600   :  { %5322 = vmatprep.subr.bf16.mxu0 %v11604_v32 }
 0x603   :  { %5323 = vmatpush1.bf16.msra.mxu0 %v11607_v44  ;;  %v12759_v44 = vld [vmem:[#allocation23_spill] sm:$0xff] }
 0x604   :  { %5324 = vmatprep.subr.bf16.mxu0 %v11610_v25 }
 0x607   :  { %5325 = vmatpush1.bf16.msra.mxu0 %v11613_v61  ;;  %v12757_v61 = vld [vmem:[#allocation24_spill] sm:$0xff] }
 0x608   :  { %5326 = vmatprep.subr.bf16.mxu0 %v11616_v42 }
 0x60b   :  { %5327 = vmatpush1.bf16.msra.mxu0 %v11619_v49  ;;  %v12756_v49 = vld [vmem:[#allocation40_spill] sm:$0xff] }
 0x60c   :  { %5328 = vmatprep.subr.bf16.mxu0 %v11622_v20 }
 0x60f   :  { %5329 = vmatpush1.bf16.msra.mxu0 %v11625_v56  ;;  %v12755_v56 = vld [vmem:[#allocation39_spill] sm:$0xff] }
 0x610   :  { %5330 = vmatprep.subr.bf16.mxu0 %v11628_v17 }
 0x613   :  { %5331 = vmatpush1.bf16.msra.mxu0 %v11631_v47 }
 0x614   :  { %6014 = vmatprep.subr.bf16.mxu0 %v11426_v38  ;;  %v12740_v38 = vld [vmem:[#allocation31_spill] sm:$0xff] }
 0x616   :  { %5333 = vmatmul.mubr.bf16.vlgmr.msra.gmra.mrb[56].mxu0 %v4640_v43  ;;  %v11747_v43 = vld [vmem:[#allocation5 + $0x2a4] ss:$24 sps:$4 sm:$0xff]  }
 0x617   :  { %6015 = vmatpush1.bf16.msra.mxu0 %v11424_v36  ;;  %v9692_v36 = vld [vmem:[#allocation5 + $0x4] ss:$24 sps:$4 sm:$0xff]   ;;  %12750 = vst [vmem:[#allocation70_spill] sm:$0xff] %v11747_v43 }
 0x618   :  { %6016 = vmatprep.subr.bf16.mxu0 %v11428_v41  ;;  %v11665_v41 = vld [vmem:[#allocation5] ss:$24 sps:$4 sm:$0xff]   ;;  %5973 = vmatprep.subr.bf16.mxu1 %v9692_v36 }
 0x619   :  { %5974 = vmatpush1.bf16.msra.mxu1 %v11665_v41 }
 0x61b   :  { %6017 = vmatpush1.bf16.msra.mxu0 %v11432_v28  ;;  %v12741_v28 = vld [vmem:[#allocation55_spill] sm:$0xff] }
 0x61c   :  { %6018 = vmatprep.subr.bf16.mxu0 %v11435_v33  ;;  %v11669_v33 = vld [vmem:[#allocation5 + $0x34] ss:$24 sps:$4 sm:$0xff]  }
 0x61d   :  { %5975 = vmatprep.subr.bf16.mxu1 %v11669_v33 }
 0x61f   :  { %6019 = vmatpush1.bf16.msra.mxu0 %v11438_v40  ;;  %v12742_v40 = vld [vmem:[#allocation17_spill] sm:$0xff] }
 0x620   :  { %6020 = vmatprep.subr.bf16.mxu0 %v11441_v55  ;;  %v11672_v55 = vld [vmem:[#allocation5 + $0x30] ss:$24 sps:$4 sm:$0xff]  }
 0x621   :  { %5976 = vmatpush1.bf16.msra.mxu1 %v11672_v55 }
 0x623   :  { %6021 = vmatpush1.bf16.msra.mxu0 %v11444_v60  ;;  %v11676_v60 = vld [vmem:[#allocation5 + $0x64] ss:$24 sps:$4 sm:$0xff]  }
 0x624   :  { %6022 = vmatprep.subr.bf16.mxu0 %v11447_v63  ;;  %v11678_v63 = vld [vmem:[#allocation5 + $0x60] ss:$24 sps:$4 sm:$0xff]   ;;  %5977 = vmatprep.subr.bf16.mxu1 %v11676_v60 }
 0x625   :  { %5978 = vmatpush1.bf16.msra.mxu1 %v11678_v63 }
 0x627   :  { %6023 = vmatpush1.bf16.msra.mxu0 %v11450_v24  ;;  %v11682_v24 = vld [vmem:[#allocation5 + $0x90] ss:$24 sps:$4 sm:$0xff]  }
 0x628   :  { %6024 = vmatprep.subr.bf16.mxu0 %v11453_v29  ;;  %v11684_v29 = vld [vmem:[#allocation5 + $0x94] ss:$24 sps:$4 sm:$0xff]  }
 0x629   :  { %5979 = vmatprep.subr.bf16.mxu1 %v11684_v29 }
 0x62a   :  { %5980 = vmatpush1.bf16.msra.mxu1 %v11682_v24 }
 0x62b   :  { %6025 = vmatpush1.bf16.msra.mxu0 %v11456_v62  ;;  %v11686_v62 = vld [vmem:[#allocation5 + $0xc4] ss:$24 sps:$4 sm:$0xff]  }
 0x62c   :  { %6026 = vmatprep.subr.bf16.mxu0 %v11460_v2  ;;  %v11690_v2 = vld [vmem:[#allocation5 + $0xc0] ss:$24 sps:$4 sm:$0xff]   ;;  %5981 = vmatprep.subr.bf16.mxu1 %v11686_v62 }
 0x62e   :  { %5982 = vmatpush1.bf16.msra.mxu1 %v11690_v2 }
 0x62f   :  { %6027 = vmatpush1.bf16.msra.mxu0 %v11462_v11  ;;  %v11693_v11 = vld [vmem:[#allocation5 + $0xf4] ss:$24 sps:$4 sm:$0xff]  }
 0x630   :  { %6028 = vmatprep.subr.bf16.mxu0 %v11466_v35  ;;  %v11696_v35 = vld [vmem:[#allocation5 + $0xf0] ss:$24 sps:$4 sm:$0xff]   ;;  %5983 = vmatprep.subr.bf16.mxu1 %v11693_v11 }
 0x632   :  { %5984 = vmatpush1.bf16.msra.mxu1 %v11696_v35 }
 0x633   :  { %6029 = vmatpush1.bf16.msra.mxu0 %v11468_v51  ;;  %v11700_v51 = vld [vmem:[#allocation5 + $0x124] ss:$24 sps:$4 sm:$0xff]  }
 0x634   :  { %6030 = vmatprep.subr.bf16.mxu0 %v11472_v16  ;;  %v11702_v16 = vld [vmem:[#allocation5 + $0x120] ss:$24 sps:$4 sm:$0xff]   ;;  %5985 = vmatprep.subr.bf16.mxu1 %v11700_v51 }
 0x636   :  { %5986 = vmatpush1.bf16.msra.mxu1 %v11702_v16 }
 0x637   :  { %6031 = vmatpush1.bf16.msra.mxu0 %v11474_v48  ;;  %v11706_v48 = vld [vmem:[#allocation5 + $0x154] ss:$24 sps:$4 sm:$0xff]  }
 0x638   :  { %6032 = vmatprep.subr.bf16.mxu0 %v11478_v5  ;;  %v11708_v5 = vld [vmem:[#allocation5 + $0x150] ss:$24 sps:$4 sm:$0xff]   ;;  %5987 = vmatprep.subr.bf16.mxu1 %v11706_v48 }
 0x63a   :  { %5988 = vmatpush1.bf16.msra.mxu1 %v11708_v5 }
 0x63b   :  { %6033 = vmatpush1.bf16.msra.mxu0 %v11480_v4  ;;  %v11712_v4 = vld [vmem:[#allocation5 + $0x184] ss:$24 sps:$4 sm:$0xff]  }
 0x63c   :  { %6034 = vmatprep.subr.bf16.mxu0 %v11484_v59  ;;  %v11714_v59 = vld [vmem:[#allocation5 + $0x180] ss:$24 sps:$4 sm:$0xff]   ;;  %5989 = vmatprep.subr.bf16.mxu1 %v11712_v4 }
 0x63e   :  { %5990 = vmatpush1.bf16.msra.mxu1 %v11714_v59 }
 0x63f   :  { %6035 = vmatpush1.bf16.msra.mxu0 %v11486_v37  ;;  %v11718_v37 = vld [vmem:[#allocation5 + $0x1b4] ss:$24 sps:$4 sm:$0xff]  }
 0x640   :  { %6036 = vmatprep.subr.bf16.mxu0 %v11490_v0  ;;  %v11720_v0 = vld [vmem:[#allocation5 + $0x1b0] ss:$24 sps:$4 sm:$0xff]   ;;  %5991 = vmatprep.subr.bf16.mxu1 %v11718_v37 }
 0x642   :  { %5992 = vmatpush1.bf16.msra.mxu1 %v11720_v0 }
 0x643   :  { %6037 = vmatpush1.bf16.msra.mxu0 %v11492_v12  ;;  %v11724_v12 = vld [vmem:[#allocation5 + $0x1e4] ss:$24 sps:$4 sm:$0xff]  }
 0x644   :  { %6038 = vmatprep.subr.bf16.mxu0 %v11494_v21  ;;  %v11726_v21 = vld [vmem:[#allocation5 + $0x1e0] ss:$24 sps:$4 sm:$0xff]   ;;  %5993 = vmatprep.subr.bf16.mxu1 %v11724_v12 }
 0x645   :  { %12743 = vst [vmem:[#allocation66_spill] sm:$0xff] %v11726_v21 }
 0x646   :  { %5994 = vmatpush1.bf16.msra.mxu1 %v11726_v21 }
 0x647   :  { %6039 = vmatpush1.bf16.msra.mxu0 %v11498_v19  ;;  %v11730_v19 = vld [vmem:[#allocation5 + $0x214] ss:$24 sps:$4 sm:$0xff]  }
 0x648   :  { %6040 = vmatprep.subr.bf16.mxu0 %v11501_v8  ;;  %12744 = vst [vmem:[#allocation67_spill] sm:$0xff] %v11730_v19  ;;  %v11732_v8 = vld [vmem:[#allocation5 + $0x210] ss:$24 sps:$4 sm:$0xff]   ;;  %5995 = vmatprep.subr.bf16.mxu1 %v11730_v19 }
 0x649   :  { %12745 = vst [vmem:[#allocation54_spill] sm:$0xff] %v11732_v8 }
 0x64a   :  { %5996 = vmatpush1.bf16.msra.mxu1 %v11732_v8  ;;  %v12758_v8 = vld [vmem:[#allocation26_spill] sm:$0xff] }
 0x64b   :  { %6041 = vmatpush1.bf16.msra.mxu0 %v11504_v10  ;;  %v11735_v10 = vld [vmem:[#allocation5 + $0x244] ss:$24 sps:$4 sm:$0xff]  }
 0x64c   :  { %6042 = vmatprep.subr.bf16.mxu0 %v11507_v54  ;;  %12746 = vst [vmem:[#allocation63_spill] sm:$0xff] %v11735_v10  ;;  %v11738_v54 = vld [vmem:[#allocation5 + $0x240] ss:$24 sps:$4 sm:$0xff]   ;;  %5997 = vmatprep.subr.bf16.mxu1 %v11735_v10 }
 0x64d   :  { %12747 = vst [vmem:[#allocation68_spill] sm:$0xff] %v11738_v54 }
 0x64e   :  { %5998 = vmatpush1.bf16.msra.mxu1 %v11738_v54 }
 0x64f   :  { %6043 = vmatpush1.bf16.msra.mxu0 %v12740_v38  ;;  %5999 = vmatprep.subr.bf16.mxu1 %v11741_v45  ;;  %v11753_v38 = vld [vmem:[#allocation5 + $0x2d4] ss:$24 sps:$4 sm:$0xff]  }
 0x650   :  { %6044 = vmatprep.subr.bf16.mxu0 %v12741_v28  ;;  %12752 = vst [vmem:[#allocation56_spill] sm:$0xff] %v11753_v38  ;;  %v11756_v28 = vld [vmem:[#allocation5 + $0x2d0] ss:$24 sps:$4 sm:$0xff]  }
 0x651   :  { %12753 = vst [vmem:[#allocation20_spill] sm:$0xff] %v11756_v28 }
 0x652   :  { %6000 = vmatpush1.bf16.msra.mxu1 %v11744_v27 }
 0x653   :  { %6045 = vmatpush1.bf16.msra.mxu0 %v12742_v40  ;;  %6001 = vmatprep.subr.bf16.mxu1 %v11747_v43  ;;  %v11760_v40 = vld [vmem:[#allocation5 + $0x14] ss:$24 sps:$4 sm:$0xff]  }
 0x654   :  { %6728 = vmatprep.subr.bf16.mxu0 %v9692_v36  ;;  %v11750_v36 = vld [vmem:[#allocation5 + $0x2a0] ss:$24 sps:$4 sm:$0xff]   ;;  %12754 = vst [vmem:[#allocation22_spill] sm:$0xff] %v11760_v40 }
 0x655   :  { %12751 = vst [vmem:[#allocation71_spill] sm:$0xff] %v11750_v36 }
 0x656   :  { %6002 = vmatpush1.bf16.msra.mxu1 %v11750_v36 }
 0x657   :  { %6003 = vmatprep.subr.bf16.mxu1 %v11753_v38 }
 0x65a   :  { %6004 = vmatpush1.bf16.msra.mxu1 %v11756_v28 }
 0x65b   :  { %6055 = vmatprep.subr.bf16.mxu1 %v11760_v40 }
 0x6a9   :  { %v5252_v47 = vpop.f32.mrb[52].mxu0  ;;  %v5293_v17 = vpop.f32.mrb[44].mxu1 }
 0x6aa   :  { %v5253_v27 = vadd.f32 %v5252_v47, %v12755_v56  ;;  %v5254_v20 = vpop.f32.mrb[53].mxu0  ;;  %v5295_v43 = vpop.f32.mrb[45].mxu1 }
 0x6ab   :  { %v5255_v45 = vadd.f32 %v5254_v20, %v12756_v49  ;;  %v5296_v36 = vadd.f32 %v5295_v43, %v12723_v58  ;;  %v5256_v54 = vpop.f32.mrb[54].mxu0  ;;  %v5297_v42 = vpop.f32.mrb[46].mxu1 }
 0x6ac   :  { %v5341_v38 = vadd.f32 %v12757_v61, %v5253_v27  ;;  %v5257_v10 = vpop.f32.mrb[55].mxu0  ;;  %v5298_v28 = vpop.f32.mrb[47].mxu1  ;;  %v5294_v54 = vadd.f32 %v5293_v17, %v12696_v46  ;;  %v12760_v61 = vld [vmem:[#allocation25_spill] sm:$0xff]  ;;  %v11775_v17 = vsel %vm4628_vm1, %v11541_v14, 0.0  ;;  %v12763_v14 = vld [vmem:[#allocation47_spill] sm:$0xff] }
 0x6ad   :  { %v5348_v25 = vadd.f32 %v12758_v8, %v5255_v45  ;;  %v5362_v40 = vadd.f32 %v12759_v44, %v5296_v36  ;;  %12761 = vst [vmem:[#allocation27_spill] sm:$0xff] %v11775_v17 }
 0x6ae   :  { %v8608_v19 = vmul.f32 -1.442695, %v5341_v38 }
 0x6af   :  { %v8609_v21 = vmul.f32 -1.442695, %v5348_v25  ;;  %v8610_v8 = vmul.f32 -1.442695, %v5362_v40 }
 0x6b0   :  { %9977 = vpow2.f32 %v8608_v19 }
 0x6b1   :  { %9979 = vpow2.f32 %v8609_v21 }
 0x6ba   :  { %v9978_v47 = vpop.eup %9977 }
 0x6bb   :  { %v5345_v56 = vadd.f32 1.0, %v9978_v47  ;;  %v9980_v20 = vpop.eup %9979 }
 0x6bc   :  { %v5352_v49 = vadd.f32 1.0, %v9980_v20 }
 0x6bd   :  { %9981 = vrcp.f32 %v5345_v56 }
 0x6be   :  { %9983 = vrcp.f32 %v5352_v49 }
 0x6c7   :  { %v9982_v42 = vpop.eup %9981 }
 0x6c8   :  { %v5355_v43 = vmul.f32 %v9982_v42, %v5294_v54  ;;  %v9984_v44 = vpop.eup %9983 }
 0x6c9   :  { %v5358_v45 = vsub.f32 1.0, %v9984_v44  ;;  %v5360_v21 = vmul.f32 %v9984_v44, %v11548_v13  ;;  %v12764_v44 = vld [vmem:[#allocation48_spill] sm:$0xff] }
 0x6ca   :  { %v5356_v10 = vadd.f32 %v12760_v61, %v5355_v43 }
 0x6cc   :  { %9985 = vtanh.f32 %v5356_v10 }
 0x6cd   :  { %9987 = vpow2.f32 %v8610_v8 }
 0x6d6   :  { %v9986_v19 = vpop.eup %9985 }
 0x6d7   :  { %v5359_v25 = vmul.f32 %v9986_v19, %v5358_v45  ;;  %v9988_v56 = vpop.eup %9987 }
 0x6d8   :  { %v5366_v38 = vadd.f32 1.0, %v9988_v56 }
 0x6d9   :  { %v5361_v27 = vadd.f32 %v5360_v21, %v5359_v25 }
 0x6da   :  { %9989 = vrcp.f32 %v5366_v38 }
 0x6db   :  { %v11779_v49 = vsel %vm4628_vm1, %v5361_v27, 0.0 }
 0x6dc   :  { %12762 = vst [vmem:[#allocation21_spill] sm:$0xff] %v11779_v49  ;;  %v7682_v36 = vadd.f32 %v11779_v49, %v11775_v17  ;;  %v12795_v17 = vld [vmem:[#allocation30_spill] sm:$0xff] }
 0x6de   :  { %7683 = vadd.xlane.f32.xlu1 %v7682_v36 }
 0x6e4   :  { %v9990_v42 = vpop.eup %9989 }
 0x6e9   :  { %v5334_v28 = vpop.f32.mrb[56].mxu0 }
 0x6ea   :  { %v5335_v40 = vadd.f32 %v5334_v28, %v12699_v6  ;;  %v5336_v47 = vpop.f32.mrb[57].mxu0 }
 0x6eb   :  { %v5337_v20 = vadd.f32 %v5336_v47, %v12728_v39  ;;  %v5338_v54 = vpop.f32.mrb[58].mxu0 }
 0x6ec   :  { %v5369_v43 = vadd.f32 %v12763_v14, %v5335_v40  ;;  %v5339_v61 = vpop.f32.mrb[59].mxu0  ;;  %v11791_v40 = vsel %vm4628_vm1, %v5361_v27, %v11548_v13  ;;  %v11815_v27 = vld [vmem:[#allocation5 + $0x44] ss:$24 sps:$4 sm:$0xff]  }
 0x6ed   :  { %v5376_v10 = vmul.f32 %v9990_v42, %v5337_v20  ;;  %v11805_v42 = vsel %vm4620_vm0, %v11529_v26, 0.0  ;;  %v11813_v13 = vpack.c.bf16 %v11791_v40, %v11791_v40  ;;  %v11822_v26 = vld [vmem:[#allocation5 + $0x40] ss:$24 sps:$4 sm:$0xff]   ;;  %v11833_v61 = vld [vmem:[#allocation5 + $0xa4] ss:$24 sps:$4 sm:$0xff]  }
 0x6ee   :  { %v8611_v8 = vmul.f32 -1.442695, %v5369_v43  ;;  %12766 = vst [vmem:[#allocation49_spill] sm:$0xff] %v11805_v42  ;;  %v11830_v43 = vld [vmem:[#allocation5 + $0x70] ss:$24 sps:$4 sm:$0xff]  }
 0x6ef   :  { %v5377_v45 = vadd.f32 %v12764_v44, %v5376_v10  ;;  %v11838_v10 = vld [vmem:[#allocation5 + $0xa0] ss:$24 sps:$4 sm:$0xff]  }
 0x6f0   :  { %9991 = vpow2.f32 %v8611_v8  ;;  %v11928_v8 = vld [vmem:[#allocation5 + $0xfc] ss:$24 sps:$4 sm:$0xff]   ;;  %v11931_v44 = vld [vmem:[#allocation5 + $0xf8] ss:$24 sps:$4 sm:$0xff]  }
 0x6fa   :  { %v9992_v19 = vpop.eup %9991 }
 0x6fb   :  { %v5373_v25 = vadd.f32 1.0, %v9992_v19  ;;  %v11937_v19 = vld [vmem:[#allocation5 + $0x128] ss:$24 sps:$4 sm:$0xff]  }
 0x6fd   :  { %9993 = vrcp.f32 %v5373_v25  ;;  %v11941_v25 = vld [vmem:[#allocation5 + $0x15c] ss:$24 sps:$4 sm:$0xff]  }
 0x6fe   :  { %9995 = vtanh.f32 %v5377_v45  ;;  %v11935_v45 = vld [vmem:[#allocation5 + $0x12c] ss:$24 sps:$4 sm:$0xff]  }
 0x707   :  { %v9994_v21 = vpop.eup %9993 }
 0x708   :  { %v5379_v56 = vsub.f32 1.0, %v9994_v21  ;;  %v9996_v36 = vpop.eup %9995  ;;  %v5381_v28 = vmul.f32 %v9994_v21, %v11554_v50  ;;  %v11943_v21 = vld [vmem:[#allocation5 + $0x158] ss:$24 sps:$4 sm:$0xff]  }
 0x70a   :  { %v5380_v38 = vmul.f32 %v9996_v36, %v5379_v56  ;;  %v11947_v56 = vld [vmem:[#allocation5 + $0x18c] ss:$24 sps:$4 sm:$0xff]   ;;  %v11949_v36 = vld [vmem:[#allocation5 + $0x188] ss:$24 sps:$4 sm:$0xff]  }
 0x70c   :  { %v5382_v47 = vadd.f32 %v5381_v28, %v5380_v38  ;;  %v11953_v38 = vld [vmem:[#allocation5 + $0x1bc] ss:$24 sps:$4 sm:$0xff]   ;;  %v11955_v28 = vld [vmem:[#allocation5 + $0x1b8] ss:$24 sps:$4 sm:$0xff]  }
 0x70e   :  { %v11795_v20 = vsel %vm4620_vm0, %v5382_v47, 0.0  ;;  %v11800_v54 = vsel %vm4620_vm0, %v5382_v47, %v11554_v50  ;;  %v11959_v47 = vld [vmem:[#allocation5 + $0x1ec] ss:$24 sps:$4 sm:$0xff]  }
 0x70f   :  { %12765 = vst [vmem:[#allocation61_spill] sm:$0xff] %v11795_v20  ;;  %v5396_v14 = vpack.c.bf16 %v11800_v54, %v11800_v54  ;;  %v7679_v50 = vadd.f32 %v11795_v20, %v11805_v42 }
 0x711   :  { %6005 = vmatprep.mubr.bf16.mxu1 %v5396_v14  ;;  %6046 = vmatprep.mubr.bf16.mxu0 %v5396_v14 }
 0x712   :  { %6006 = vmatmul.mubr.bf16.vlgmr.msra.gmra.mrb[48].mxu1 %v11813_v13  ;;  %6047 = vmatmul.mubr.bf16.vlgmr.msra.gmra.mrb[60].mxu0 %v11813_v13 }
 0x713   :  { %6056 = vmatpush1.bf16.msra.mxu1 %v11809_v3  ;;  %6087 = vmatprep.mubr.bf16.mxu1 %v5396_v14  ;;  %v11961_v14 = vld [vmem:[#allocation5 + $0x1e8] ss:$24 sps:$4 sm:$0xff]  }
 0x714   :  { %6057 = vmatprep.subr.bf16.mxu1 %v11815_v27  ;;  %7680 = vadd.xlane.f32.xlu0 %v7679_v50  ;;  %v11967_v50 = vld [vmem:[#allocation5 + $0x21c] ss:$24 sps:$4 sm:$0xff]  }
 0x715   :  { %6729 = vmatpush1.bf16.msra.mxu0 %v11665_v41  ;;  %v11841_v41 = vld [vmem:[#allocation5 + $0xd4] ss:$24 sps:$4 sm:$0xff]  }
 0x716   :  { %6730 = vmatprep.subr.bf16.mxu0 %v11669_v33  ;;  %v11846_v33 = vld [vmem:[#allocation5 + $0xd0] ss:$24 sps:$4 sm:$0xff]  }
 0x717   :  { %6058 = vmatpush1.bf16.msra.mxu1 %v11822_v26 }
 0x718   :  { %6059 = vmatprep.subr.bf16.mxu1 %v11825_v15 }
 0x719   :  { %6731 = vmatpush1.bf16.msra.mxu0 %v11672_v55  ;;  %v12780_v55 = vld [vmem:[#allocation70_spill] sm:$0xff] }
 0x71a   :  { %6732 = vmatprep.subr.bf16.mxu0 %v11676_v60  ;;  %v12781_v60 = vld [vmem:[#allocation65_spill] sm:$0xff] }
 0x71b   :  { %6060 = vmatpush1.bf16.msra.mxu1 %v11830_v43 }
 0x71c   :  { %6061 = vmatprep.subr.bf16.mxu1 %v11833_v61 }
 0x71d   :  { %6733 = vmatpush1.bf16.msra.mxu0 %v11678_v63  ;;  %v12782_v63 = vld [vmem:[#allocation59_spill] sm:$0xff] }
 0x71e   :  { %6734 = vmatprep.subr.bf16.mxu0 %v11684_v29  ;;  %v12784_v29 = vld [vmem:[#allocation56_spill] sm:$0xff] }
 0x71f   :  { %6062 = vmatpush1.bf16.msra.mxu1 %v11838_v10 }
 0x720   :  { %6063 = vmatprep.subr.bf16.mxu1 %v11841_v41 }
 0x721   :  { %6735 = vmatpush1.bf16.msra.mxu0 %v11682_v24  ;;  %v12783_v24 = vld [vmem:[#allocation71_spill] sm:$0xff] }
 0x722   :  { %6736 = vmatprep.subr.bf16.mxu0 %v11686_v62  ;;  %v12785_v62 = vld [vmem:[#allocation53_spill] sm:$0xff] }
 0x723   :  { %6064 = vmatpush1.bf16.msra.mxu1 %v11846_v33 }
 0x724   :  { %6065 = vmatprep.subr.bf16.mxu1 %v11568_v7  ;;  %v12767_v7 = vld [vmem:[#allocation66_spill] sm:$0xff] }
 0x725   :  { %6737 = vmatpush1.bf16.msra.mxu0 %v11690_v2  ;;  %v12786_v2 = vld [vmem:[#allocation20_spill] sm:$0xff] }
 0x726   :  { %6738 = vmatprep.subr.bf16.mxu0 %v11693_v11  ;;  %v12787_v11 = vld [vmem:[#allocation22_spill] sm:$0xff] }
 0x727   :  { %6066 = vmatpush1.bf16.msra.mxu1 %v11571_v53  ;;  %v12768_v53 = vld [vmem:[#allocation67_spill] sm:$0xff] }
 0x728   :  { %6067 = vmatprep.subr.bf16.mxu1 %v11574_v31  ;;  %v12769_v31 = vld [vmem:[#allocation60_spill] sm:$0xff] }
 0x729   :  { %6739 = vmatpush1.bf16.msra.mxu0 %v11696_v35  ;;  %v11899_v35 = vld [vmem:[#allocation5 + $0xc] ss:$24 sps:$4 sm:$0xff]  }
 0x72a   :  { %6740 = vmatprep.subr.bf16.mxu0 %v11700_v51  ;;  %v11901_v51 = vld [vmem:[#allocation5 + $0x8] ss:$24 sps:$4 sm:$0xff]  }
 0x72b   :  { %6068 = vmatpush1.bf16.msra.mxu1 %v11577_v22  ;;  %v12770_v22 = vld [vmem:[#allocation51_spill] sm:$0xff] }
 0x72c   :  { %6069 = vmatprep.subr.bf16.mxu1 %v11580_v9  ;;  %v12771_v9 = vld [vmem:[#allocation54_spill] sm:$0xff] }
 0x72d   :  { %6741 = vmatpush1.bf16.msra.mxu0 %v11702_v16  ;;  %v11905_v16 = vld [vmem:[#allocation5 + $0x3c] ss:$24 sps:$4 sm:$0xff]  }
 0x72e   :  { %6742 = vmatprep.subr.bf16.mxu0 %v11706_v48  ;;  %v11907_v48 = vld [vmem:[#allocation5 + $0x38] ss:$24 sps:$4 sm:$0xff]  }
 0x72f   :  { %6070 = vmatpush1.bf16.msra.mxu1 %v11583_v23  ;;  %v12772_v23 = vld [vmem:[#allocation63_spill] sm:$0xff] }
 0x730   :  { %6071 = vmatprep.subr.bf16.mxu1 %v11586_v1  ;;  %v12773_v1 = vld [vmem:[#allocation52_spill] sm:$0xff] }
 0x731   :  { %6743 = vmatpush1.bf16.msra.mxu0 %v11708_v5  ;;  %v11911_v5 = vld [vmem:[#allocation5 + $0x6c] ss:$24 sps:$4 sm:$0xff]  }
 0x732   :  { %6744 = vmatprep.subr.bf16.mxu0 %v11712_v4  ;;  %v11913_v4 = vld [vmem:[#allocation5 + $0x68] ss:$24 sps:$4 sm:$0xff]  }
 0x733   :  { %6072 = vmatpush1.bf16.msra.mxu1 %v11589_v57  ;;  %v12774_v57 = vld [vmem:[#allocation35_spill] sm:$0xff] }
 0x734   :  { %6073 = vmatprep.subr.bf16.mxu1 %v11592_v18  ;;  %v12775_v18 = vld [vmem:[#allocation68_spill] sm:$0xff] }
 0x735   :  { %6745 = vmatpush1.bf16.msra.mxu0 %v11714_v59  ;;  %v11915_v59 = vld [vmem:[#allocation5 + $0x9c] ss:$24 sps:$4 sm:$0xff]  }
 0x736   :  { %6746 = vmatprep.subr.bf16.mxu0 %v11718_v37  ;;  %v11919_v37 = vld [vmem:[#allocation5 + $0x98] ss:$24 sps:$4 sm:$0xff]  }
 0x737   :  { %6074 = vmatpush1.bf16.msra.mxu1 %v11595_v30  ;;  %v12776_v30 = vld [vmem:[#allocation69_spill] sm:$0xff] }
 0x738   :  { %6075 = vmatprep.subr.bf16.mxu1 %v11598_v34  ;;  %v12777_v34 = vld [vmem:[#allocation13_spill] sm:$0xff] }
 0x739   :  { %6747 = vmatpush1.bf16.msra.mxu0 %v11720_v0  ;;  %v11922_v0 = vld [vmem:[#allocation5 + $0xcc] ss:$24 sps:$4 sm:$0xff]  }
 0x73a   :  { %6748 = vmatprep.subr.bf16.mxu0 %v11724_v12  ;;  %v11925_v12 = vld [vmem:[#allocation5 + $0xc8] ss:$24 sps:$4 sm:$0xff]  }
 0x73b   :  { %6076 = vmatpush1.bf16.msra.mxu1 %v11601_v52  ;;  %v12778_v52 = vld [vmem:[#allocation62_spill] sm:$0xff] }
 0x73c   :  { %6077 = vmatprep.subr.bf16.mxu1 %v11604_v32  ;;  %v12779_v32 = vld [vmem:[#allocation64_spill] sm:$0xff] }
 0x73d   :  { %6749 = vmatpush1.bf16.msra.mxu0 %v12767_v7  ;;  %v11969_v7 = vld [vmem:[#allocation5 + $0x24c] ss:$24 sps:$4 sm:$0xff]  }
 0x73e   :  { %6750 = vmatprep.subr.bf16.mxu0 %v12768_v53  ;;  %v11973_v53 = vld [vmem:[#allocation5 + $0x248] ss:$24 sps:$4 sm:$0xff]  }
 0x73f   :  { %6078 = vmatpush1.bf16.msra.mxu1 %v12769_v31  ;;  %v11976_v31 = vld [vmem:[#allocation5 + $0x27c] ss:$24 sps:$4 sm:$0xff]  }
 0x740   :  { %6079 = vmatprep.subr.bf16.mxu1 %v12770_v22  ;;  %v11979_v22 = vld [vmem:[#allocation5 + $0x278] ss:$24 sps:$4 sm:$0xff]  }
 0x741   :  { %6751 = vmatpush1.bf16.msra.mxu0 %v12771_v9  ;;  %v11982_v9 = vld [vmem:[#allocation5 + $0x2ac] ss:$24 sps:$4 sm:$0xff]  }
 0x742   :  { %6752 = vmatprep.subr.bf16.mxu0 %v12772_v23  ;;  %12788 = vst [vmem:[#allocation50_spill] sm:$0xff] %v11982_v9  ;;  %v11985_v23 = vld [vmem:[#allocation5 + $0x2a8] ss:$24 sps:$4 sm:$0xff]  }
 0x743   :  { %6080 = vmatpush1.bf16.msra.mxu1 %v12773_v1  ;;  %12789 = vst [vmem:[#allocation31_spill] sm:$0xff] %v11985_v23  ;;  %v11988_v1 = vld [vmem:[#allocation5 + $0x2dc] ss:$24 sps:$4 sm:$0xff]  }
 0x744   :  { %6081 = vmatprep.subr.bf16.mxu1 %v12774_v57  ;;  %12790 = vst [vmem:[#allocation55_spill] sm:$0xff] %v11988_v1  ;;  %v11991_v57 = vld [vmem:[#allocation5 + $0x2d8] ss:$24 sps:$4 sm:$0xff]  }
 0x745   :  { %6753 = vmatpush1.bf16.msra.mxu0 %v12775_v18  ;;  %12791 = vst [vmem:[#allocation17_spill] sm:$0xff] %v11991_v57 }
 0x746   :  { %6754 = vmatprep.subr.bf16.mxu0 %v12776_v30 }
 0x747   :  { %6082 = vmatpush1.bf16.msra.mxu1 %v12777_v34  ;;  %v12792_v34 = vld [vmem:[#allocation39_spill] sm:$0xff] }
 0x748   :  { %6083 = vmatprep.subr.bf16.mxu1 %v12778_v52 }
 0x749   :  { %6755 = vmatpush1.bf16.msra.mxu0 %v12779_v32 }
 0x74a   :  { %6756 = vmatprep.subr.bf16.mxu0 %v12780_v55 }
 0x74b   :  { %6084 = vmatpush1.bf16.msra.mxu1 %v12781_v60  ;;  %v12793_v60 = vld [vmem:[#allocation40_spill] sm:$0xff] }
 0x74c   :  { %6085 = vmatprep.subr.bf16.mxu1 %v12782_v63 }
 0x74d   :  { %6757 = vmatpush1.bf16.msra.mxu0 %v12783_v24 }
 0x74e   :  { %6758 = vmatprep.subr.bf16.mxu0 %v12784_v29 }
 0x74f   :  { %6086 = vmatpush1.bf16.msra.mxu1 %v12785_v62 }
 0x750   :  { %6769 = vmatprep.subr.bf16.mxu1 %v11899_v35 }
 0x751   :  { %6759 = vmatpush1.bf16.msra.mxu0 %v12786_v2  ;;  %v12794_v2 = vld [vmem:[#allocation28_spill] sm:$0xff] }
 0x752   :  { %6088 = vmatmul.mubr.bf16.vlgmr.msra.gmra.mrb[52].mxu1 %v11813_v13  ;;  %6810 = vmatprep.subr.bf16.mxu0 %v12787_v11  ;;  %v11965_v13 = vld [vmem:[#allocation5 + $0x218] ss:$24 sps:$4 sm:$0xff]  }
 0x753   :  { %6770 = vmatpush1.bf16.msra.mxu1 %v11901_v51 }
 0x754   :  { %6771 = vmatprep.subr.bf16.mxu1 %v11905_v16 }
 0x757   :  { %6772 = vmatpush1.bf16.msra.mxu1 %v11907_v48 }
 0x758   :  { %6773 = vmatprep.subr.bf16.mxu1 %v11911_v5 }
 0x75b   :  { %6774 = vmatpush1.bf16.msra.mxu1 %v11913_v4 }
 0x75c   :  { %6775 = vmatprep.subr.bf16.mxu1 %v11915_v59 }
 0x75f   :  { %6776 = vmatpush1.bf16.msra.mxu1 %v11919_v37 }
 0x760   :  { %6777 = vmatprep.subr.bf16.mxu1 %v11922_v0 }
 0x763   :  { %6778 = vmatpush1.bf16.msra.mxu1 %v11925_v12 }
 0x764   :  { %6779 = vmatprep.subr.bf16.mxu1 %v11928_v8 }
 0x767   :  { %6780 = vmatpush1.bf16.msra.mxu1 %v11931_v44 }
 0x768   :  { %6781 = vmatprep.subr.bf16.mxu1 %v11935_v45 }
 0x76b   :  { %6782 = vmatpush1.bf16.msra.mxu1 %v11937_v19 }
 0x76c   :  { %6783 = vmatprep.subr.bf16.mxu1 %v11941_v25 }
 0x76f   :  { %6784 = vmatpush1.bf16.msra.mxu1 %v11943_v21 }
 0x770   :  { %6785 = vmatprep.subr.bf16.mxu1 %v11947_v56 }
 0x773   :  { %6786 = vmatpush1.bf16.msra.mxu1 %v11949_v36 }
 0x774   :  { %6787 = vmatprep.subr.bf16.mxu1 %v11953_v38 }
 0x777   :  { %6788 = vmatpush1.bf16.msra.mxu1 %v11955_v28 }
 0x778   :  { %6789 = vmatprep.subr.bf16.mxu1 %v11959_v47 }
 0x77b   :  { %6790 = vmatpush1.bf16.msra.mxu1 %v11961_v14 }
 0x77c   :  { %6791 = vmatprep.subr.bf16.mxu1 %v11967_v50 }
 0x77f   :  { %6792 = vmatpush1.bf16.msra.mxu1 %v11965_v13 }
 0x780   :  { %6793 = vmatprep.subr.bf16.mxu1 %v11969_v7 }
 0x783   :  { %6794 = vmatpush1.bf16.msra.mxu1 %v11973_v53 }
 0x784   :  { %6795 = vmatprep.subr.bf16.mxu1 %v11976_v31 }
 0x787   :  { %6796 = vmatpush1.bf16.msra.mxu1 %v11979_v22 }
 0x788   :  { %6797 = vmatprep.subr.bf16.mxu1 %v11982_v9 }
 0x78b   :  { %6798 = vmatpush1.bf16.msra.mxu1 %v11985_v23 }
 0x78c   :  { %6799 = vmatprep.subr.bf16.mxu1 %v11988_v1  ;;  %v12796_v1 = vld [vmem:[#allocation19_spill] sm:$0xff] }
 0x78f   :  { %6800 = vmatpush1.bf16.msra.mxu1 %v11991_v57 }
 0x7e5   :  { %v6007_v18 = vpop.f32.mrb[48].mxu1  ;;  %v6048_v30 = vpop.f32.mrb[60].mxu0 }
 0x7e6   :  { %v6008_v52 = vadd.f32 %v6007_v18, %v12792_v34  ;;  %v6009_v32 = vpop.f32.mrb[49].mxu1  ;;  %v6050_v55 = vpop.f32.mrb[61].mxu0 }
 0x7e7   :  { %v6010_v63 = vadd.f32 %v6009_v32, %v12793_v60  ;;  %v6051_v24 = vadd.f32 %v6050_v55, %v12723_v58  ;;  %v6011_v29 = vpop.f32.mrb[50].mxu1  ;;  %v6052_v62 = vpop.f32.mrb[62].mxu0  ;;  %v6049_v55 = vadd.f32 %v6048_v30, %v12696_v46  ;;  %v12011_v30 = vld [vmem:[%s12512_s10 + $0x58] sm:$0xff] }
 0x7e8   :  { %v6096_v11 = vadd.f32 %v12794_v2, %v6008_v52  ;;  %v6012_v20 = vpop.f32.mrb[51].mxu1  ;;  %v6053_v42 = vpop.f32.mrb[63].mxu0  ;;  %12799 = vst [vmem:[#allocation24_spill] sm:$0xff] %v12011_v30 }
 0x7e9   :  { %v6103_v49 = vadd.f32 %v12795_v17, %v6010_v63  ;;  %v6117_v57 = vadd.f32 %v12796_v1, %v6051_v24  ;;  %v12797_v20 = vld [vmem:[#allocation29_spill] sm:$0xff]  ;;  %v12083_v24 = vld [vmem:[#allocation5 + $0x1f4] ss:$24 sps:$4 sm:$0xff]  }
 0x7ea   :  { %v8710_v23 = vmul.f32 -1.442695, %v6096_v11 }
 0x7eb   :  { %v8711_v9 = vmul.f32 -1.442695, %v6103_v49  ;;  %v8712_v17 = vmul.f32 -1.442695, %v6117_v57 }
 0x7ec   :  { %9997 = vpow2.f32 %v8710_v23 }
 0x7ed   :  { %9999 = vpow2.f32 %v8711_v9 }
 0x7f6   :  { %v9998_v18 = vpop.eup %9997 }
 0x7f7   :  { %v6100_v34 = vadd.f32 1.0, %v9998_v18  ;;  %v10000_v32 = vpop.eup %9999 }
 0x7f8   :  { %v6107_v60 = vadd.f32 1.0, %v10000_v32 }
 0x7f9   :  { %10001 = vrcp.f32 %v6100_v34 }
 0x7fa   :  { %10003 = vrcp.f32 %v6107_v60 }
 0x803   :  { %v10002_v29 = vpop.eup %10001 }
 0x804   :  { %v6110_v62 = vmul.f32 %v10002_v29, %v6049_v55  ;;  %v10004_v1 = vpop.eup %10003 }
 0x805   :  { %v6113_v52 = vsub.f32 1.0, %v10004_v1  ;;  %v6115_v9 = vmul.f32 %v10004_v1, %v11791_v40 }
 0x806   :  { %v6111_v42 = vadd.f32 %v12797_v20, %v6110_v62  ;;  %v12800_v20 = vld [vmem:[#allocation45_spill] sm:$0xff] }
 0x808   :  { %10005 = vtanh.f32 %v6111_v42 }
 0x809   :  { %10007 = vpow2.f32 %v8712_v17 }
 0x812   :  { %v10006_v23 = vpop.eup %10005 }
 0x813   :  { %v6114_v49 = vmul.f32 %v10006_v23, %v6113_v52  ;;  %v10008_v34 = vpop.eup %10007  ;;  %v12801_v23 = vld [vmem:[#allocation46_spill] sm:$0xff] }
 0x814   :  { %v6121_v60 = vadd.f32 1.0, %v10008_v34 }
 0x815   :  { %v6116_v63 = vadd.f32 %v6115_v9, %v6114_v49 }
 0x816   :  { %10009 = vrcp.f32 %v6121_v60 }
 0x817   :  { %v12006_v2 = vsel %vm3859_vm15, %v6116_v63, 0.0 }
 0x818   :  { %v7685_v57 = vadd.f32 %v12011_v30, %v12006_v2 }
 0x81a   :  { %7686 = vadd.xlane.f32.xlu0 %v7685_v57 }
 0x820   :  { %v10010_v62 = vpop.eup %10009 }
 0x825   :  { %v6089_v11 = vpop.f32.mrb[52].mxu1 }
 0x826   :  { %v6090_v18 = vadd.f32 %v6089_v11, %v12699_v6  ;;  %v6091_v32 = vpop.f32.mrb[53].mxu1 }
 0x827   :  { %v6092_v55 = vadd.f32 %v6091_v32, %v12728_v39  ;;  %v6093_v29 = vpop.f32.mrb[54].mxu1 }
 0x828   :  { %v6124_v42 = vadd.f32 %v12800_v20, %v6090_v18  ;;  %v6094_v17 = vpop.f32.mrb[55].mxu1  ;;  %v12023_v18 = vsel %vm3859_vm15, %v6116_v63, %v11791_v40 }
 0x829   :  { %v6131_v1 = vmul.f32 %v10010_v62, %v6092_v55  ;;  %v6150_v40 = vpack.c.bf16 %v12023_v18, %v12023_v18  ;;  %v12086_v17 = vld [vmem:[#allocation5 + $0x1f0] ss:$24 sps:$4 sm:$0xff]   ;;  %v9870_v55 = vld [vmem:[#allocation5 + $0x240] ss:$24 sps:$4 sm:$0xff]  }
 0x82a   :  { %v8713_v52 = vmul.f32 -1.442695, %v6124_v42 }
 0x82b   :  { %v6132_v49 = vadd.f32 %v12801_v23, %v6131_v1  ;;  %v12089_v1 = vld [vmem:[#allocation5 + $0x224] ss:$24 sps:$4 sm:$0xff]   ;;  %v12095_v23 = vld [vmem:[#allocation5 + $0x254] ss:$24 sps:$4 sm:$0xff]  }
 0x82c   :  { %10011 = vpow2.f32 %v8713_v52  ;;  %v12092_v52 = vld [vmem:[#allocation5 + $0x220] ss:$24 sps:$4 sm:$0xff]  }
 0x836   :  { %v10012_v9 = vpop.eup %10011 }
 0x837   :  { %v6128_v34 = vadd.f32 1.0, %v10012_v9  ;;  %v12101_v9 = vld [vmem:[#allocation5 + $0x284] ss:$24 sps:$4 sm:$0xff]  }
 0x839   :  { %10013 = vrcp.f32 %v6128_v34  ;;  %v12104_v34 = vld [vmem:[#allocation5 + $0x280] ss:$24 sps:$4 sm:$0xff]  }
 0x83a   :  { %10015 = vtanh.f32 %v6132_v49  ;;  %v12098_v49 = vld [vmem:[#allocation5 + $0x250] ss:$24 sps:$4 sm:$0xff]  }
 0x843   :  { %v10014_v57 = vpop.eup %10013 }
 0x844   :  { %v6134_v60 = vsub.f32 1.0, %v10014_v57  ;;  %v10016_v11 = vpop.eup %10015  ;;  %v6136_v32 = vmul.f32 %v10014_v57, %v11800_v54  ;;  %v12107_v57 = vld [vmem:[#allocation5 + $0x2b4] ss:$24 sps:$4 sm:$0xff]  }
 0x846   :  { %v6135_v30 = vmul.f32 %v10016_v11, %v6134_v60  ;;  %v12110_v60 = vld [vmem:[#allocation5 + $0x2b0] ss:$24 sps:$4 sm:$0xff]   ;;  %v12113_v11 = vld [vmem:[#allocation5 + $0x2e4] ss:$24 sps:$4 sm:$0xff]  }
 0x848   :  { %v6137_v29 = vadd.f32 %v6136_v32, %v6135_v30  ;;  %v12039_v30 = vld [vmem:[%s12512_s10 + $0x20] sm:$0xff] }
 0x849   :  { %v12116_v32 = vld [vmem:[#allocation5 + $0x2e0] ss:$24 sps:$4 sm:$0xff]  }
 0x84a   :  { %v12027_v62 = vsel %vm3851_vm14, %v6137_v29, 0.0  ;;  %v12032_v20 = vsel %vm3851_vm14, %v6137_v29, %v11800_v54  ;;  %v12053_v54 = vld [vmem:[#allocation5 + $0x104] ss:$24 sps:$4 sm:$0xff]  }
 0x84b   :  { %v6151_v42 = vpack.c.bf16 %v12032_v20, %v12032_v20  ;;  %v7676_v63 = vadd.f32 %v12039_v30, %v12027_v62  ;;  %v9872_v29 = vld [vmem:[#allocation5 + $0x244] ss:$24 sps:$4 sm:$0xff]  }
 0x84d   :  { %6760 = vmatprep.mubr.bf16.mxu0 %v6151_v42  ;;  %6801 = vmatprep.mubr.bf16.mxu1 %v6151_v42 }
 0x84e   :  { %6761 = vmatmul.mubr.bf16.vlgmr.msra.gmra.mrb[64].mxu0 %v6150_v40  ;;  %6802 = vmatmul.mubr.bf16.vlgmr.msra.gmra.mrb[56].mxu1 %v6150_v40 }
 0x84f   :  { %6811 = vmatpush1.bf16.msra.mxu0 %v11809_v3  ;;  %6842 = vmatprep.mubr.bf16.mxu0 %v6151_v42  ;;  %v12056_v3 = vld [vmem:[#allocation5 + $0x100] ss:$24 sps:$4 sm:$0xff]   ;;  %v9875_v42 = vld [vmem:[#allocation5 + $0x274] ss:$24 sps:$4 sm:$0xff]  }
 0x850   :  { %6812 = vmatprep.subr.bf16.mxu0 %v11815_v27  ;;  %7677 = vadd.xlane.f32.xlu0 %v7676_v63  ;;  %v12059_v27 = vld [vmem:[#allocation5 + $0x134] ss:$24 sps:$4 sm:$0xff]   ;;  %v9878_v63 = vld [vmem:[#allocation5 + $0x2a4] ss:$24 sps:$4 sm:$0xff]  }
 0x853   :  { %6813 = vmatpush1.bf16.msra.mxu0 %v11822_v26  ;;  %v12062_v26 = vld [vmem:[#allocation5 + $0x130] ss:$24 sps:$4 sm:$0xff]  }
 0x854   :  { %6814 = vmatprep.subr.bf16.mxu0 %v11825_v15  ;;  %v12065_v15 = vld [vmem:[#allocation5 + $0x164] ss:$24 sps:$4 sm:$0xff]  }
 0x857   :  { %6815 = vmatpush1.bf16.msra.mxu0 %v11830_v43  ;;  %v12068_v43 = vld [vmem:[#allocation5 + $0x160] ss:$24 sps:$4 sm:$0xff]  }
 0x858   :  { %6816 = vmatprep.subr.bf16.mxu0 %v11833_v61  ;;  %v12071_v61 = vld [vmem:[#allocation5 + $0x194] ss:$24 sps:$4 sm:$0xff]  }
 0x85b   :  { %6817 = vmatpush1.bf16.msra.mxu0 %v11838_v10  ;;  %v12074_v10 = vld [vmem:[#allocation5 + $0x190] ss:$24 sps:$4 sm:$0xff]  }
 0x85c   :  { %6818 = vmatprep.subr.bf16.mxu0 %v11841_v41  ;;  %v12077_v41 = vld [vmem:[#allocation5 + $0x1c4] ss:$24 sps:$4 sm:$0xff]  }
 0x85f   :  { %6819 = vmatpush1.bf16.msra.mxu0 %v11846_v33  ;;  %v12080_v33 = vld [vmem:[#allocation5 + $0x1c0] ss:$24 sps:$4 sm:$0xff]  }
 0x860   :  { %6820 = vmatprep.subr.bf16.mxu0 %v12053_v54 }
 0x863   :  { %6821 = vmatpush1.bf16.msra.mxu0 %v12056_v3 }
 0x864   :  { %6822 = vmatprep.subr.bf16.mxu0 %v12059_v27 }
 0x867   :  { %6823 = vmatpush1.bf16.msra.mxu0 %v12062_v26 }
 0x868   :  { %6824 = vmatprep.subr.bf16.mxu0 %v12065_v15 }
 0x86b   :  { %6825 = vmatpush1.bf16.msra.mxu0 %v12068_v43 }
 0x86c   :  { %6826 = vmatprep.subr.bf16.mxu0 %v12071_v61 }
 0x86f   :  { %6827 = vmatpush1.bf16.msra.mxu0 %v12074_v10 }
 0x870   :  { %6828 = vmatprep.subr.bf16.mxu0 %v12077_v41 }
 0x873   :  { %6829 = vmatpush1.bf16.msra.mxu0 %v12080_v33 }
 0x874   :  { %6830 = vmatprep.subr.bf16.mxu0 %v12083_v24 }
 0x877   :  { %6831 = vmatpush1.bf16.msra.mxu0 %v12086_v17 }
 0x878   :  { %6832 = vmatprep.subr.bf16.mxu0 %v12089_v1 }
 0x87b   :  { %6833 = vmatpush1.bf16.msra.mxu0 %v12092_v52 }
 0x87c   :  { %6834 = vmatprep.subr.bf16.mxu0 %v12095_v23 }
 0x87f   :  { %6835 = vmatpush1.bf16.msra.mxu0 %v12098_v49 }
 0x880   :  { %6836 = vmatprep.subr.bf16.mxu0 %v12101_v9 }
 0x883   :  { %6837 = vmatpush1.bf16.msra.mxu0 %v12104_v34 }
 0x884   :  { %6838 = vmatprep.subr.bf16.mxu0 %v12107_v57 }
 0x887   :  { %6839 = vmatpush1.bf16.msra.mxu0 %v12110_v60 }
 0x888   :  { %6840 = vmatprep.subr.bf16.mxu0 %v12113_v11 }
 0x88b   :  { %6841 = vmatpush1.bf16.msra.mxu0 %v12116_v32 }
 0x88c   :  { %7524 = vmatprep.subr.bf16.mxu0 %v11899_v35  ;;  %v12803_v35 = vld [vmem:[#allocation50_spill] sm:$0xff] }
 0x88e   :  { %6843 = vmatmul.mubr.bf16.vlgmr.msra.gmra.mrb[68].mxu0 %v6150_v40  ;;  %v9873_v40 = vld [vmem:[#allocation5 + $0x270] ss:$24 sps:$4 sm:$0xff]  }
 0x88f   :  { %7525 = vmatpush1.bf16.msra.mxu0 %v11901_v51  ;;  %v12804_v51 = vld [vmem:[#allocation31_spill] sm:$0xff] }
 0x890   :  { %7526 = vmatprep.subr.bf16.mxu0 %v11905_v16  ;;  %v12805_v16 = vld [vmem:[#allocation55_spill] sm:$0xff] }
 0x893   :  { %7527 = vmatpush1.bf16.msra.mxu0 %v11907_v48  ;;  %v9836_v48 = vld [vmem:[#allocation5 + $0x4] ss:$24 sps:$4 sm:$0xff]  }
 0x894   :  { %7528 = vmatprep.subr.bf16.mxu0 %v11911_v5  ;;  %v9834_v5 = vld [vmem:[#allocation5] ss:$24 sps:$4 sm:$0xff]   ;;  %7483 = vmatprep.subr.bf16.mxu1 %v9836_v48  ;;  %v9884_v48 = vld [vmem:[#allocation5 + $0x14] ss:$24 sps:$4 sm:$0xff]  }
 0x895   :  { %7484 = vmatpush1.bf16.msra.mxu1 %v9834_v5 }
 0x897   :  { %7529 = vmatpush1.bf16.msra.mxu0 %v11913_v4  ;;  %v12806_v4 = vld [vmem:[#allocation17_spill] sm:$0xff] }
 0x898   :  { %7530 = vmatprep.subr.bf16.mxu0 %v11915_v59  ;;  %v9839_v59 = vld [vmem:[#allocation5 + $0x34] ss:$24 sps:$4 sm:$0xff]  }
 0x899   :  { %7485 = vmatprep.subr.bf16.mxu1 %v9839_v59  ;;  %v12807_v59 = vld [vmem:[#allocation39_spill] sm:$0xff] }
 0x89b   :  { %7531 = vmatpush1.bf16.msra.mxu0 %v11919_v37  ;;  %v9837_v37 = vld [vmem:[#allocation5 + $0x30] ss:$24 sps:$4 sm:$0xff]  }
 0x89c   :  { %7532 = vmatprep.subr.bf16.mxu0 %v11922_v0  ;;  %7486 = vmatpush1.bf16.msra.mxu1 %v9837_v37  ;;  %v9842_v0 = vld [vmem:[#allocation5 + $0x64] ss:$24 sps:$4 sm:$0xff]  }
 0x89d   :  { %7487 = vmatprep.subr.bf16.mxu1 %v9842_v0 }
 0x89f   :  { %7533 = vmatpush1.bf16.msra.mxu0 %v11925_v12  ;;  %v9840_v12 = vld [vmem:[#allocation5 + $0x60] ss:$24 sps:$4 sm:$0xff]  }
 0x8a0   :  { %7534 = vmatprep.subr.bf16.mxu0 %v11928_v8  ;;  %v9845_v8 = vld [vmem:[#allocation5 + $0x94] ss:$24 sps:$4 sm:$0xff]   ;;  %7488 = vmatpush1.bf16.msra.mxu1 %v9840_v12 }
 0x8a1   :  { %7489 = vmatprep.subr.bf16.mxu1 %v9845_v8  ;;  %v12808_v8 = vld [vmem:[#allocation40_spill] sm:$0xff] }
 0x8a3   :  { %7535 = vmatpush1.bf16.msra.mxu0 %v11931_v44  ;;  %v9843_v44 = vld [vmem:[#allocation5 + $0x90] ss:$24 sps:$4 sm:$0xff]  }
 0x8a4   :  { %7536 = vmatprep.subr.bf16.mxu0 %v11935_v45  ;;  %v9848_v45 = vld [vmem:[#allocation5 + $0xc4] ss:$24 sps:$4 sm:$0xff]   ;;  %7490 = vmatpush1.bf16.msra.mxu1 %v9843_v44 }
 0x8a5   :  { %7491 = vmatprep.subr.bf16.mxu1 %v9848_v45 }
 0x8a7   :  { %7537 = vmatpush1.bf16.msra.mxu0 %v11937_v19  ;;  %v9846_v19 = vld [vmem:[#allocation5 + $0xc0] ss:$24 sps:$4 sm:$0xff]  }
 0x8a8   :  { %7538 = vmatprep.subr.bf16.mxu0 %v11941_v25  ;;  %v9851_v25 = vld [vmem:[#allocation5 + $0xf4] ss:$24 sps:$4 sm:$0xff]   ;;  %7492 = vmatpush1.bf16.msra.mxu1 %v9846_v19 }
 0x8a9   :  { %7493 = vmatprep.subr.bf16.mxu1 %v9851_v25 }
 0x8ab   :  { %7539 = vmatpush1.bf16.msra.mxu0 %v11943_v21  ;;  %v9849_v21 = vld [vmem:[#allocation5 + $0xf0] ss:$24 sps:$4 sm:$0xff]  }
 0x8ac   :  { %7540 = vmatprep.subr.bf16.mxu0 %v11947_v56  ;;  %7494 = vmatpush1.bf16.msra.mxu1 %v9849_v21  ;;  %v9854_v56 = vld [vmem:[#allocation5 + $0x124] ss:$24 sps:$4 sm:$0xff]  }
 0x8ad   :  { %7495 = vmatprep.subr.bf16.mxu1 %v9854_v56  ;;  %v12809_v21 = vld [vmem:[#allocation32_spill] sm:$0xff] }
 0x8af   :  { %7541 = vmatpush1.bf16.msra.mxu0 %v11949_v36  ;;  %v9852_v36 = vld [vmem:[#allocation5 + $0x120] ss:$24 sps:$4 sm:$0xff]  }
 0x8b0   :  { %7542 = vmatprep.subr.bf16.mxu0 %v11953_v38  ;;  %7496 = vmatpush1.bf16.msra.mxu1 %v9852_v36  ;;  %v9857_v38 = vld [vmem:[#allocation5 + $0x154] ss:$24 sps:$4 sm:$0xff]  }
 0x8b1   :  { %7497 = vmatprep.subr.bf16.mxu1 %v9857_v38 }
 0x8b3   :  { %7543 = vmatpush1.bf16.msra.mxu0 %v11955_v28  ;;  %v9855_v28 = vld [vmem:[#allocation5 + $0x150] ss:$24 sps:$4 sm:$0xff]  }
 0x8b4   :  { %7544 = vmatprep.subr.bf16.mxu0 %v11959_v47  ;;  %7498 = vmatpush1.bf16.msra.mxu1 %v9855_v28  ;;  %v9860_v47 = vld [vmem:[#allocation5 + $0x184] ss:$24 sps:$4 sm:$0xff]   ;;  %v12810_v28 = vld [vmem:[#allocation34_spill] sm:$0xff] }
 0x8b5   :  { %7499 = vmatprep.subr.bf16.mxu1 %v9860_v47 }
 0x8b7   :  { %7545 = vmatpush1.bf16.msra.mxu0 %v11961_v14  ;;  %v9858_v14 = vld [vmem:[#allocation5 + $0x180] ss:$24 sps:$4 sm:$0xff]  }
 0x8b8   :  { %7546 = vmatprep.subr.bf16.mxu0 %v11967_v50  ;;  %7500 = vmatpush1.bf16.msra.mxu1 %v9858_v14  ;;  %v9861_v50 = vld [vmem:[#allocation5 + $0x1b0] ss:$24 sps:$4 sm:$0xff]  }
 0x8b9   :  { %v12811_v14 = vld [vmem:[#allocation15_spill] sm:$0xff] }
 0x8bb   :  { %7547 = vmatpush1.bf16.msra.mxu0 %v11965_v13  ;;  %v9863_v13 = vld [vmem:[#allocation5 + $0x1b4] ss:$24 sps:$4 sm:$0xff]  }
 0x8bc   :  { %7548 = vmatprep.subr.bf16.mxu0 %v11969_v7  ;;  %7501 = vmatprep.subr.bf16.mxu1 %v9863_v13  ;;  %v9866_v7 = vld [vmem:[#allocation5 + $0x1e4] ss:$24 sps:$4 sm:$0xff]  }
 0x8bd   :  { %7502 = vmatpush1.bf16.msra.mxu1 %v9861_v50 }
 0x8be   :  { %7503 = vmatprep.subr.bf16.mxu1 %v9866_v7 }
 0x8bf   :  { %7549 = vmatpush1.bf16.msra.mxu0 %v11973_v53  ;;  %v9864_v53 = vld [vmem:[#allocation5 + $0x1e0] ss:$24 sps:$4 sm:$0xff]  }
 0x8c0   :  { %7550 = vmatprep.subr.bf16.mxu0 %v11976_v31  ;;  %v9867_v31 = vld [vmem:[#allocation5 + $0x210] ss:$24 sps:$4 sm:$0xff]  }
 0x8c1   :  { %7504 = vmatpush1.bf16.msra.mxu1 %v9864_v53 }
 0x8c3   :  { %7551 = vmatpush1.bf16.msra.mxu0 %v11979_v22  ;;  %v9869_v22 = vld [vmem:[#allocation5 + $0x214] ss:$24 sps:$4 sm:$0xff]  }
 0x8c4   :  { %7552 = vmatprep.subr.bf16.mxu0 %v12803_v35  ;;  %7505 = vmatprep.subr.bf16.mxu1 %v9869_v22  ;;  %v9876_v35 = vld [vmem:[#allocation5 + $0x2a0] ss:$24 sps:$4 sm:$0xff]  }
 0x8c5   :  { %7506 = vmatpush1.bf16.msra.mxu1 %v9867_v31 }
 0x8c6   :  { %7507 = vmatprep.subr.bf16.mxu1 %v9872_v29 }
 0x8c7   :  { %7553 = vmatpush1.bf16.msra.mxu0 %v12804_v51  ;;  %v9881_v51 = vld [vmem:[#allocation5 + $0x2d4] ss:$24 sps:$4 sm:$0xff]  }
 0x8c8   :  { %7554 = vmatprep.subr.bf16.mxu0 %v12805_v16  ;;  %v9879_v16 = vld [vmem:[#allocation5 + $0x2d0] ss:$24 sps:$4 sm:$0xff]  }
 0x8c9   :  { %7508 = vmatpush1.bf16.msra.mxu1 %v9870_v55 }
 0x8ca   :  { %7509 = vmatprep.subr.bf16.mxu1 %v9875_v42 }
 0x8cb   :  { %7555 = vmatpush1.bf16.msra.mxu0 %v12806_v4 }
 0x8cd   :  { %7510 = vmatpush1.bf16.msra.mxu1 %v9873_v40 }
 0x8ce   :  { %7511 = vmatprep.subr.bf16.mxu1 %v9878_v63  ;;  %v12812_v63 = vld [vmem:[#allocation33_spill] sm:$0xff] }
 0x8d1   :  { %7512 = vmatpush1.bf16.msra.mxu1 %v9876_v35 }
 0x8d2   :  { %7513 = vmatprep.subr.bf16.mxu1 %v9881_v51 }
 0x8d5   :  { %7514 = vmatpush1.bf16.msra.mxu1 %v9879_v16 }
 0x8d6   :  { %7565 = vmatprep.subr.bf16.mxu1 %v9884_v48 }
 0x921   :  { %v6762_v5 = vpop.f32.mrb[64].mxu0  ;;  %v6803_v4 = vpop.f32.mrb[56].mxu1 }
 0x922   :  { %v6763_v37 = vadd.f32 %v6762_v5, %v12807_v59  ;;  %v6764_v0 = vpop.f32.mrb[65].mxu0  ;;  %v6805_v12 = vpop.f32.mrb[57].mxu1  ;;  %v6804_v55 = vadd.f32 %v6803_v4, %v12696_v46  ;;  %v12168_v4 = vld [vmem:[%s12512_s10 + $0x68] sm:$0xff] }
 0x923   :  { %v6765_v44 = vadd.f32 %v6764_v0, %v12808_v8  ;;  %v6806_v45 = vadd.f32 %v6805_v12, %v12723_v58  ;;  %v6766_v19 = vpop.f32.mrb[66].mxu0  ;;  %v6807_v25 = vpop.f32.mrb[58].mxu1 }
 0x924   :  { %v6851_v56 = vadd.f32 %v12809_v21, %v6763_v37  ;;  %v6767_v36 = vpop.f32.mrb[67].mxu0  ;;  %v6808_v38 = vpop.f32.mrb[59].mxu1 }
 0x925   :  { %v6858_v47 = vadd.f32 %v12810_v28, %v6765_v44  ;;  %v6872_v13 = vadd.f32 %v12811_v14, %v6806_v45 }
 0x926   :  { %v8812_v50 = vmul.f32 -1.442695, %v6851_v56 }
 0x927   :  { %v8813_v7 = vmul.f32 -1.442695, %v6858_v47  ;;  %v8814_v51 = vmul.f32 -1.442695, %v6872_v13  ;;  %v12814_v13 = vld [vmem:[#allocation43_spill] sm:$0xff] }
 0x928   :  { %10017 = vpow2.f32 %v8812_v50 }
 0x929   :  { %10019 = vpow2.f32 %v8813_v7 }
 0x932   :  { %v10018_v53 = vpop.eup %10017 }
 0x933   :  { %v6855_v31 = vadd.f32 1.0, %v10018_v53  ;;  %v10020_v22 = vpop.eup %10019 }
 0x934   :  { %v6862_v29 = vadd.f32 1.0, %v10020_v22  ;;  %v12815_v22 = vld [vmem:[#allocation44_spill] sm:$0xff] }
 0x935   :  { %10021 = vrcp.f32 %v6855_v31 }
 0x936   :  { %10023 = vrcp.f32 %v6862_v29 }
 0x93f   :  { %v10022_v42 = vpop.eup %10021 }
 0x940   :  { %v6865_v40 = vmul.f32 %v10022_v42, %v6804_v55  ;;  %v10024_v16 = vpop.eup %10023 }
 0x941   :  { %v6868_v48 = vsub.f32 1.0, %v10024_v16  ;;  %v6870_v0 = vmul.f32 %v10024_v16, %v12023_v18 }
 0x942   :  { %v6866_v35 = vadd.f32 %v12812_v63, %v6865_v40 }
 0x944   :  { %10025 = vtanh.f32 %v6866_v35 }
 0x945   :  { %10027 = vpow2.f32 %v8814_v51 }
 0x94e   :  { %v10026_v5 = vpop.eup %10025 }
 0x94f   :  { %v6869_v37 = vmul.f32 %v10026_v5, %v6868_v48  ;;  %v10028_v44 = vpop.eup %10027 }
 0x950   :  { %v6876_v21 = vadd.f32 1.0, %v10028_v44 }
 0x951   :  { %v6871_v12 = vadd.f32 %v6870_v0, %v6869_v37 }
 0x952   :  { %10029 = vrcp.f32 %v6876_v21  ;;  %v9882_v21 = vld [vmem:[#allocation5 + $0x10] ss:$24 sps:$4 sm:$0xff]  }
 0x953   :  { %v12163_v19 = vsel %vm3090_vm13, %v6871_v12, 0.0  ;;  %v12180_v5 = vsel %vm3090_vm13, %v6871_v12, %v12023_v18  ;;  %v9887_v12 = vld [vmem:[#allocation5 + $0x44] ss:$24 sps:$4 sm:$0xff]  }
 0x954   :  { %v7688_v25 = vadd.f32 %v12168_v4, %v12163_v19  ;;  %v6905_v18 = vpack.c.bf16 %v12180_v5, %v12180_v5 }
 0x956   :  { %7689 = vadd.xlane.f32.xlu1 %v7688_v25 }
 0x95c   :  { %v10030_v14 = vpop.eup %10029 }
 0x961   :  { %v6844_v56 = vpop.f32.mrb[68].mxu0 }
 0x962   :  { %v6845_v36 = vadd.f32 %v6844_v56, %v12699_v6  ;;  %v6846_v38 = vpop.f32.mrb[69].mxu0  ;;  %v12196_v56 = vld [vmem:[%s12512_s10 + $0x10] sm:$0xff] }
 0x963   :  { %v6847_v28 = vadd.f32 %v6846_v38, %v12728_v39  ;;  %v6848_v47 = vpop.f32.mrb[70].mxu0  ;;  %v9888_v38 = vld [vmem:[#allocation5 + $0x70] ss:$24 sps:$4 sm:$0xff]  }
 0x964   :  { %v6879_v50 = vadd.f32 %v12814_v13, %v6845_v36  ;;  %v6849_v7 = vpop.f32.mrb[71].mxu0  ;;  %v9890_v36 = vld [vmem:[#allocation5 + $0x74] ss:$24 sps:$4 sm:$0xff]   ;;  %v9891_v47 = vld [vmem:[#allocation5 + $0xa0] ss:$24 sps:$4 sm:$0xff]  }
 0x965   :  { %v6886_v53 = vmul.f32 %v10030_v14, %v6847_v28  ;;  %v9893_v28 = vld [vmem:[#allocation5 + $0xa4] ss:$24 sps:$4 sm:$0xff]   ;;  %v9896_v14 = vld [vmem:[#allocation5 + $0xd4] ss:$24 sps:$4 sm:$0xff]   ;;  %v9894_v13 = vld [vmem:[#allocation5 + $0xd0] ss:$24 sps:$4 sm:$0xff]  }
 0x966   :  { %v8815_v31 = vmul.f32 -1.442695, %v6879_v50  ;;  %v12231_v50 = vpop.xlane.xlu0 %7680 }
 0x967   :  { %v6887_v29 = vadd.f32 %v12815_v22, %v6886_v53  ;;  %v12820_v53 = vld [vmem:[#allocation37_spill] sm:$0xff] }
 0x968   :  { %10031 = vpow2.f32 %v8815_v31 }
 0x96a   :  { %v12234_v22 = vpop.xlane.xlu0 %7686 }
 0x972   :  { %v10032_v55 = vpop.eup %10031 }
 0x973   :  { %v6883_v42 = vadd.f32 1.0, %v10032_v55  ;;  %v7678_v55 = vpop.xlane.xlu0 %7677 }
 0x975   :  { %10033 = vrcp.f32 %v6883_v42 }
 0x976   :  { %10035 = vtanh.f32 %v6887_v29 }
 0x97f   :  { %v10034_v40 = vpop.eup %10033 }
 0x980   :  { %v6889_v63 = vsub.f32 1.0, %v10034_v40  ;;  %v10036_v35 = vpop.eup %10035  ;;  %v6891_v16 = vmul.f32 %v10034_v40, %v12032_v20  ;;  %v7684_v40 = vpop.xlane.xlu1 %7683 }
 0x982   :  { %v6890_v51 = vmul.f32 %v10036_v35, %v6889_v63  ;;  %v7697_v63 = vmul.f32 0.00390625, %v7678_v55  ;;  %v7699_v35 = vmul.f32 0.00390625, %v7684_v40 }
 0x984   :  { %v6892_v48 = vadd.f32 %v6891_v16, %v6890_v51 }
 0x986   :  { %v12184_v0 = vsel %vm3082_vm12, %v6892_v48, 0.0  ;;  %v12189_v44 = vsel %vm3082_vm12, %v6892_v48, %v12032_v20  ;;  %v9885_v20 = vld [vmem:[#allocation5 + $0x40] ss:$24 sps:$4 sm:$0xff]   ;;  %v12240_v48 = vsub.f32 %v12027_v62, %v7697_v63 }
 0x987   :  { %v6906_v25 = vpack.c.bf16 %v12189_v44, %v12189_v44  ;;  %v7673_v45 = vadd.f32 %v12196_v56, %v12184_v0 }
 0x989   :  { %7515 = vmatprep.mubr.bf16.mxu1 %v6906_v25  ;;  %7556 = vmatprep.mubr.bf16.mxu0 %v6906_v25 }
 0x98a   :  { %7516 = vmatmul.mubr.bf16.vlgmr.msra.gmra.mrb[60].mxu1 %v6905_v18  ;;  %7557 = vmatmul.mubr.bf16.vlgmr.msra.gmra.mrb[72].mxu0 %v6905_v18 }
 0x98b   :  { %7566 = vmatpush1.bf16.msra.mxu1 %v9882_v21  ;;  %7597 = vmatprep.mubr.bf16.mxu1 %v6906_v25 }
 0x98c   :  { %7567 = vmatprep.subr.bf16.mxu1 %v9887_v12  ;;  %7674 = vadd.xlane.f32.xlu1 %v7673_v45  ;;  %v12822_v45 = vld [vmem:[#allocation27_spill] sm:$0xff] }
 0x98f   :  { %7568 = vmatpush1.bf16.msra.mxu1 %v9885_v20  ;;  %v12247_v20 = vsub.f32 %v12822_v45, %v7699_v35  ;;  %v7700_v45 = vmul.f32 0.00390625, %v12234_v22  ;;  %v12829_v22 = vld [vmem:[#allocation24_spill] sm:$0xff] }
 0x990   :  { %7569 = vmatprep.subr.bf16.mxu1 %v9890_v36 }
 0x993   :  { %7570 = vmatpush1.bf16.msra.mxu1 %v9888_v38 }
 0x994   :  { %7571 = vmatprep.subr.bf16.mxu1 %v9893_v28 }
 0x997   :  { %7572 = vmatpush1.bf16.msra.mxu1 %v9891_v47 }
 0x998   :  { %7573 = vmatprep.subr.bf16.mxu1 %v9896_v14 }
 0x99b   :  { %7574 = vmatpush1.bf16.msra.mxu1 %v9894_v13 }
 0x99c   :  { %7575 = vmatprep.subr.bf16.mxu1 %v12053_v54 }
 0x99f   :  { %7576 = vmatpush1.bf16.msra.mxu1 %v12056_v3 }
 0x9a0   :  { %7577 = vmatprep.subr.bf16.mxu1 %v12059_v27 }
 0x9a3   :  { %7578 = vmatpush1.bf16.msra.mxu1 %v12062_v26 }
 0x9a4   :  { %7579 = vmatprep.subr.bf16.mxu1 %v12065_v15 }
 0x9a7   :  { %7580 = vmatpush1.bf16.msra.mxu1 %v12068_v43 }
 0x9a8   :  { %7581 = vmatprep.subr.bf16.mxu1 %v12071_v61 }
 0x9ab   :  { %7582 = vmatpush1.bf16.msra.mxu1 %v12074_v10 }
 0x9ac   :  { %7583 = vmatprep.subr.bf16.mxu1 %v12077_v41 }
 0x9af   :  { %7584 = vmatpush1.bf16.msra.mxu1 %v12080_v33  ;;  %v12817_v33 = vld [vmem:[#allocation36_spill] sm:$0xff] }
 0x9b0   :  { %7585 = vmatprep.subr.bf16.mxu1 %v12083_v24 }
 0x9b3   :  { %7586 = vmatpush1.bf16.msra.mxu1 %v12086_v17 }
 0x9b4   :  { %7587 = vmatprep.subr.bf16.mxu1 %v12089_v1 }
 0x9b7   :  { %7588 = vmatpush1.bf16.msra.mxu1 %v12092_v52  ;;  %v12818_v52 = vld [vmem:[#allocation38_spill] sm:$0xff] }
 0x9b8   :  { %7589 = vmatprep.subr.bf16.mxu1 %v12095_v23 }
 0x9bb   :  { %7590 = vmatpush1.bf16.msra.mxu1 %v12098_v49  ;;  %v12819_v49 = vld [vmem:[#allocation11_spill] sm:$0xff] }
 0x9bc   :  { %7591 = vmatprep.subr.bf16.mxu1 %v12101_v9 }
 0x9bf   :  { %7592 = vmatpush1.bf16.msra.mxu1 %v12104_v34 }
 0x9c0   :  { %7593 = vmatprep.subr.bf16.mxu1 %v12107_v57 }
 0x9c3   :  { %7594 = vmatpush1.bf16.msra.mxu1 %v12110_v60 }
 0x9c4   :  { %7595 = vmatprep.subr.bf16.mxu1 %v12113_v11 }
 0x9c7   :  { %7596 = vmatpush1.bf16.msra.mxu1 %v12116_v32 }
 0x9ca   :  { %7598 = vmatmul.mubr.bf16.vlgmr.msra.gmra.mrb[64].mxu1 %v6905_v18  ;;  %v12821_v18 = vld [vmem:[#allocation21_spill] sm:$0xff] }
 0x9cb   :  { %v12244_v12 = vsub.f32 %v12821_v18, %v7699_v35  ;;  %v12297_v35 = vld [vmem:[%s12512_s10] sm:$0xff] }
 0x9e3   :  { %v7690_v37 = vpop.xlane.xlu1 %7689 }
 0x9e4   :  { %v7701_v38 = vmul.f32 0.00390625, %v7690_v37 }
 0xa5d   :  { %v7517_v54 = vpop.f32.mrb[60].mxu1  ;;  %v7558_v3 = vpop.f32.mrb[72].mxu0 }
 0xa5e   :  { %v7518_v27 = vadd.f32 %v7517_v54, %v12807_v59  ;;  %v7519_v26 = vpop.f32.mrb[61].mxu1  ;;  %v7560_v15 = vpop.f32.mrb[73].mxu0  ;;  %v12265_v54 = vld [vmem:[%s12512_s10 + $0x78] sm:$0xff] }
 0xa5f   :  { %v7520_v43 = vadd.f32 %v7519_v26, %v12808_v8  ;;  %v7561_v61 = vadd.f32 %v7560_v15, %v12723_v58  ;;  %v7521_v10 = vpop.f32.mrb[62].mxu1  ;;  %v7562_v41 = vpop.f32.mrb[74].mxu0  ;;  %v7559_v58 = vadd.f32 %v7558_v3, %v12696_v46  ;;  %v12237_v46 = vsub.f32 %v12039_v30, %v7697_v63 }
 0xa60   :  { %v7606_v24 = vadd.f32 %v12817_v33, %v7518_v27  ;;  %v7522_v17 = vpop.f32.mrb[63].mxu1  ;;  %v7563_v1 = vpop.f32.mrb[75].mxu0  ;;  %v7724_v30 = vmul.f32 %v12240_v48, %v12240_v48  ;;  %v7727_v27 = vmul.f32 %v12244_v12, %v12244_v12  ;;  %v7728_v26 = vmul.f32 %v12247_v20, %v12247_v20 }
 0xa61   :  { %v7613_v23 = vadd.f32 %v12818_v52, %v7520_v43  ;;  %v7627_v9 = vadd.f32 %v12819_v49, %v7561_v61  ;;  %v7723_v28 = vmul.f32 %v12237_v46, %v12237_v46  ;;  %v12275_v15 = vsub.f32 %v12163_v19, %v7701_v38  ;;  %v12824_v49 = vld [vmem:[#allocation41_spill] sm:$0xff] }
 0xa62   :  { %v8914_v34 = vmul.f32 -1.442695, %v7606_v24  ;;  %v7747_v10 = vadd.f32 %v7728_v26, %v7727_v27 }
 0xa63   :  { %v8915_v57 = vmul.f32 -1.442695, %v7613_v23  ;;  %v8916_v29 = vmul.f32 -1.442695, %v7627_v9  ;;  %v7741_v61 = vadd.f32 %v7724_v30, %v7723_v28  ;;  %v7731_v41 = vmul.f32 %v12275_v15, %v12275_v15 }
 0xa64   :  { %10037 = vpow2.f32 %v8914_v34  ;;  %v12327_v28 = vsub.f32 %v12006_v2, %v7700_v45  ;;  %v12330_v30 = vsub.f32 %v12829_v22, %v7700_v45 }
 0xa65   :  { %10039 = vpow2.f32 %v8915_v57 }
 0xa66   :  { %v7730_v27 = vmul.f32 %v12330_v30, %v12330_v30 }
 0xa6e   :  { %v10038_v60 = vpop.eup %10037 }
 0xa6f   :  { %v7610_v11 = vadd.f32 1.0, %v10038_v60  ;;  %v10040_v32 = vpop.eup %10039 }
 0xa70   :  { %v7617_v59 = vadd.f32 1.0, %v10040_v32 }
 0xa71   :  { %10041 = vrcp.f32 %v7610_v11  ;;  %v12825_v11 = vld [vmem:[#allocation42_spill] sm:$0xff] }
 0xa72   :  { %10043 = vrcp.f32 %v7617_v59 }
 0xa7b   :  { %v10042_v8 = vpop.eup %10041 }
 0xa7c   :  { %v7620_v7 = vmul.f32 %v10042_v8, %v7559_v58  ;;  %v10044_v42 = vpop.eup %10043 }
 0xa7d   :  { %v7623_v51 = vsub.f32 1.0, %v10044_v42  ;;  %v7625_v21 = vmul.f32 %v10044_v42, %v12180_v5  ;;  %v7698_v42 = vmul.f32 0.00390625, %v12231_v50  ;;  %v12827_v50 = vld [vmem:[#allocation49_spill] sm:$0xff] }
 0xa7e   :  { %v7621_v31 = vadd.f32 %v12820_v53, %v7620_v7  ;;  %v7675_v7 = vpop.xlane.xlu1 %7674 }
 0xa80   :  { %10045 = vtanh.f32 %v7621_v31 }
 0xa81   :  { %10047 = vpow2.f32 %v8916_v29  ;;  %v7696_v29 = vmul.f32 0.00390625, %v7675_v7 }
 0xa8a   :  { %v10046_v16 = vpop.eup %10045 }
 0xa8b   :  { %v7624_v25 = vmul.f32 %v10046_v16, %v7623_v51  ;;  %v10048_v62 = vpop.eup %10047  ;;  %v12300_v51 = vsub.f32 %v12196_v56, %v7696_v29  ;;  %v12303_v16 = vsub.f32 %v12184_v0, %v7696_v29 }
 0xa8c   :  { %v7631_v43 = vadd.f32 1.0, %v10048_v62 }
 0xa8d   :  { %v7626_v36 = vadd.f32 %v7625_v21, %v7624_v25  ;;  %v12308_v25 = vsub.f32 %v12827_v50, %v7698_v42  ;;  %v12828_v21 = vld [vmem:[#allocation61_spill] sm:$0xff]  ;;  %v7722_v56 = vmul.f32 %v12303_v16, %v12303_v16 }
 0xa8e   :  { %10049 = vrcp.f32 %v7631_v43  ;;  %v12311_v18 = vsub.f32 %v12828_v21, %v7698_v42 }
 0xa8f   :  { %v12255_v14 = vsel %vm2323_vm9, %v7626_v36, 0.0  ;;  %v12260_v13 = vsel %vm2323_vm9, %v7626_v36, %v12180_v5  ;;  %v12278_v5 = vsub.f32 %v12168_v4, %v7701_v38  ;;  %v7721_v36 = vmul.f32 %v12300_v51, %v12300_v51 }
 0xa90   :  { %7873 = vadd.xlane.f32.xlu1 %v12260_v13  ;;  %v7691_v3 = vadd.f32 %v12265_v54, %v12255_v14  ;;  %v7725_v38 = vmul.f32 %v12308_v25, %v12308_v25  ;;  %v7726_v47 = vmul.f32 %v12311_v18, %v12311_v18 }
 0xa91   :  { %v7732_v33 = vmul.f32 %v12278_v5, %v12278_v5  ;;  %v7738_v62 = vadd.f32 %v7722_v56, %v7721_v36 }
 0xa92   :  { %7692 = vadd.xlane.f32.xlu0 %v7691_v3  ;;  %v7744_v3 = vadd.f32 %v7726_v47, %v7725_v38 }
 0xa93   :  { %v7753_v24 = vadd.f32 %v7732_v33, %v7731_v41 }
 0xa94   :  { %7742 = vadd.xlane.f32.xlu1 %v7741_v61 }
 0xa98   :  { %7748 = vadd.xlane.f32.xlu1 %v7747_v10  ;;  %v10050_v23 = vpop.eup %10049 }
 0xa9c   :  { %7754 = vadd.xlane.f32.xlu1 %v7753_v24 }
 0xa9d   :  { %v7599_v19 = vpop.f32.mrb[64].mxu1 }
 0xa9e   :  { %v7600_v17 = vadd.f32 %v7599_v19, %v12699_v6  ;;  %v7601_v4 = vpop.f32.mrb[65].mxu1 }
 0xa9f   :  { %v7602_v1 = vadd.f32 %v7601_v4, %v12728_v39  ;;  %v7603_v52 = vpop.f32.mrb[66].mxu1 }
 0xaa0   :  { %v7634_v9 = vadd.f32 %v12824_v49, %v7600_v17  ;;  %v7604_v34 = vpop.f32.mrb[67].mxu1 }
 0xaa1   :  { %v7641_v57 = vmul.f32 %v10050_v23, %v7602_v1 }
 0xaa2   :  { %v8917_v60 = vmul.f32 -1.442695, %v7634_v9 }
 0xaa3   :  { %v7642_v32 = vadd.f32 %v12825_v11, %v7641_v57  ;;  %v7827_v57 = vld [vmem:[%s12509_s7] sm:$0x3] }
 0xaa4   :  { %10051 = vpow2.f32 %v8917_v60  ;;  %v12830_v60 = vld [vmem:[#allocation9_spill] sm:$0xff] }
 0xaae   :  { %v10052_v59 = vpop.eup %10051 }
 0xaaf   :  { %v7638_v58 = vadd.f32 1.0, %v10052_v59 }
 0xab1   :  { %10053 = vrcp.f32 %v7638_v58 }
 0xab2   :  { %10055 = vtanh.f32 %v7642_v32  ;;  %v12831_v32 = vld [vmem:[#allocation10_spill] sm:$0xff] }
 0xab3   :  { %v12364_v7 = vrot.slane %v7827_v57, %v12831_v32 }
 0xabb   :  { %v10054_v8 = vpop.eup %10053 }
 0xabc   :  { %v7644_v6 = vsub.f32 1.0, %v10054_v8  ;;  %v10056_v53 = vpop.eup %10055  ;;  %v7646_v39 = vmul.f32 %v10054_v8, %v12189_v44  ;;  %v12361_v8 = vrot.slane %v7827_v57, %v12830_v60 }
 0xabe   :  { %v7645_v31 = vmul.f32 %v10056_v53, %v7644_v6 }
 0xac0   :  { %v7647_v55 = vadd.f32 %v7646_v39, %v7645_v31 }
 0xac2   :  { %v12292_v63 = vsel %vm2316_vm8, %v7647_v55, 0.0  ;;  %v12321_v0 = vsel %vm2316_vm8, %v7647_v55, %v12189_v44  ;;  %v7729_v44 = vmul.f32 %v12327_v28, %v12327_v28 }
 0xac3   :  { %v7670_v37 = vadd.f32 %v12297_v35, %v12292_v63 }
 0xac4   :  { %v7750_v26 = vadd.f32 %v7730_v27, %v7729_v44 }
 0xac5   :  { %7671 = vadd.xlane.f32.xlu0 %v7670_v37 }
 0xac9   :  { %7899 = vadd.xlane.f32.xlu0 %v12321_v0 }
 0xacd   :  { %7739 = vadd.xlane.f32.xlu0 %v7738_v62 }
 0xad1   :  { %7745 = vadd.xlane.f32.xlu0 %v7744_v3 }
 0xad5   :  { %7751 = vadd.xlane.f32.xlu0 %v7750_v26 }
 0xb1d   :  { %v7874_v2 = vpop.xlane.xlu1 %7873 }
 0xb1e   :  { %v7876_v62 = vmul.f32 0.0078125, %v7874_v2 }
 0xb1f   :  { %v7693_v43 = vpop.xlane.xlu0 %7692 }
 0xb20   :  { %v7702_v61 = vmul.f32 0.00390625, %v7693_v43 }
 0xb21   :  { %v7743_v10 = vpop.xlane.xlu1 %7742 }
 0xb22   :  { %v7761_v41 = vmul.f32 0.00390625, %v7743_v10  ;;  %v12339_v33 = vsub.f32 %v12255_v14, %v7702_v61  ;;  %v12342_v24 = vsub.f32 %v12265_v54, %v7702_v61  ;;  %v7799_v54 = vld [vmem:[%s12508_s6] sm:$0x3]  ;;  %v12413_v61 = vsub.f32 %v12260_v13, %v7876_v62 }
 0xb23   :  { %v12355_v11 = vrot.slane %v7799_v54, %v12830_v60  ;;  %v12358_v59 = vrot.slane %v7799_v54, %v12831_v32 }
 0xb24   :  { %v7769_v19 = vadd.f32 1e-05, %v7761_v41  ;;  %v7733_v17 = vmul.f32 %v12339_v33, %v12339_v33  ;;  %v7734_v4 = vmul.f32 %v12342_v24, %v12342_v24 }
 0xb25   :  { %v7749_v1 = vpop.xlane.xlu1 %7748 }
 0xb26   :  { %10057 = vrsqrt.f32 %v7769_v19  ;;  %v7763_v52 = vmul.f32 0.00390625, %v7749_v1  ;;  %v7756_v23 = vadd.f32 %v7734_v4, %v7733_v17  ;;  %v7878_v17 = vmul.f32 %v12413_v61, %v12413_v61 }
 0xb28   :  { %v7771_v49 = vadd.f32 1e-05, %v7763_v52  ;;  %7757 = vadd.xlane.f32.xlu0 %v7756_v23 }
 0xb29   :  { %v7755_v9 = vpop.xlane.xlu1 %7754 }
 0xb2a   :  { %10059 = vrsqrt.f32 %v7771_v49  ;;  %v7765_v14 = vmul.f32 0.00390625, %v7755_v9 }
 0xb2c   :  { %v7773_v34 = vadd.f32 1e-05, %v7765_v14 }
 0xb2e   :  { %10061 = vrsqrt.f32 %v7773_v34 }
 0xb30   :  { %v10058_v58 = vpop.eup %10057 }
 0xb31   :  { %v7787_v6 = vmul.f32 %v10058_v58, %v12237_v46  ;;  %v7788_v53 = vmul.f32 %v10058_v58, %v12240_v48 }
 0xb33   :  { %v7815_v39 = vmul.f32 %v12355_v11, %v7787_v6  ;;  %v7816_v31 = vmul.f32 %v12358_v59, %v7788_v53 }
 0xb34   :  { %v10060_v29 = vpop.eup %10059 }
 0xb35   :  { %v7843_v55 = vadd.f32 %v12361_v8, %v7815_v39  ;;  %v7844_v42 = vadd.f32 %v12364_v7, %v7816_v31  ;;  %v7791_v40 = vmul.f32 %v10060_v29, %v12244_v12  ;;  %v7792_v37 = vmul.f32 %v10060_v29, %v12247_v20 }
 0xb37   :  { %7859 = vst [vmem:[%s12512_s10 + $0x20] sm:$0xff] %v7843_v55  ;;  %7860 = vst [vmem:[%s12512_s10 + $0x28] sm:$0xff] %v7844_v42  ;;  %v7819_v46 = vmul.f32 %v12355_v11, %v7791_v40  ;;  %v7820_v48 = vmul.f32 %v12358_v59, %v7792_v37 }
 0xb38   :  { %v10062_v50 = vpop.eup %10061 }
 0xb39   :  { %v7847_v21 = vadd.f32 %v12361_v8, %v7819_v46  ;;  %v7848_v45 = vadd.f32 %v12364_v7, %v7820_v48  ;;  %v7795_v12 = vmul.f32 %v10062_v50, %v12275_v15  ;;  %v7796_v20 = vmul.f32 %v10062_v50, %v12278_v5 }
 0xb3b   :  { %7863 = vst [vmem:[%s12512_s10 + $0x40] sm:$0xff] %v7847_v21  ;;  %7864 = vst [vmem:[%s12512_s10 + $0x48] sm:$0xff] %v7848_v45  ;;  %v7823_v36 = vmul.f32 %v12355_v11, %v7795_v12  ;;  %v7824_v56 = vmul.f32 %v12358_v59, %v7796_v20 }
 0xb3d   :  { %v7851_v38 = vadd.f32 %v12361_v8, %v7823_v36  ;;  %v7852_v22 = vadd.f32 %v12364_v7, %v7824_v56 }
 0xb3f   :  { %7867 = vst [vmem:[%s12512_s10 + $0x60] sm:$0xff] %v7851_v38  ;;  %7868 = vst [vmem:[%s12512_s10 + $0x68] sm:$0xff] %v7852_v22 }
 0xb52   :  { %v7672_v15 = vpop.xlane.xlu0 %7671 }
 0xb53   :  { %v7695_v5 = vmul.f32 0.00390625, %v7672_v15 }
 0xb55   :  { %v12403_v47 = vsub.f32 %v12297_v35, %v7695_v5  ;;  %v12406_v3 = vsub.f32 %v12292_v63, %v7695_v5 }
 0xb56   :  { %v7900_v44 = vpop.xlane.xlu0 %7899 }
 0xb57   :  { %v7901_v27 = vmul.f32 0.0078125, %v7900_v44  ;;  %v7719_v26 = vmul.f32 %v12403_v47, %v12403_v47  ;;  %v7720_v43 = vmul.f32 %v12406_v3, %v12406_v3 }
 0xb59   :  { %v12416_v10 = vsub.f32 %v12321_v0, %v7901_v27  ;;  %v7735_v2 = vadd.f32 %v7720_v43, %v7719_v26 }
 0xb5a   :  { %v7740_v35 = vpop.xlane.xlu0 %7739 }
 0xb5b   :  { %v7760_v41 = vmul.f32 0.00390625, %v7740_v35  ;;  %7736 = vadd.xlane.f32.xlu1 %v7735_v2  ;;  %v7903_v63 = vmul.f32 %v12416_v10, %v12416_v10  ;;  %v8919_v2 = vld [vmem:[%s12510_s8] ss:$0 sm:$0xff] }
 0xb5d   :  { %v7768_v19 = vadd.f32 1e-05, %v7760_v41  ;;  %7904 = vadd.xlane.f32.xlu0 %v7903_v63 }
 0xb5e   :  { %v7746_v4 = vpop.xlane.xlu0 %7745 }
 0xb5f   :  { %10063 = vrsqrt.f32 %v7768_v19  ;;  %v7762_v1 = vmul.f32 0.00390625, %v7746_v4  ;;  %7879 = vadd.xlane.f32.xlu1 %v7878_v17  ;;  %v8920_v17 = vld [vmem:[%s12511_s9] ss:$0 sm:$0xff] }
 0xb61   :  { %v7770_v13 = vadd.f32 1e-05, %v7762_v1 }
 0xb62   :  { %v7752_v52 = vpop.xlane.xlu0 %7751 }
 0xb63   :  { %10065 = vrsqrt.f32 %v7770_v13  ;;  %v7764_v0 = vmul.f32 0.00390625, %v7752_v52 }
 0xb65   :  { %v7772_v23 = vadd.f32 1e-05, %v7764_v0 }
 0xb67   :  { %10067 = vrsqrt.f32 %v7772_v23 }
 0xb69   :  { %v10064_v49 = vpop.eup %10063 }
 0xb6a   :  { %v7785_v9 = vmul.f32 %v10064_v49, %v12300_v51  ;;  %v7786_v14 = vmul.f32 %v10064_v49, %v12303_v16 }
 0xb6c   :  { %v7813_v54 = vmul.f32 %v12355_v11, %v7785_v9  ;;  %v7814_v34 = vmul.f32 %v12358_v59, %v7786_v14 }
 0xb6d   :  { %v10066_v57 = vpop.eup %10065 }
 0xb6e   :  { %v7841_v60 = vadd.f32 %v12361_v8, %v7813_v54  ;;  %v7842_v32 = vadd.f32 %v12364_v7, %v7814_v34  ;;  %v7789_v58 = vmul.f32 %v10066_v57, %v12308_v25  ;;  %v7790_v6 = vmul.f32 %v10066_v57, %v12311_v18 }
 0xb70   :  { %7857 = vst [vmem:[%s12512_s10 + $0x10] sm:$0xff] %v7841_v60  ;;  %7858 = vst [vmem:[%s12512_s10 + $0x18] sm:$0xff] %v7842_v32  ;;  %v7817_v51 = vmul.f32 %v12355_v11, %v7789_v58  ;;  %v7818_v16 = vmul.f32 %v12358_v59, %v7790_v6 }
 0xb71   :  { %v10068_v53 = vpop.eup %10067 }
 0xb72   :  { %v7845_v39 = vadd.f32 %v12361_v8, %v7817_v51  ;;  %v7846_v31 = vadd.f32 %v12364_v7, %v7818_v16  ;;  %v7793_v25 = vmul.f32 %v10068_v53, %v12327_v28  ;;  %v7794_v18 = vmul.f32 %v10068_v53, %v12330_v30 }
 0xb74   :  { %7861 = vst [vmem:[%s12512_s10 + $0x30] sm:$0xff] %v7845_v39  ;;  %7862 = vst [vmem:[%s12512_s10 + $0x38] sm:$0xff] %v7846_v31  ;;  %v7821_v29 = vmul.f32 %v12355_v11, %v7793_v25  ;;  %v7822_v55 = vmul.f32 %v12358_v59, %v7794_v18 }
 0xb76   :  { %v7849_v42 = vadd.f32 %v12361_v8, %v7821_v29  ;;  %v7850_v40 = vadd.f32 %v12364_v7, %v7822_v55 }
 0xb78   :  { %7865 = vst [vmem:[%s12512_s10 + $0x50] sm:$0xff] %v7849_v42  ;;  %7866 = vst [vmem:[%s12512_s10 + $0x58] sm:$0xff] %v7850_v40 }
 0xbb5   :  { %v7758_v28 = vpop.xlane.xlu0 %7757 }
 0xbb6   :  { %v7766_v30 = vmul.f32 0.00390625, %v7758_v28 }
 0xbb8   :  { %v7774_v37 = vadd.f32 1e-05, %v7766_v30 }
 0xbba   :  { %10069 = vrsqrt.f32 %v7774_v37 }
 0xbc4   :  { %v10070_v46 = vpop.eup %10069 }
 0xbc5   :  { %v7797_v48 = vmul.f32 %v10070_v46, %v12339_v33  ;;  %v7798_v50 = vmul.f32 %v10070_v46, %v12342_v24 }
 0xbc7   :  { %v7825_v21 = vmul.f32 %v12355_v11, %v7797_v48  ;;  %v7826_v45 = vmul.f32 %v12358_v59, %v7798_v50 }
 0xbc9   :  { %v7853_v12 = vadd.f32 %v12361_v8, %v7825_v21  ;;  %v7854_v20 = vadd.f32 %v12364_v7, %v7826_v45 }
 0xbcb   :  { %7869 = vst [vmem:[%s12512_s10 + $0x70] sm:$0xff] %v7853_v12  ;;  %7870 = vst [vmem:[%s12512_s10 + $0x78] sm:$0xff] %v7854_v20 }
 0xbe8   :  { %v7737_v36 = vpop.xlane.xlu1 %7736 }
 0xbe9   :  { %v7759_v33 = vmul.f32 0.00390625, %v7737_v36 }
 0xbea   :  { %v7905_v56 = vpop.xlane.xlu0 %7904 }
 0xbeb   :  { %v7767_v24 = vadd.f32 1e-05, %v7759_v33  ;;  %v7906_v38 = vmul.f32 0.0078125, %v7905_v56 }
 0xbec   :  { %v7880_v22 = vpop.xlane.xlu1 %7879 }
 0xbed   :  { %10071 = vrsqrt.f32 %v7767_v24  ;;  %v7907_v15 = vadd.f32 1e-05, %v7906_v38  ;;  %v7881_v5 = vmul.f32 0.0078125, %v7880_v22 }
 0xbef   :  { %10073 = vrsqrt.f32 %v7907_v15  ;;  %v7882_v62 = vadd.f32 1e-05, %v7881_v5 }
 0xbf1   :  { %10075 = vrsqrt.f32 %v7882_v62 }
 0xbf7   :  { %v10072_v44 = vpop.eup %10071 }
 0xbf8   :  { %v7783_v27 = vmul.f32 %v10072_v44, %v12403_v47  ;;  %v7784_v26 = vmul.f32 %v10072_v44, %v12406_v3 }
 0xbf9   :  { %v10074_v43 = vpop.eup %10073 }
 0xbfa   :  { %v7811_v35 = vmul.f32 %v12355_v11, %v7783_v27  ;;  %v7812_v41 = vmul.f32 %v12358_v59, %v7784_v26  ;;  %v7909_v63 = vmul.f32 %v10074_v43, %v12416_v10 }
 0xbfb   :  { %v10076_v19 = vpop.eup %10075 }
 0xbfc   :  { %v7839_v47 = vadd.f32 %v12361_v8, %v7811_v35  ;;  %v7840_v3 = vadd.f32 %v12364_v7, %v7812_v41  ;;  %v7910_v4 = vmul.f32 %v8919_v2, %v7909_v63  ;;  %v7884_v1 = vmul.f32 %v10076_v19, %v12413_v61 }
 0xbfe   :  { %7855 = vst [vmem:[%s12512_s10] sm:$0xff] %v7839_v47  ;;  %7856 = vst [vmem:[%s12512_s10 + $0x8] sm:$0xff] %v7840_v3  ;;  %v7911_v11 = vadd.f32 %v8920_v17, %v7910_v4  ;;  %v7891_v59 = vmul.f32 %v8919_v2, %v7884_v1 }
 0xc00   :  { %8921 = vst [vmem:[%s12514_s12 + $0x8] sm:$0xff] %v7911_v11  ;;  %7916 = vst [vmem:[%s12513_s11 + $0x8] sm:$0xff] %v7911_v11  ;;  %v7898_v8 = vadd.f32 %v8920_v17, %v7891_v59 }
 0xc02   :  { %7912 = vst [vmem:[%s12514_s12] sm:$0xff] %v7898_v8  ;;  %7915 = vst [vmem:[%s12513_s11] sm:$0xff] %v7898_v8 }
 0xc03   :  { %7929 = vsyncpa [#allocation4], 1 }
 0xc04   :  { %7930 = vsyncpa [#allocation6], 1 }

</bundles_post_ra>
